<compile_context>
chip_gen: v7x
topology: tpu7x:2x2x1
jax: 0.10.0
libtpu: 0.0.40
codegen_flags: <defaults>
</compile_context>

<pallas_src>
import functools

import jax
import jax.numpy as jnp
import numpy as np
from jax import lax
from jax.experimental import pallas as pl
from jax.experimental.pallas import tpu as pltpu


# ----------------------------------------------------------------------------- fused kernel
def _swa_kernel(q_ref, k_ref, v_ref,
                w_in_ref, w_in_t_ref, b_in_c_ref, b_in_r_ref,
                gamma_c_ref, beta_c_ref, gamma_r_ref, beta_r_ref,
                mask_ref, hmask_k_ref, hmask_v_ref, seg_ref, segt_ref,
                w_out_ref, b_out_ref,
                o_ref, aim_ref,
                *, wq, hp, wp, eps, scale):
    f32 = jnp.float32
    E, P = q_ref.shape
    S9 = hp * wp
    R_pad = seg_ref.shape[1]
    ph, pw = hp // 2, wp // 2
    center = ph * wp + pw

    # ---------------- query: 1x1 conv + LayerNorm over channels (channel-major) ----------
    q = jnp.dot(w_in_ref[...], q_ref[...], preferred_element_type=f32) + b_in_c_ref[...]
    q_mu = jnp.mean(q, axis=0, keepdims=True)
    q_c = q - q_mu
    q_var = jnp.mean(q_c * q_c, axis=0, keepdims=True)
    q_ln = q_c * lax.rsqrt(q_var + eps) * gamma_c_ref[...] + beta_c_ref[...]        # (E, P)

    # ---------------- keys: 1x1 conv + per-pixel LayerNorm on head-replicated rows --------
    # k_ref rows are s*R_pad + (h*N + n); conv is ONE matmul, LN is a per-row lane reduce.
    k = jnp.dot(k_ref[...], w_in_t_ref[...], preferred_element_type=f32) + b_in_r_ref[...]
    k_mu = jnp.mean(k, axis=1, keepdims=True)
    k_c = k - k_mu
    k_var = jnp.mean(k_c * k_c, axis=1, keepdims=True)
    k_ln = (k_c * lax.rsqrt(k_var + eps) * gamma_r_ref[...] + beta_r_ref[...]) \
        * hmask_k_ref[...]                                                            # (S9*R_pad, E)

    # ---------------- values: 1x1 conv on head-replicated columns + head/pad mask ---------
    v_bd = (jnp.dot(w_in_ref[...], v_ref[...], preferred_element_type=f32)
            + b_in_c_ref[...]) * hmask_v_ref[...]                                     # (E, S9*R_pad)

    # ---------------- sliding-window shift: XLU roll + (1, P) boundary mask ----------------
    def shifted(x, off, midx):
        y = x if off == 0 else pltpu.roll(x, (-off) % P, 1)
        if midx != center:                       # centre offset has an all-ones mask
            y = y * mask_ref[pl.ds(midx, 1), :]
        return y

    # ---------------- correlation: 9 accumulating MXU matmuls ------------------------------
    scores = jnp.zeros((R_pad, P), f32)
    for dy in range(hp):
        for dx in range(wp):
            s = dy * wp + dx
            off = (dy - ph) * wq + (dx - pw)
            q_s = shifted(q_ln, off, s)                              # (E, P)
            k_s = k_ln[s * R_pad:(s + 1) * R_pad, :]                 # aligned sublane slice
            scores = scores + jnp.dot(k_s, q_s, preferred_element_type=f32)
    scores = scores * scale                                          # (R_pad, P)

    # exp with a global shift (constant -> cancels exactly in sn * en) + both normalisations
    m = jnp.max(jnp.max(scores, axis=1, keepdims=True), axis=0, keepdims=True)
    a = jnp.exp(scores - m)
    row_max = jnp.max(a, axis=1, keepdims=True)                      # per (head, exemplar)
    ex_sum = jnp.dot(seg_ref[...], a, preferred_element_type=f32)    # per-head sum over exemplars
    denom = jnp.dot(segt_ref[...], ex_sum, preferred_element_type=f32)
    w_attn = (a * a) / (row_max * denom)                             # sn * en
    # TODO(synk): nn.Dropout treated as eval-mode identity (no RNG dropout in kernel).

    # ---------------- aggregation: rolled attention slabs -> scratch -> ONE matmul ---------
    for dy in range(hp):
        for dx in range(wp):
            s = dy * wp + dx
            off = (ph - dy) * wq + (pw - dx)
            aim_ref[pl.ds(s * R_pad, R_pad), :] = shifted(w_attn, off, S9 - 1 - s)
    feat = jnp.dot(v_bd, aim_ref[...], preferred_element_type=f32)   # (E, P)

    # ---------------- out_conv -------------------------------------------------------------
    out = jnp.dot(w_out_ref[...], feat, preferred_element_type=f32) + b_out_ref[...]
    o_ref[...] = out.astype(o_ref.dtype)


# ----------------------------------------------------------------------------- wrapper
def swa_forward(query, keys, values, params, *, head):
    W_in, b_in, gamma, beta, W_out, b_out = params
    _, E, Hq, Wq = query.shape
    N, _, Hp, Wp = keys.shape
    assert Hp % 2 == 1 and Wp % 2 == 1, "module requires odd exemplar patches"
    hd = E // head
    P = Hq * Wq
    S9 = Hp * Wp
    R = head * N
    R_pad = ((R + 7) // 8) * 8
    ph, pw = Hp // 2, Wp // 2
    scale = float(E * Hp * Wp) ** (-0.5)

    # ---- data layouts (pure layout plumbing; no compute hoisted out of the kernel) ----
    q_cm = query.reshape(E, P)                                       # (E, P) channel-major

    k_nse = jnp.transpose(keys, (0, 2, 3, 1)).reshape(N, S9, E)      # [n, s, e]
    k_rse = jnp.tile(k_nse[None], (head, 1, 1, 1)).reshape(R, S9, E)  # row r = h*N + n
    k_rse = jnp.pad(k_rse, ((0, R_pad - R), (0, 0), (0, 0)))
    k_exp = jnp.transpose(k_rse, (1, 0, 2)).reshape(S9 * R_pad, E)   # row s*R_pad + r

    v_esn = jnp.transpose(values, (1, 2, 3, 0)).reshape(E, S9, N)    # [e, s, n]
    v_esr = jnp.tile(v_esn, (1, 1, head))                            # col h*N + n per pixel
    v_esr = jnp.pad(v_esr, ((0, 0), (0, 0), (0, R_pad - R)))
    v_exp = v_esr.reshape(E, S9 * R_pad)                             # col s*R_pad + r

    # ---- host constants: 9 boundary masks + head/pad masks + exemplar-sum matrices ----
    yy = np.repeat(np.arange(Hq), Wq)
    xx = np.tile(np.arange(Wq), Hq)
    masks = np.zeros((S9, P), np.float32)
    for dy in range(Hp):
        for dx in range(Wp):
            oy, ox = dy - ph, dx - pw
            ok = (yy + oy >= 0) & (yy + oy < Hq) & (xx + ox >= 0) & (xx + ox < Wq)
            masks[dy * Wp + dx] = ok.astype(np.float32)

    r_idx = np.arange(R_pad)
    valid = r_idx < R
    hmask = (((np.arange(E)[None, :] // hd) == (r_idx[:, None] // N))
             & valid[:, None]).astype(np.float32)                    # (R_pad, E)
    hmask_k = np.tile(hmask, (S9, 1))                                # (S9*R_pad, E)
    hmask_v = np.tile(hmask.T, (1, S9))                              # (E, S9*R_pad)
    seg = (((r_idx[None, :] // N) == np.arange(head)[:, None])
           & valid[None, :]).astype(np.float32)                      # (head, R_pad)
    segt = np.zeros((R_pad, head), np.float32)
    segt[r_idx[valid], r_idx[valid] // N] = 1.0
    segt[~valid, 0] = 1.0                                            # pad rows -> finite denominator

    kernel = functools.partial(_swa_kernel, wq=Wq, hp=Hp, wp=Wp, eps=1e-5, scale=scale)
    out = pl.pallas_call(
        kernel,
        out_shape=jax.ShapeDtypeStruct((E, P), jnp.float32),
        scratch_shapes=[pltpu.VMEM((S9 * R_pad, P), jnp.float32)],
        compiler_params=pltpu.CompilerParams(vmem_limit_bytes=32 * 1024 * 1024),
    )(q_cm, k_exp, v_exp,
      W_in, W_in.T, b_in.reshape(E, 1), b_in.reshape(1, E),
      gamma.reshape(E, 1), beta.reshape(E, 1), gamma.reshape(1, E), beta.reshape(1, E),
      jnp.asarray(masks), jnp.asarray(hmask_k), jnp.asarray(hmask_v),
      jnp.asarray(seg), jnp.asarray(segt),
      W_out, b_out.reshape(E, 1))
    return out.reshape(1, E, Hq, Wq)


# ----------------------------------------------------------------------------- pure-JAX reference
def reference_forward(query, keys, values, params, head):
    W_in, b_in, gamma, beta, W_out, b_out = params
    E = query.shape[1]
    hd = E // head
    _, _, Hq, Wq = query.shape
    N, _, Hp, Wp = keys.shape
    ph, pw = Hp // 2, Wp // 2

    def conv1x1(x, W, b):
        return jnp.einsum('oc,nchw->nohw', W, x) + b[None, :, None, None]

    def lnorm(x):
        xt = jnp.moveaxis(x, 1, -1)
        mu = jnp.mean(xt, -1, keepdims=True)
        var = jnp.mean((xt - mu) ** 2, -1, keepdims=True)
        y = (xt - mu) / jnp.sqrt(var + 1e-5) * gamma + beta
        return jnp.moveaxis(y, -1, 1)

    q = lnorm(conv1x1(query, W_in, b_in)).reshape(head, hd, Hq, Wq)
    k = lnorm(conv1x1(keys, W_in, b_in)).reshape(N, head, hd, Hp, Wp)
    v = conv1x1(values, W_in, b_in).reshape(N, head, hd, Hp, Wp)

    qp = jnp.pad(q, ((0, 0), (0, 0), (ph, ph), (pw, pw)))
    attn = jnp.zeros((head, N, Hq, Wq), jnp.float32)
    for dy in range(Hp):
        for dx in range(Wp):
            attn = attn + jnp.einsum('hcyx,nhc->hnyx',
                                     qp[:, :, dy:dy + Hq, dx:dx + Wq],
                                     k[:, :, :, dy, dx])
    attn = jnp.exp(attn * float(E * Hp * Wp) ** (-0.5))
    sn = attn / jnp.max(attn, axis=(2, 3), keepdims=True)
    en = attn / jnp.sum(attn, axis=1, keepdims=True)
    w_attn = sn * en
    wpd = jnp.pad(w_attn, ((0, 0), (0, 0), (ph, ph), (pw, pw)))
    feat = jnp.zeros((head, hd, Hq, Wq), jnp.float32)
    for dy in range(Hp):
        for dx in range(Wp):
            feat = feat + jnp.einsum('hnyx,nhc->hcyx',
                                     wpd[:, :, Hp - 1 - dy:Hp - 1 - dy + Hq,
                                         Wp - 1 - dx:Wp - 1 - dx + Wq],
                                     v[:, :, :, dy, dx])
    feat = feat.reshape(1, E, Hq, Wq)
    return conv1x1(feat, W_out, b_out)


# ----------------------------------------------------------------------------- main
if __name__ == "__main__":
    E, head = 32, 4          # embed_dim, heads (head_dim = 8)
    Hq = Wq = 16             # query feature map
    Hp = Wp = 3              # exemplar patch (odd, as the module's view() requires)
    N = 3                    # number of exemplars

    key = jax.random.PRNGKey(0)
    ks = jax.random.split(key, 9)
    W_in = jax.random.normal(ks[0], (E, E), jnp.float32) / np.sqrt(E)
    b_in = 0.1 * jax.random.normal(ks[1], (E,), jnp.float32)
    gamma = 1.0 + 0.1 * jax.random.normal(ks[2], (E,), jnp.float32)
    beta = 0.1 * jax.random.normal(ks[3], (E,), jnp.float32)
    W_out = jax.random.normal(ks[4], (E, E), jnp.float32) / np.sqrt(E)
    b_out = 0.1 * jax.random.normal(ks[5], (E,), jnp.float32)
    params = (W_in, b_in, gamma, beta, W_out, b_out)

    query = jax.random.normal(ks[6], (1, E, Hq, Wq), jnp.float32)
    keys_in = jax.random.normal(ks[7], (N, E, Hp, Wp), jnp.float32)
    values_in = jax.random.normal(ks[8], (N, E, Hp, Wp), jnp.float32)

    fwd = jax.jit(functools.partial(swa_forward, head=head))
    out = jax.block_until_ready(fwd(query, keys_in, values_in, params))

    ref = reference_forward(query, keys_in, values_in, params, head)
    err = float(np.max(np.abs(np.asarray(out) - np.asarray(ref))))
    if not np.allclose(np.asarray(out), np.asarray(ref), rtol=2e-3, atol=2e-3):
        raise AssertionError(f"Pallas output mismatch vs reference (max abs diff {err:.3e})")
    print("KERNEL_OK")
</pallas_src>

<mosaic_0001>
module attributes {stable_mosaic.version = 11 : i64} {
  func.func @_swa_kernel(%arg0: memref<32x256xf32, #tpu.memory_space<vmem>>, %arg1: memref<144x32xf32, #tpu.memory_space<vmem>>, %arg2: memref<32x144xf32, #tpu.memory_space<vmem>>, %arg3: memref<32x32xf32, #tpu.memory_space<vmem>>, %arg4: memref<32x32xf32, #tpu.memory_space<vmem>>, %arg5: memref<32x1xf32, #tpu.memory_space<vmem>>, %arg6: memref<1x32xf32, #tpu.memory_space<vmem>>, %arg7: memref<32x1xf32, #tpu.memory_space<vmem>>, %arg8: memref<32x1xf32, #tpu.memory_space<vmem>>, %arg9: memref<1x32xf32, #tpu.memory_space<vmem>>, %arg10: memref<1x32xf32, #tpu.memory_space<vmem>>, %arg11: memref<9x256xf32, #tpu.memory_space<vmem>>, %arg12: memref<144x32xf32, #tpu.memory_space<vmem>>, %arg13: memref<32x144xf32, #tpu.memory_space<vmem>>, %arg14: memref<4x16xf32, #tpu.memory_space<vmem>>, %arg15: memref<16x4xf32, #tpu.memory_space<vmem>>, %arg16: memref<32x32xf32, #tpu.memory_space<vmem>>, %arg17: memref<32x1xf32, #tpu.memory_space<vmem>>, %arg18: memref<32x256xf32, #tpu.memory_space<vmem>>, %arg19: memref<144x256xf32, #tpu.memory_space<vmem>>) attributes {dimension_semantics = [], scalar_prefetch = 0 : i64, scratch_operands = 1 : i64, tpu.core_type = #tpu.core_type<tc>} {
    %c0 = arith.constant 0 : index
    %c0_0 = arith.constant 0 : index
    %0 = vector.load %arg3[%c0, %c0_0] : memref<32x32xf32, #tpu.memory_space<vmem>>, vector<32x32xf32>
    %c0_1 = arith.constant 0 : index
    %c0_2 = arith.constant 0 : index
    %1 = vector.load %arg0[%c0_1, %c0_2] : memref<32x256xf32, #tpu.memory_space<vmem>>, vector<32x256xf32>
    %cst = arith.constant dense<0.000000e+00> : vector<32x256xf32>
    %2 = tpu.matmul %0, %1, %cst {dimension_numbers = #tpu.dot_dimension_numbers<[1], [0], [0], [1], [0, 0, 1, 1], [], []>} : vector<32x32xf32>, vector<32x256xf32>, vector<32x256xf32> -> vector<32x256xf32>
    %c0_3 = arith.constant 0 : index
    %c0_4 = arith.constant 0 : index
    %3 = vector.load %arg5[%c0_3, %c0_4] : memref<32x1xf32, #tpu.memory_space<vmem>>, vector<32x1xf32>
    %4 = vector.broadcast %3 : vector<32x1xf32> to vector<32x256xf32>
    %5 = arith.addf %2, %4 : vector<32x256xf32>
    %cst_5 = arith.constant dense<0.000000e+00> : vector<256xf32>
    %6 = vector.multi_reduction <add>, %5, %cst_5 [0] : vector<32x256xf32> to vector<256xf32>
    %7 = vector.shape_cast %6 : vector<256xf32> to vector<1x256xf32>
    %cst_6 = arith.constant 3.200000e+01 : f32
    %8 = vector.broadcast %cst_6 : f32 to vector<1x256xf32>
    %9 = arith.divf %7, %8 : vector<1x256xf32>
    %10 = vector.broadcast %9 : vector<1x256xf32> to vector<32x256xf32>
    %11 = arith.subf %5, %10 : vector<32x256xf32>
    %12 = arith.mulf %11, %11 : vector<32x256xf32>
    %cst_7 = arith.constant dense<0.000000e+00> : vector<256xf32>
    %13 = vector.multi_reduction <add>, %12, %cst_7 [0] : vector<32x256xf32> to vector<256xf32>
    %14 = vector.shape_cast %13 : vector<256xf32> to vector<1x256xf32>
    %cst_8 = arith.constant 3.200000e+01 : f32
    %15 = vector.broadcast %cst_8 : f32 to vector<1x256xf32>
    %16 = arith.divf %14, %15 : vector<1x256xf32>
    %cst_9 = arith.constant 9.99999974E-6 : f32
    %17 = vector.broadcast %cst_9 : f32 to vector<1x256xf32>
    %18 = arith.addf %16, %17 : vector<1x256xf32>
    %19 = math.rsqrt %18 : vector<1x256xf32>
    %20 = vector.broadcast %19 : vector<1x256xf32> to vector<32x256xf32>
    %21 = arith.mulf %11, %20 : vector<32x256xf32>
    %c0_10 = arith.constant 0 : index
    %c0_11 = arith.constant 0 : index
    %22 = vector.load %arg7[%c0_10, %c0_11] : memref<32x1xf32, #tpu.memory_space<vmem>>, vector<32x1xf32>
    %23 = vector.broadcast %22 : vector<32x1xf32> to vector<32x256xf32>
    %24 = arith.mulf %21, %23 : vector<32x256xf32>
    %c0_12 = arith.constant 0 : index
    %c0_13 = arith.constant 0 : index
    %25 = vector.load %arg8[%c0_12, %c0_13] : memref<32x1xf32, #tpu.memory_space<vmem>>, vector<32x1xf32>
    %26 = vector.broadcast %25 : vector<32x1xf32> to vector<32x256xf32>
    %27 = arith.addf %24, %26 : vector<32x256xf32>
    %c0_14 = arith.constant 0 : index
    %c0_15 = arith.constant 0 : index
    %28 = vector.load %arg1[%c0_14, %c0_15] : memref<144x32xf32, #tpu.memory_space<vmem>>, vector<144x32xf32>
    %c0_16 = arith.constant 0 : index
    %c0_17 = arith.constant 0 : index
    %29 = vector.load %arg4[%c0_16, %c0_17] : memref<32x32xf32, #tpu.memory_space<vmem>>, vector<32x32xf32>
    %cst_18 = arith.constant dense<0.000000e+00> : vector<144x32xf32>
    %30 = tpu.matmul %28, %29, %cst_18 {dimension_numbers = #tpu.dot_dimension_numbers<[1], [0], [0], [1], [0, 0, 1, 1], [], []>} : vector<144x32xf32>, vector<32x32xf32>, vector<144x32xf32> -> vector<144x32xf32>
    %c0_19 = arith.constant 0 : index
    %c0_20 = arith.constant 0 : index
    %31 = vector.load %arg6[%c0_19, %c0_20] : memref<1x32xf32, #tpu.memory_space<vmem>>, vector<1x32xf32>
    %32 = vector.broadcast %31 : vector<1x32xf32> to vector<144x32xf32>
    %33 = arith.addf %30, %32 : vector<144x32xf32>
    %cst_21 = arith.constant dense<0.000000e+00> : vector<144xf32>
    %34 = vector.multi_reduction <add>, %33, %cst_21 [1] : vector<144x32xf32> to vector<144xf32>
    %35 = vector.shape_cast %34 : vector<144xf32> to vector<144x1xf32>
    %cst_22 = arith.constant 3.200000e+01 : f32
    %36 = vector.broadcast %cst_22 : f32 to vector<144x1xf32>
    %37 = arith.divf %35, %36 : vector<144x1xf32>
    %38 = vector.broadcast %37 : vector<144x1xf32> to vector<144x32xf32>
    %39 = arith.subf %33, %38 : vector<144x32xf32>
    %40 = arith.mulf %39, %39 : vector<144x32xf32>
    %cst_23 = arith.constant dense<0.000000e+00> : vector<144xf32>
    %41 = vector.multi_reduction <add>, %40, %cst_23 [1] : vector<144x32xf32> to vector<144xf32>
    %42 = vector.shape_cast %41 : vector<144xf32> to vector<144x1xf32>
    %cst_24 = arith.constant 3.200000e+01 : f32
    %43 = vector.broadcast %cst_24 : f32 to vector<144x1xf32>
    %44 = arith.divf %42, %43 : vector<144x1xf32>
    %cst_25 = arith.constant 9.99999974E-6 : f32
    %45 = vector.broadcast %cst_25 : f32 to vector<144x1xf32>
    %46 = arith.addf %44, %45 : vector<144x1xf32>
    %47 = math.rsqrt %46 : vector<144x1xf32>
    %48 = vector.broadcast %47 : vector<144x1xf32> to vector<144x32xf32>
    %49 = arith.mulf %39, %48 : vector<144x32xf32>
    %c0_26 = arith.constant 0 : index
    %c0_27 = arith.constant 0 : index
    %50 = vector.load %arg9[%c0_26, %c0_27] : memref<1x32xf32, #tpu.memory_space<vmem>>, vector<1x32xf32>
    %51 = vector.broadcast %50 : vector<1x32xf32> to vector<144x32xf32>
    %52 = arith.mulf %49, %51 : vector<144x32xf32>
    %c0_28 = arith.constant 0 : index
    %c0_29 = arith.constant 0 : index
    %53 = vector.load %arg10[%c0_28, %c0_29] : memref<1x32xf32, #tpu.memory_space<vmem>>, vector<1x32xf32>
    %54 = vector.broadcast %53 : vector<1x32xf32> to vector<144x32xf32>
    %55 = arith.addf %52, %54 : vector<144x32xf32>
    %c0_30 = arith.constant 0 : index
    %c0_31 = arith.constant 0 : index
    %56 = vector.load %arg12[%c0_30, %c0_31] : memref<144x32xf32, #tpu.memory_space<vmem>>, vector<144x32xf32>
    %57 = arith.mulf %55, %56 : vector<144x32xf32>
    %c0_32 = arith.constant 0 : index
    %c0_33 = arith.constant 0 : index
    %58 = vector.load %arg3[%c0_32, %c0_33] : memref<32x32xf32, #tpu.memory_space<vmem>>, vector<32x32xf32>
    %c0_34 = arith.constant 0 : index
    %c0_35 = arith.constant 0 : index
    %59 = vector.load %arg2[%c0_34, %c0_35] : memref<32x144xf32, #tpu.memory_space<vmem>>, vector<32x144xf32>
    %cst_36 = arith.constant dense<0.000000e+00> : vector<32x144xf32>
    %60 = tpu.matmul %58, %59, %cst_36 {dimension_numbers = #tpu.dot_dimension_numbers<[1], [0], [0], [1], [0, 0, 1, 1], [], []>} : vector<32x32xf32>, vector<32x144xf32>, vector<32x144xf32> -> vector<32x144xf32>
    %c0_37 = arith.constant 0 : index
    %c0_38 = arith.constant 0 : index
    %61 = vector.load %arg5[%c0_37, %c0_38] : memref<32x1xf32, #tpu.memory_space<vmem>>, vector<32x1xf32>
    %62 = vector.broadcast %61 : vector<32x1xf32> to vector<32x144xf32>
    %63 = arith.addf %60, %62 : vector<32x144xf32>
    %c0_39 = arith.constant 0 : index
    %c0_40 = arith.constant 0 : index
    %64 = vector.load %arg13[%c0_39, %c0_40] : memref<32x144xf32, #tpu.memory_space<vmem>>, vector<32x144xf32>
    %65 = arith.mulf %63, %64 : vector<32x144xf32>
    %cst_41 = arith.constant 0.000000e+00 : f32
    %66 = vector.broadcast %cst_41 : f32 to vector<16x256xf32>
    %c17_i32 = arith.constant 17 : i32
    %67 = tpu.dynamic_rotate %27 by %c17_i32 dim 1 : vector<32x256xf32>, i32 -> vector<32x256xf32>
    %c0_42 = arith.constant 0 : index
    %c0_43 = arith.constant 0 : index
    %68 = vector.load %arg11[%c0_42, %c0_43] : memref<9x256xf32, #tpu.memory_space<vmem>>, vector<1x256xf32>
    %69 = vector.broadcast %68 : vector<1x256xf32> to vector<32x256xf32>
    %70 = arith.mulf %67, %69 : vector<32x256xf32>
    %71 = vector.extract_strided_slice %57 {offsets = [0, 0], sizes = [16, 32], strides = [1, 1]} : vector<144x32xf32> to vector<16x32xf32>
    %cst_44 = arith.constant dense<0.000000e+00> : vector<16x256xf32>
    %72 = tpu.matmul %71, %70, %cst_44 {dimension_numbers = #tpu.dot_dimension_numbers<[1], [0], [0], [1], [0, 0, 1, 1], [], []>} : vector<16x32xf32>, vector<32x256xf32>, vector<16x256xf32> -> vector<16x256xf32>
    %73 = arith.addf %66, %72 : vector<16x256xf32>
    %c16_i32 = arith.constant 16 : i32
    %74 = tpu.dynamic_rotate %27 by %c16_i32 dim 1 : vector<32x256xf32>, i32 -> vector<32x256xf32>
    %c1 = arith.constant 1 : index
    %c0_45 = arith.constant 0 : index
    %75 = vector.load %arg11[%c1, %c0_45] : memref<9x256xf32, #tpu.memory_space<vmem>>, vector<1x256xf32>
    %76 = vector.broadcast %75 : vector<1x256xf32> to vector<32x256xf32>
    %77 = arith.mulf %74, %76 : vector<32x256xf32>
    %78 = vector.extract_strided_slice %57 {offsets = [16, 0], sizes = [16, 32], strides = [1, 1]} : vector<144x32xf32> to vector<16x32xf32>
    %cst_46 = arith.constant dense<0.000000e+00> : vector<16x256xf32>
    %79 = tpu.matmul %78, %77, %cst_46 {dimension_numbers = #tpu.dot_dimension_numbers<[1], [0], [0], [1], [0, 0, 1, 1], [], []>} : vector<16x32xf32>, vector<32x256xf32>, vector<16x256xf32> -> vector<16x256xf32>
    %80 = arith.addf %73, %79 : vector<16x256xf32>
    %c15_i32 = arith.constant 15 : i32
    %81 = tpu.dynamic_rotate %27 by %c15_i32 dim 1 : vector<32x256xf32>, i32 -> vector<32x256xf32>
    %c2 = arith.constant 2 : index
    %c0_47 = arith.constant 0 : index
    %82 = vector.load %arg11[%c2, %c0_47] : memref<9x256xf32, #tpu.memory_space<vmem>>, vector<1x256xf32>
    %83 = vector.broadcast %82 : vector<1x256xf32> to vector<32x256xf32>
    %84 = arith.mulf %81, %83 : vector<32x256xf32>
    %85 = vector.extract_strided_slice %57 {offsets = [32, 0], sizes = [16, 32], strides = [1, 1]} : vector<144x32xf32> to vector<16x32xf32>
    %cst_48 = arith.constant dense<0.000000e+00> : vector<16x256xf32>
    %86 = tpu.matmul %85, %84, %cst_48 {dimension_numbers = #tpu.dot_dimension_numbers<[1], [0], [0], [1], [0, 0, 1, 1], [], []>} : vector<16x32xf32>, vector<32x256xf32>, vector<16x256xf32> -> vector<16x256xf32>
    %87 = arith.addf %80, %86 : vector<16x256xf32>
    %c1_i32 = arith.constant 1 : i32
    %88 = tpu.dynamic_rotate %27 by %c1_i32 dim 1 : vector<32x256xf32>, i32 -> vector<32x256xf32>
    %c3 = arith.constant 3 : index
    %c0_49 = arith.constant 0 : index
    %89 = vector.load %arg11[%c3, %c0_49] : memref<9x256xf32, #tpu.memory_space<vmem>>, vector<1x256xf32>
    %90 = vector.broadcast %89 : vector<1x256xf32> to vector<32x256xf32>
    %91 = arith.mulf %88, %90 : vector<32x256xf32>
    %92 = vector.extract_strided_slice %57 {offsets = [48, 0], sizes = [16, 32], strides = [1, 1]} : vector<144x32xf32> to vector<16x32xf32>
    %cst_50 = arith.constant dense<0.000000e+00> : vector<16x256xf32>
    %93 = tpu.matmul %92, %91, %cst_50 {dimension_numbers = #tpu.dot_dimension_numbers<[1], [0], [0], [1], [0, 0, 1, 1], [], []>} : vector<16x32xf32>, vector<32x256xf32>, vector<16x256xf32> -> vector<16x256xf32>
    %94 = arith.addf %87, %93 : vector<16x256xf32>
    %95 = vector.extract_strided_slice %57 {offsets = [64, 0], sizes = [16, 32], strides = [1, 1]} : vector<144x32xf32> to vector<16x32xf32>
    %cst_51 = arith.constant dense<0.000000e+00> : vector<16x256xf32>
    %96 = tpu.matmul %95, %27, %cst_51 {dimension_numbers = #tpu.dot_dimension_numbers<[1], [0], [0], [1], [0, 0, 1, 1], [], []>} : vector<16x32xf32>, vector<32x256xf32>, vector<16x256xf32> -> vector<16x256xf32>
    %97 = arith.addf %94, %96 : vector<16x256xf32>
    %c255_i32 = arith.constant 255 : i32
    %98 = tpu.dynamic_rotate %27 by %c255_i32 dim 1 : vector<32x256xf32>, i32 -> vector<32x256xf32>
    %c5 = arith.constant 5 : index
    %c0_52 = arith.constant 0 : index
    %99 = vector.load %arg11[%c5, %c0_52] : memref<9x256xf32, #tpu.memory_space<vmem>>, vector<1x256xf32>
    %100 = vector.broadcast %99 : vector<1x256xf32> to vector<32x256xf32>
    %101 = arith.mulf %98, %100 : vector<32x256xf32>
    %102 = vector.extract_strided_slice %57 {offsets = [80, 0], sizes = [16, 32], strides = [1, 1]} : vector<144x32xf32> to vector<16x32xf32>
    %cst_53 = arith.constant dense<0.000000e+00> : vector<16x256xf32>
    %103 = tpu.matmul %102, %101, %cst_53 {dimension_numbers = #tpu.dot_dimension_numbers<[1], [0], [0], [1], [0, 0, 1, 1], [], []>} : vector<16x32xf32>, vector<32x256xf32>, vector<16x256xf32> -> vector<16x256xf32>
    %104 = arith.addf %97, %103 : vector<16x256xf32>
    %c241_i32 = arith.constant 241 : i32
    %105 = tpu.dynamic_rotate %27 by %c241_i32 dim 1 : vector<32x256xf32>, i32 -> vector<32x256xf32>
    %c6 = arith.constant 6 : index
    %c0_54 = arith.constant 0 : index
    %106 = vector.load %arg11[%c6, %c0_54] : memref<9x256xf32, #tpu.memory_space<vmem>>, vector<1x256xf32>
    %107 = vector.broadcast %106 : vector<1x256xf32> to vector<32x256xf32>
    %108 = arith.mulf %105, %107 : vector<32x256xf32>
    %109 = vector.extract_strided_slice %57 {offsets = [96, 0], sizes = [16, 32], strides = [1, 1]} : vector<144x32xf32> to vector<16x32xf32>
    %cst_55 = arith.constant dense<0.000000e+00> : vector<16x256xf32>
    %110 = tpu.matmul %109, %108, %cst_55 {dimension_numbers = #tpu.dot_dimension_numbers<[1], [0], [0], [1], [0, 0, 1, 1], [], []>} : vector<16x32xf32>, vector<32x256xf32>, vector<16x256xf32> -> vector<16x256xf32>
    %111 = arith.addf %104, %110 : vector<16x256xf32>
    %c240_i32 = arith.constant 240 : i32
    %112 = tpu.dynamic_rotate %27 by %c240_i32 dim 1 : vector<32x256xf32>, i32 -> vector<32x256xf32>
    %c7 = arith.constant 7 : index
    %c0_56 = arith.constant 0 : index
    %113 = vector.load %arg11[%c7, %c0_56] : memref<9x256xf32, #tpu.memory_space<vmem>>, vector<1x256xf32>
    %114 = vector.broadcast %113 : vector<1x256xf32> to vector<32x256xf32>
    %115 = arith.mulf %112, %114 : vector<32x256xf32>
    %116 = vector.extract_strided_slice %57 {offsets = [112, 0], sizes = [16, 32], strides = [1, 1]} : vector<144x32xf32> to vector<16x32xf32>
    %cst_57 = arith.constant dense<0.000000e+00> : vector<16x256xf32>
    %117 = tpu.matmul %116, %115, %cst_57 {dimension_numbers = #tpu.dot_dimension_numbers<[1], [0], [0], [1], [0, 0, 1, 1], [], []>} : vector<16x32xf32>, vector<32x256xf32>, vector<16x256xf32> -> vector<16x256xf32>
    %118 = arith.addf %111, %117 : vector<16x256xf32>
    %c239_i32 = arith.constant 239 : i32
    %119 = tpu.dynamic_rotate %27 by %c239_i32 dim 1 : vector<32x256xf32>, i32 -> vector<32x256xf32>
    %c8 = arith.constant 8 : index
    %c0_58 = arith.constant 0 : index
    %120 = vector.load %arg11[%c8, %c0_58] : memref<9x256xf32, #tpu.memory_space<vmem>>, vector<1x256xf32>
    %121 = vector.broadcast %120 : vector<1x256xf32> to vector<32x256xf32>
    %122 = arith.mulf %119, %121 : vector<32x256xf32>
    %123 = vector.extract_strided_slice %57 {offsets = [128, 0], sizes = [16, 32], strides = [1, 1]} : vector<144x32xf32> to vector<16x32xf32>
    %cst_59 = arith.constant dense<0.000000e+00> : vector<16x256xf32>
    %124 = tpu.matmul %123, %122, %cst_59 {dimension_numbers = #tpu.dot_dimension_numbers<[1], [0], [0], [1], [0, 0, 1, 1], [], []>} : vector<16x32xf32>, vector<32x256xf32>, vector<16x256xf32> -> vector<16x256xf32>
    %125 = arith.addf %118, %124 : vector<16x256xf32>
    %cst_60 = arith.constant 0.0589255653 : f32
    %126 = vector.broadcast %cst_60 : f32 to vector<16x256xf32>
    %127 = arith.mulf %125, %126 : vector<16x256xf32>
    %cst_61 = arith.constant dense<0xFF800000> : vector<16xf32>
    %128 = vector.multi_reduction <maximumf>, %127, %cst_61 [1] : vector<16x256xf32> to vector<16xf32>
    %129 = vector.shape_cast %128 : vector<16xf32> to vector<16x1xf32>
    %cst_62 = arith.constant dense<0xFF800000> : vector<1xf32>
    %130 = vector.multi_reduction <maximumf>, %129, %cst_62 [0] : vector<16x1xf32> to vector<1xf32>
    %131 = vector.shape_cast %130 : vector<1xf32> to vector<1x1xf32>
    %132 = vector.broadcast %131 : vector<1x1xf32> to vector<16x256xf32>
    %133 = arith.subf %127, %132 : vector<16x256xf32>
    %134 = math.exp %133 : vector<16x256xf32>
    %cst_63 = arith.constant dense<0xFF800000> : vector<16xf32>
    %135 = vector.multi_reduction <maximumf>, %134, %cst_63 [1] : vector<16x256xf32> to vector<16xf32>
    %136 = vector.shape_cast %135 : vector<16xf32> to vector<16x1xf32>
    %c0_64 = arith.constant 0 : index
    %c0_65 = arith.constant 0 : index
    %137 = vector.load %arg14[%c0_64, %c0_65] : memref<4x16xf32, #tpu.memory_space<vmem>>, vector<4x16xf32>
    %cst_66 = arith.constant dense<0.000000e+00> : vector<4x256xf32>
    %138 = tpu.matmul %137, %134, %cst_66 {dimension_numbers = #tpu.dot_dimension_numbers<[1], [0], [0], [1], [0, 0, 1, 1], [], []>} : vector<4x16xf32>, vector<16x256xf32>, vector<4x256xf32> -> vector<4x256xf32>
    %c0_67 = arith.constant 0 : index
    %c0_68 = arith.constant 0 : index
    %139 = vector.load %arg15[%c0_67, %c0_68] : memref<16x4xf32, #tpu.memory_space<vmem>>, vector<16x4xf32>
    %cst_69 = arith.constant dense<0.000000e+00> : vector<16x256xf32>
    %140 = tpu.matmul %139, %138, %cst_69 {dimension_numbers = #tpu.dot_dimension_numbers<[1], [0], [0], [1], [0, 0, 1, 1], [], []>} : vector<16x4xf32>, vector<4x256xf32>, vector<16x256xf32> -> vector<16x256xf32>
    %141 = arith.mulf %134, %134 : vector<16x256xf32>
    %142 = vector.broadcast %136 : vector<16x1xf32> to vector<16x256xf32>
    %143 = arith.mulf %142, %140 : vector<16x256xf32>
    %144 = arith.divf %141, %143 : vector<16x256xf32>
    %c239_i32_70 = arith.constant 239 : i32
    %145 = tpu.dynamic_rotate %144 by %c239_i32_70 dim 1 : vector<16x256xf32>, i32 -> vector<16x256xf32>
    %c8_71 = arith.constant 8 : index
    %c0_72 = arith.constant 0 : index
    %146 = vector.load %arg11[%c8_71, %c0_72] : memref<9x256xf32, #tpu.memory_space<vmem>>, vector<1x256xf32>
    %147 = vector.broadcast %146 : vector<1x256xf32> to vector<16x256xf32>
    %148 = arith.mulf %145, %147 : vector<16x256xf32>
    %c0_73 = arith.constant 0 : index
    %c0_74 = arith.constant 0 : index
    %149 = vector.load %arg19[%c0_73, %c0_74] : memref<144x256xf32, #tpu.memory_space<vmem>>, vector<16x256xf32>
    tpu.vector_store %arg19[%c0_73, %c0_74], %148 {strides = array<i32>} : memref<144x256xf32, #tpu.memory_space<vmem>>, vector<16x256xf32>,
    %c240_i32_75 = arith.constant 240 : i32
    %150 = tpu.dynamic_rotate %144 by %c240_i32_75 dim 1 : vector<16x256xf32>, i32 -> vector<16x256xf32>
    %c7_76 = arith.constant 7 : index
    %c0_77 = arith.constant 0 : index
    %151 = vector.load %arg11[%c7_76, %c0_77] : memref<9x256xf32, #tpu.memory_space<vmem>>, vector<1x256xf32>
    %152 = vector.broadcast %151 : vector<1x256xf32> to vector<16x256xf32>
    %153 = arith.mulf %150, %152 : vector<16x256xf32>
    %c16 = arith.constant 16 : index
    %c0_78 = arith.constant 0 : index
    %154 = vector.load %arg19[%c16, %c0_78] : memref<144x256xf32, #tpu.memory_space<vmem>>, vector<16x256xf32>
    tpu.vector_store %arg19[%c16, %c0_78], %153 {strides = array<i32>} : memref<144x256xf32, #tpu.memory_space<vmem>>, vector<16x256xf32>,
    %c241_i32_79 = arith.constant 241 : i32
    %155 = tpu.dynamic_rotate %144 by %c241_i32_79 dim 1 : vector<16x256xf32>, i32 -> vector<16x256xf32>
    %c6_80 = arith.constant 6 : index
    %c0_81 = arith.constant 0 : index
    %156 = vector.load %arg11[%c6_80, %c0_81] : memref<9x256xf32, #tpu.memory_space<vmem>>, vector<1x256xf32>
    %157 = vector.broadcast %156 : vector<1x256xf32> to vector<16x256xf32>
    %158 = arith.mulf %155, %157 : vector<16x256xf32>
    %c32 = arith.constant 32 : index
    %c0_82 = arith.constant 0 : index
    %159 = vector.load %arg19[%c32, %c0_82] : memref<144x256xf32, #tpu.memory_space<vmem>>, vector<16x256xf32>
    tpu.vector_store %arg19[%c32, %c0_82], %158 {strides = array<i32>} : memref<144x256xf32, #tpu.memory_space<vmem>>, vector<16x256xf32>,
    %c255_i32_83 = arith.constant 255 : i32
    %160 = tpu.dynamic_rotate %144 by %c255_i32_83 dim 1 : vector<16x256xf32>, i32 -> vector<16x256xf32>
    %c5_84 = arith.constant 5 : index
    %c0_85 = arith.constant 0 : index
    %161 = vector.load %arg11[%c5_84, %c0_85] : memref<9x256xf32, #tpu.memory_space<vmem>>, vector<1x256xf32>
    %162 = vector.broadcast %161 : vector<1x256xf32> to vector<16x256xf32>
    %163 = arith.mulf %160, %162 : vector<16x256xf32>
    %c48 = arith.constant 48 : index
    %c0_86 = arith.constant 0 : index
    %164 = vector.load %arg19[%c48, %c0_86] : memref<144x256xf32, #tpu.memory_space<vmem>>, vector<16x256xf32>
    tpu.vector_store %arg19[%c48, %c0_86], %163 {strides = array<i32>} : memref<144x256xf32, #tpu.memory_space<vmem>>, vector<16x256xf32>,
    %c64 = arith.constant 64 : index
    %c0_87 = arith.constant 0 : index
    %165 = vector.load %arg19[%c64, %c0_87] : memref<144x256xf32, #tpu.memory_space<vmem>>, vector<16x256xf32>
    tpu.vector_store %arg19[%c64, %c0_87], %144 {strides = array<i32>} : memref<144x256xf32, #tpu.memory_space<vmem>>, vector<16x256xf32>,
    %c1_i32_88 = arith.constant 1 : i32
    %166 = tpu.dynamic_rotate %144 by %c1_i32_88 dim 1 : vector<16x256xf32>, i32 -> vector<16x256xf32>
    %c3_89 = arith.constant 3 : index
    %c0_90 = arith.constant 0 : index
    %167 = vector.load %arg11[%c3_89, %c0_90] : memref<9x256xf32, #tpu.memory_space<vmem>>, vector<1x256xf32>
    %168 = vector.broadcast %167 : vector<1x256xf32> to vector<16x256xf32>
    %169 = arith.mulf %166, %168 : vector<16x256xf32>
    %c80 = arith.constant 80 : index
    %c0_91 = arith.constant 0 : index
    %170 = vector.load %arg19[%c80, %c0_91] : memref<144x256xf32, #tpu.memory_space<vmem>>, vector<16x256xf32>
    tpu.vector_store %arg19[%c80, %c0_91], %169 {strides = array<i32>} : memref<144x256xf32, #tpu.memory_space<vmem>>, vector<16x256xf32>,
    %c15_i32_92 = arith.constant 15 : i32
    %171 = tpu.dynamic_rotate %144 by %c15_i32_92 dim 1 : vector<16x256xf32>, i32 -> vector<16x256xf32>
    %c2_93 = arith.constant 2 : index
    %c0_94 = arith.constant 0 : index
    %172 = vector.load %arg11[%c2_93, %c0_94] : memref<9x256xf32, #tpu.memory_space<vmem>>, vector<1x256xf32>
    %173 = vector.broadcast %172 : vector<1x256xf32> to vector<16x256xf32>
    %174 = arith.mulf %171, %173 : vector<16x256xf32>
    %c96 = arith.constant 96 : index
    %c0_95 = arith.constant 0 : index
    %175 = vector.load %arg19[%c96, %c0_95] : memref<144x256xf32, #tpu.memory_space<vmem>>, vector<16x256xf32>
    tpu.vector_store %arg19[%c96, %c0_95], %174 {strides = array<i32>} : memref<144x256xf32, #tpu.memory_space<vmem>>, vector<16x256xf32>,
    %c16_i32_96 = arith.constant 16 : i32
    %176 = tpu.dynamic_rotate %144 by %c16_i32_96 dim 1 : vector<16x256xf32>, i32 -> vector<16x256xf32>
    %c1_97 = arith.constant 1 : index
    %c0_98 = arith.constant 0 : index
    %177 = vector.load %arg11[%c1_97, %c0_98] : memref<9x256xf32, #tpu.memory_space<vmem>>, vector<1x256xf32>
    %178 = vector.broadcast %177 : vector<1x256xf32> to vector<16x256xf32>
    %179 = arith.mulf %176, %178 : vector<16x256xf32>
    %c112 = arith.constant 112 : index
    %c0_99 = arith.constant 0 : index
    %180 = vector.load %arg19[%c112, %c0_99] : memref<144x256xf32, #tpu.memory_space<vmem>>, vector<16x256xf32>
    tpu.vector_store %arg19[%c112, %c0_99], %179 {strides = array<i32>} : memref<144x256xf32, #tpu.memory_space<vmem>>, vector<16x256xf32>,
    %c17_i32_100 = arith.constant 17 : i32
    %181 = tpu.dynamic_rotate %144 by %c17_i32_100 dim 1 : vector<16x256xf32>, i32 -> vector<16x256xf32>
    %c0_101 = arith.constant 0 : index
    %c0_102 = arith.constant 0 : index
    %182 = vector.load %arg11[%c0_101, %c0_102] : memref<9x256xf32, #tpu.memory_space<vmem>>, vector<1x256xf32>
    %183 = vector.broadcast %182 : vector<1x256xf32> to vector<16x256xf32>
    %184 = arith.mulf %181, %183 : vector<16x256xf32>
    %c128 = arith.constant 128 : index
    %c0_103 = arith.constant 0 : index
    %185 = vector.load %arg19[%c128, %c0_103] : memref<144x256xf32, #tpu.memory_space<vmem>>, vector<16x256xf32>
    tpu.vector_store %arg19[%c128, %c0_103], %184 {strides = array<i32>} : memref<144x256xf32, #tpu.memory_space<vmem>>, vector<16x256xf32>,
    %c0_104 = arith.constant 0 : index
    %c0_105 = arith.constant 0 : index
    %186 = vector.load %arg19[%c0_104, %c0_105] : memref<144x256xf32, #tpu.memory_space<vmem>>, vector<144x256xf32>
    %cst_106 = arith.constant dense<0.000000e+00> : vector<32x256xf32>
    %187 = tpu.matmul %65, %186, %cst_106 {dimension_numbers = #tpu.dot_dimension_numbers<[1], [0], [0], [1], [0, 0, 1, 1], [], []>} : vector<32x144xf32>, vector<144x256xf32>, vector<32x256xf32> -> vector<32x256xf32>
    %c0_107 = arith.constant 0 : index
    %c0_108 = arith.constant 0 : index
    %188 = vector.load %arg16[%c0_107, %c0_108] : memref<32x32xf32, #tpu.memory_space<vmem>>, vector<32x32xf32>
    %cst_109 = arith.constant dense<0.000000e+00> : vector<32x256xf32>
    %189 = tpu.matmul %188, %187, %cst_109 {dimension_numbers = #tpu.dot_dimension_numbers<[1], [0], [0], [1], [0, 0, 1, 1], [], []>} : vector<32x32xf32>, vector<32x256xf32>, vector<32x256xf32> -> vector<32x256xf32>
    %c0_110 = arith.constant 0 : index
    %c0_111 = arith.constant 0 : index
    %190 = vector.load %arg17[%c0_110, %c0_111] : memref<32x1xf32, #tpu.memory_space<vmem>>, vector<32x1xf32>
    %191 = vector.broadcast %190 : vector<32x1xf32> to vector<32x256xf32>
    %192 = arith.addf %189, %191 : vector<32x256xf32>
    %c0_112 = arith.constant 0 : index
    %c0_113 = arith.constant 0 : index
    %193 = vector.load %arg18[%c0_112, %c0_113] : memref<32x256xf32, #tpu.memory_space<vmem>>, vector<32x256xf32>
    tpu.vector_store %arg18[%c0_112, %c0_113], %192 {strides = array<i32>} : memref<32x256xf32, #tpu.memory_space<vmem>>, vector<32x256xf32>,
    return
  }
}

</mosaic_0001>

<bundles_post_ra>
// kernel: tile.15
= control target key start
LH: loop header
LB: loop body
LE: loop exit
PB: predicated region body
PF: predicated region fallthrough
CT: control target
= control target key end

     0   :  { %vm181_vm0 = vcmask 261120   ;;  %s724_s0 = inlined_call_operand.vmem [shape: f32[32,9,4,3], index: 0, kind: input, shape index: {}]   ;;  %s725_s1 = inlined_call_operand.vmem [shape: f32[32,9,12], index: 1, kind: output, shape index: {}]  }
   0x1   :  { %v392_v0 = vld [vmem:[%s724_s0 + $0x8c] sm:$0xf]  ;;  %v393_v1 = vld [vmem:[%s724_s0 + $0x88] sm:$0xf]  ;;  %v394_v2 = vld [vmem:[%s724_s0 + $0x84] sm:$0xf] }
   0x2   :  { %8 = vst [vmem:[#allocation0 + $0x118] sm:$0xf] %v392_v0  ;;  %13 = vst [vmem:[#allocation0 + $0x110] sm:$0xf] %v393_v1  ;;  %v395_v3 = vld [vmem:[%s724_s0 + $0x80] sm:$0xf] }
   0x3   :  { %18 = vst [vmem:[#allocation0 + $0x108] sm:$0xf] %v394_v2  ;;  %v396_v4 = vld [vmem:[%s724_s0 + $0x7c] sm:$0xf]  ;;  %v397_v5 = vld [vmem:[%s724_s0 + $0x78] sm:$0xf] }
   0x4   :  { %23 = vst [vmem:[#allocation0 + $0x100] sm:$0xf] %v395_v3  ;;  %28 = vst [vmem:[#allocation0 + $0xf8] sm:$0xf] %v396_v4  ;;  %v398_v6 = vld [vmem:[%s724_s0 + $0x74] sm:$0xf] }
   0x5   :  { %33 = vst [vmem:[#allocation0 + $0xf0] sm:$0xf] %v397_v5  ;;  %v399_v7 = vld [vmem:[%s724_s0 + $0x70] sm:$0xf]  ;;  %v400_v8 = vld [vmem:[%s724_s0 + $0x6c] sm:$0xf] }
   0x6   :  { %38 = vst [vmem:[#allocation0 + $0xe8] sm:$0xf] %v398_v6  ;;  %43 = vst [vmem:[#allocation0 + $0xe0] sm:$0xf] %v399_v7  ;;  %v401_v9 = vld [vmem:[%s724_s0 + $0x68] sm:$0xf] }
   0x7   :  { %48 = vst [vmem:[#allocation0 + $0xd8] sm:$0xf] %v400_v8  ;;  %v402_v10 = vld [vmem:[%s724_s0 + $0x64] sm:$0xf]  ;;  %v403_v11 = vld [vmem:[%s724_s0 + $0x60] sm:$0xf] }
   0x8   :  { %53 = vst [vmem:[#allocation0 + $0xd0] sm:$0xf] %v401_v9  ;;  %58 = vst [vmem:[#allocation0 + $0xc8] sm:$0xf] %v402_v10  ;;  %v404_v12 = vld [vmem:[%s724_s0 + $0x5c] sm:$0xf] }
   0x9   :  { %63 = vst [vmem:[#allocation0 + $0xc0] sm:$0xf] %v403_v11  ;;  %v405_v13 = vld [vmem:[%s724_s0 + $0x58] sm:$0xf]  ;;  %v406_v14 = vld [vmem:[%s724_s0 + $0x54] sm:$0xf] }
   0xa   :  { %68 = vst [vmem:[#allocation0 + $0xb8] sm:$0xf] %v404_v12  ;;  %73 = vst [vmem:[#allocation0 + $0xb0] sm:$0xf] %v405_v13  ;;  %v407_v15 = vld [vmem:[%s724_s0 + $0x50] sm:$0xf] }
   0xb   :  { %78 = vst [vmem:[#allocation0 + $0xa8] sm:$0xf] %v406_v14  ;;  %v408_v16 = vld [vmem:[%s724_s0 + $0x4c] sm:$0xf]  ;;  %v409_v17 = vld [vmem:[%s724_s0 + $0x48] sm:$0xf] }
   0xc   :  { %83 = vst [vmem:[#allocation0 + $0xa0] sm:$0xf] %v407_v15  ;;  %88 = vst [vmem:[#allocation0 + $0x98] sm:$0xf] %v408_v16  ;;  %v410_v18 = vld [vmem:[%s724_s0 + $0x44] sm:$0xf] }
   0xd   :  { %93 = vst [vmem:[#allocation0 + $0x90] sm:$0xf] %v409_v17  ;;  %v411_v19 = vld [vmem:[%s724_s0 + $0x40] sm:$0xf]  ;;  %v412_v20 = vld [vmem:[%s724_s0 + $0x3c] sm:$0xf] }
   0xe   :  { %98 = vst [vmem:[#allocation0 + $0x88] sm:$0xf] %v410_v18  ;;  %103 = vst [vmem:[#allocation0 + $0x80] sm:$0xf] %v411_v19  ;;  %v413_v21 = vld [vmem:[%s724_s0 + $0x38] sm:$0xf] }
   0xf   :  { %108 = vst [vmem:[#allocation0 + $0x78] sm:$0xf] %v412_v20  ;;  %v414_v22 = vld [vmem:[%s724_s0 + $0x34] sm:$0xf]  ;;  %v415_v23 = vld [vmem:[%s724_s0 + $0x30] sm:$0xf] }
  0x10   :  { %113 = vst [vmem:[#allocation0 + $0x70] sm:$0xf] %v413_v21  ;;  %118 = vst [vmem:[#allocation0 + $0x68] sm:$0xf] %v414_v22  ;;  %v416_v24 = vld [vmem:[%s724_s0 + $0x2c] sm:$0xf] }
  0x11   :  { %123 = vst [vmem:[#allocation0 + $0x60] sm:$0xf] %v415_v23  ;;  %v417_v25 = vld [vmem:[%s724_s0 + $0x28] sm:$0xf]  ;;  %v418_v26 = vld [vmem:[%s724_s0 + $0x24] sm:$0xf] }
  0x12   :  { %128 = vst [vmem:[#allocation0 + $0x58] sm:$0xf] %v416_v24  ;;  %133 = vst [vmem:[#allocation0 + $0x50] sm:$0xf] %v417_v25  ;;  %v419_v27 = vld [vmem:[%s724_s0 + $0x20] sm:$0xf] }
  0x13   :  { %138 = vst [vmem:[#allocation0 + $0x48] sm:$0xf] %v418_v26  ;;  %v420_v28 = vld [vmem:[%s724_s0 + $0x1c] sm:$0xf]  ;;  %v421_v29 = vld [vmem:[%s724_s0 + $0x18] sm:$0xf] }
  0x14   :  { %143 = vst [vmem:[#allocation0 + $0x40] sm:$0xf] %v419_v27  ;;  %148 = vst [vmem:[#allocation0 + $0x38] sm:$0xf] %v420_v28  ;;  %v422_v30 = vld [vmem:[%s724_s0 + $0x14] sm:$0xf] }
  0x15   :  { %153 = vst [vmem:[#allocation0 + $0x30] sm:$0xf] %v421_v29  ;;  %v423_v31 = vld [vmem:[%s724_s0 + $0x10] sm:$0xf]  ;;  %v424_v32 = vld [vmem:[%s724_s0 + $0xc] sm:$0xf] }
  0x16   :  { %158 = vst [vmem:[#allocation0 + $0x28] sm:$0xf] %v422_v30  ;;  %163 = vst [vmem:[#allocation0 + $0x20] sm:$0xf] %v423_v31  ;;  %v425_v33 = vld [vmem:[%s724_s0 + $0x8] sm:$0xf] }
  0x17   :  { %168 = vst [vmem:[#allocation0 + $0x18] sm:$0xf] %v424_v32  ;;  %v426_v34 = vld [vmem:[%s724_s0 + $0x4] sm:$0xf]  ;;  %v178_v35 = vld [vmem:[%s724_s0] sm:$0xf] }
  0x18   :  { %173 = vst [vmem:[#allocation0 + $0x10] sm:$0xf] %v425_v33  ;;  %177 = vst [vmem:[#allocation0 + $0x8] sm:$0xf] %v426_v34  ;;  %v284_v36 = vld [vmem:[#allocation0 + $0xa8] sm:$0x7]  }
  0x19   :  { %179 = vst [vmem:[#allocation0] sm:$0xf] %v178_v35  ;;  %v289_v37 = vld [vmem:[#allocation0 + $0xb0] sm:$0x7]   ;;  %v274_v39 = vld [vmem:[#allocation0 + $0x98] sm:$0x7]  }
  0x1a   :  { %v269_v38 = vld [vmem:[#allocation0 + $0x90] sm:$0x7]   ;;  %v279_v40 = vld [vmem:[#allocation0 + $0xa0] sm:$0x7]   ;;  %447 = vst.msk [vmem:[%s725_s1 + $0x53] sm:$0x7] %vm181_vm0, %v284_v36  }
  0x1b   :  { %448 = vst.msk [vmem:[%s725_s1 + $0x56] sm:$0x7] %vm181_vm0, %v289_v37   ;;  %v254_v41 = vld [vmem:[#allocation0 + $0x78] sm:$0x7]   ;;  %v259_v42 = vld [vmem:[#allocation0 + $0x80] sm:$0x7]  }
  0x1c   :  { %v264_v43 = vld [vmem:[#allocation0 + $0x88] sm:$0x7]   ;;  %444 = vst.msk [vmem:[%s725_s1 + $0x46] sm:$0x7] %vm181_vm0, %v269_v38   ;;  %445 = vst.msk [vmem:[%s725_s1 + $0x49] sm:$0x7] %vm181_vm0, %v274_v39  }
  0x1d   :  { %446 = vst.msk [vmem:[%s725_s1 + $0x50] sm:$0x7] %vm181_vm0, %v279_v40   ;;  %v239_v44 = vld [vmem:[#allocation0 + $0x60] sm:$0x7]   ;;  %v244_v45 = vld [vmem:[#allocation0 + $0x68] sm:$0x7]  }
  0x1e   :  { %v249_v46 = vld [vmem:[#allocation0 + $0x70] sm:$0x7]   ;;  %441 = vst.msk [vmem:[%s725_s1 + $0x39] sm:$0x7] %vm181_vm0, %v254_v41   ;;  %442 = vst.msk [vmem:[%s725_s1 + $0x40] sm:$0x7] %vm181_vm0, %v259_v42  }
  0x1f   :  { %443 = vst.msk [vmem:[%s725_s1 + $0x43] sm:$0x7] %vm181_vm0, %v264_v43   ;;  %v224_v47 = vld [vmem:[#allocation0 + $0x48] sm:$0x7]   ;;  %v229_v48 = vld [vmem:[#allocation0 + $0x50] sm:$0x7]  }
  0x20   :  { %v234_v49 = vld [vmem:[#allocation0 + $0x58] sm:$0x7]   ;;  %438 = vst.msk [vmem:[%s725_s1 + $0x30] sm:$0x7] %vm181_vm0, %v239_v44   ;;  %439 = vst.msk [vmem:[%s725_s1 + $0x33] sm:$0x7] %vm181_vm0, %v244_v45  }
  0x21   :  { %440 = vst.msk [vmem:[%s725_s1 + $0x36] sm:$0x7] %vm181_vm0, %v249_v46   ;;  %v209_v50 = vld [vmem:[#allocation0 + $0x30] sm:$0x7]   ;;  %v214_v51 = vld [vmem:[#allocation0 + $0x38] sm:$0x7]  }
  0x22   :  { %v219_v52 = vld [vmem:[#allocation0 + $0x40] sm:$0x7]   ;;  %435 = vst.msk [vmem:[%s725_s1 + $0x23] sm:$0x7] %vm181_vm0, %v224_v47   ;;  %436 = vst.msk [vmem:[%s725_s1 + $0x26] sm:$0x7] %vm181_vm0, %v229_v48  }
  0x23   :  { %437 = vst.msk [vmem:[%s725_s1 + $0x29] sm:$0x7] %vm181_vm0, %v234_v49   ;;  %v194_v53 = vld [vmem:[#allocation0 + $0x18] sm:$0x7]   ;;  %v199_v54 = vld [vmem:[#allocation0 + $0x20] sm:$0x7]  }
  0x24   :  { %v204_v55 = vld [vmem:[#allocation0 + $0x28] sm:$0x7]   ;;  %432 = vst.msk [vmem:[%s725_s1 + $0x16] sm:$0x7] %vm181_vm0, %v209_v50   ;;  %433 = vst.msk [vmem:[%s725_s1 + $0x19] sm:$0x7] %vm181_vm0, %v214_v51  }
  0x25   :  { %434 = vst.msk [vmem:[%s725_s1 + $0x20] sm:$0x7] %vm181_vm0, %v219_v52   ;;  %v180_v56 = vld [vmem:[#allocation0] sm:$0x7]   ;;  %v184_v57 = vld [vmem:[#allocation0 + $0x8] sm:$0x7]  }
  0x26   :  { %v189_v58 = vld [vmem:[#allocation0 + $0x10] sm:$0x7]   ;;  %429 = vst.msk [vmem:[%s725_s1 + $0x9] sm:$0x7] %vm181_vm0, %v194_v53   ;;  %430 = vst.msk [vmem:[%s725_s1 + $0x10] sm:$0x7] %vm181_vm0, %v199_v54  }
  0x27   :  { %431 = vst.msk [vmem:[%s725_s1 + $0x13] sm:$0x7] %vm181_vm0, %v204_v55   ;;  %182 = vst.msk [vmem:[%s725_s1] sm:$0x7] %vm181_vm0, %v180_v56   ;;  %v294_v59 = vld [vmem:[#allocation0 + $0xb8] sm:$0x7]  }
  0x28   :  { %427 = vst.msk [vmem:[%s725_s1 + $0x3] sm:$0x7] %vm181_vm0, %v184_v57   ;;  %428 = vst.msk [vmem:[%s725_s1 + $0x6] sm:$0x7] %vm181_vm0, %v189_v58   ;;  %v299_v60 = vld [vmem:[#allocation0 + $0xc0] sm:$0x7]  }
  0x29   :  { %v304_v61 = vld [vmem:[#allocation0 + $0xc8] sm:$0x7]   ;;  %449 = vst.msk [vmem:[%s725_s1 + $0x59] sm:$0x7] %vm181_vm0, %v294_v59   ;;  %450 = vst.msk [vmem:[%s725_s1 + $0x60] sm:$0x7] %vm181_vm0, %v299_v60  }
  0x2a   :  { %451 = vst.msk [vmem:[%s725_s1 + $0x63] sm:$0x7] %vm181_vm0, %v304_v61   ;;  %v309_v62 = vld [vmem:[#allocation0 + $0xd0] sm:$0x7]   ;;  %v314_v63 = vld [vmem:[#allocation0 + $0xd8] sm:$0x7]  }
  0x2b   :  { %v319_v0 = vld [vmem:[#allocation0 + $0xe0] sm:$0x7]   ;;  %452 = vst.msk [vmem:[%s725_s1 + $0x66] sm:$0x7] %vm181_vm0, %v309_v62   ;;  %453 = vst.msk [vmem:[%s725_s1 + $0x69] sm:$0x7] %vm181_vm0, %v314_v63  }
  0x2c   :  { %454 = vst.msk [vmem:[%s725_s1 + $0x70] sm:$0x7] %vm181_vm0, %v319_v0   ;;  %v324_v1 = vld [vmem:[#allocation0 + $0xe8] sm:$0x7]   ;;  %v329_v2 = vld [vmem:[#allocation0 + $0xf0] sm:$0x7]  }
  0x2d   :  { %v334_v3 = vld [vmem:[#allocation0 + $0xf8] sm:$0x7]   ;;  %455 = vst.msk [vmem:[%s725_s1 + $0x73] sm:$0x7] %vm181_vm0, %v324_v1   ;;  %456 = vst.msk [vmem:[%s725_s1 + $0x76] sm:$0x7] %vm181_vm0, %v329_v2  }
  0x2e   :  { %457 = vst.msk [vmem:[%s725_s1 + $0x79] sm:$0x7] %vm181_vm0, %v334_v3   ;;  %v339_v4 = vld [vmem:[#allocation0 + $0x100] sm:$0x7]   ;;  %v344_v5 = vld [vmem:[#allocation0 + $0x108] sm:$0x7]  }
  0x2f   :  { %v349_v6 = vld [vmem:[#allocation0 + $0x110] sm:$0x7]   ;;  %458 = vst.msk [vmem:[%s725_s1 + $0x80] sm:$0x7] %vm181_vm0, %v339_v4   ;;  %459 = vst.msk [vmem:[%s725_s1 + $0x83] sm:$0x7] %vm181_vm0, %v344_v5  }
  0x30   :  { %460 = vst.msk [vmem:[%s725_s1 + $0x86] sm:$0x7] %vm181_vm0, %v349_v6   ;;  %v354_v7 = vld [vmem:[#allocation0 + $0x118] sm:$0x7]  }
  0x31   :  { %461 = vst.msk [vmem:[%s725_s1 + $0x89] sm:$0x7] %vm181_vm0, %v354_v7  }

// kernel: tile.11
= control target key start
LH: loop header
LB: loop body
LE: loop exit
PB: predicated region body
PF: predicated region fallthrough
CT: control target
= control target key end

     0   :  { %vm181_vm0 = vcmask 261120   ;;  %s724_s0 = inlined_call_operand.vmem [shape: f32[4,1,1,3,9,32], index: 0, kind: input, shape index: {}]   ;;  %s725_s1 = inlined_call_operand.vmem [shape: f32[12,9,32], index: 1, kind: output, shape index: {}]  }
   0x1   :  { %v392_v0 = vld [vmem:[%s724_s0 + $0x8c] sm:$0xf]  ;;  %v393_v1 = vld [vmem:[%s724_s0 + $0x88] sm:$0xf]  ;;  %v394_v2 = vld [vmem:[%s724_s0 + $0x84] sm:$0xf] }
   0x2   :  { %8 = vst [vmem:[#allocation0 + $0x118] sm:$0xf] %v392_v0  ;;  %13 = vst [vmem:[#allocation0 + $0x110] sm:$0xf] %v393_v1  ;;  %v395_v3 = vld [vmem:[%s724_s0 + $0x80] sm:$0xf] }
   0x3   :  { %18 = vst [vmem:[#allocation0 + $0x108] sm:$0xf] %v394_v2  ;;  %v396_v4 = vld [vmem:[%s724_s0 + $0x7c] sm:$0xf]  ;;  %v397_v5 = vld [vmem:[%s724_s0 + $0x78] sm:$0xf] }
   0x4   :  { %23 = vst [vmem:[#allocation0 + $0x100] sm:$0xf] %v395_v3  ;;  %28 = vst [vmem:[#allocation0 + $0xf8] sm:$0xf] %v396_v4  ;;  %v398_v6 = vld [vmem:[%s724_s0 + $0x74] sm:$0xf] }
   0x5   :  { %33 = vst [vmem:[#allocation0 + $0xf0] sm:$0xf] %v397_v5  ;;  %v399_v7 = vld [vmem:[%s724_s0 + $0x70] sm:$0xf]  ;;  %v400_v8 = vld [vmem:[%s724_s0 + $0x6c] sm:$0xf] }
   0x6   :  { %38 = vst [vmem:[#allocation0 + $0xe8] sm:$0xf] %v398_v6  ;;  %43 = vst [vmem:[#allocation0 + $0xe0] sm:$0xf] %v399_v7  ;;  %v401_v9 = vld [vmem:[%s724_s0 + $0x68] sm:$0xf] }
   0x7   :  { %48 = vst [vmem:[#allocation0 + $0xd8] sm:$0xf] %v400_v8  ;;  %v402_v10 = vld [vmem:[%s724_s0 + $0x64] sm:$0xf]  ;;  %v403_v11 = vld [vmem:[%s724_s0 + $0x60] sm:$0xf] }
   0x8   :  { %53 = vst [vmem:[#allocation0 + $0xd0] sm:$0xf] %v401_v9  ;;  %58 = vst [vmem:[#allocation0 + $0xc8] sm:$0xf] %v402_v10  ;;  %v404_v12 = vld [vmem:[%s724_s0 + $0x5c] sm:$0xf] }
   0x9   :  { %63 = vst [vmem:[#allocation0 + $0xc0] sm:$0xf] %v403_v11  ;;  %v405_v13 = vld [vmem:[%s724_s0 + $0x58] sm:$0xf]  ;;  %v406_v14 = vld [vmem:[%s724_s0 + $0x54] sm:$0xf] }
   0xa   :  { %68 = vst [vmem:[#allocation0 + $0xb8] sm:$0xf] %v404_v12  ;;  %73 = vst [vmem:[#allocation0 + $0xb0] sm:$0xf] %v405_v13  ;;  %v407_v15 = vld [vmem:[%s724_s0 + $0x50] sm:$0xf] }
   0xb   :  { %78 = vst [vmem:[#allocation0 + $0xa8] sm:$0xf] %v406_v14  ;;  %v408_v16 = vld [vmem:[%s724_s0 + $0x4c] sm:$0xf]  ;;  %v409_v17 = vld [vmem:[%s724_s0 + $0x48] sm:$0xf] }
   0xc   :  { %83 = vst [vmem:[#allocation0 + $0xa0] sm:$0xf] %v407_v15  ;;  %88 = vst [vmem:[#allocation0 + $0x98] sm:$0xf] %v408_v16  ;;  %v410_v18 = vld [vmem:[%s724_s0 + $0x44] sm:$0xf] }
   0xd   :  { %93 = vst [vmem:[#allocation0 + $0x90] sm:$0xf] %v409_v17  ;;  %v411_v19 = vld [vmem:[%s724_s0 + $0x40] sm:$0xf]  ;;  %v412_v20 = vld [vmem:[%s724_s0 + $0x3c] sm:$0xf] }
   0xe   :  { %98 = vst [vmem:[#allocation0 + $0x88] sm:$0xf] %v410_v18  ;;  %103 = vst [vmem:[#allocation0 + $0x80] sm:$0xf] %v411_v19  ;;  %v413_v21 = vld [vmem:[%s724_s0 + $0x38] sm:$0xf] }
   0xf   :  { %108 = vst [vmem:[#allocation0 + $0x78] sm:$0xf] %v412_v20  ;;  %v414_v22 = vld [vmem:[%s724_s0 + $0x34] sm:$0xf]  ;;  %v415_v23 = vld [vmem:[%s724_s0 + $0x30] sm:$0xf] }
  0x10   :  { %113 = vst [vmem:[#allocation0 + $0x70] sm:$0xf] %v413_v21  ;;  %118 = vst [vmem:[#allocation0 + $0x68] sm:$0xf] %v414_v22  ;;  %v416_v24 = vld [vmem:[%s724_s0 + $0x2c] sm:$0xf] }
  0x11   :  { %123 = vst [vmem:[#allocation0 + $0x60] sm:$0xf] %v415_v23  ;;  %v417_v25 = vld [vmem:[%s724_s0 + $0x28] sm:$0xf]  ;;  %v418_v26 = vld [vmem:[%s724_s0 + $0x24] sm:$0xf] }
  0x12   :  { %128 = vst [vmem:[#allocation0 + $0x58] sm:$0xf] %v416_v24  ;;  %133 = vst [vmem:[#allocation0 + $0x50] sm:$0xf] %v417_v25  ;;  %v419_v27 = vld [vmem:[%s724_s0 + $0x20] sm:$0xf] }
  0x13   :  { %138 = vst [vmem:[#allocation0 + $0x48] sm:$0xf] %v418_v26  ;;  %v420_v28 = vld [vmem:[%s724_s0 + $0x1c] sm:$0xf]  ;;  %v421_v29 = vld [vmem:[%s724_s0 + $0x18] sm:$0xf] }
  0x14   :  { %143 = vst [vmem:[#allocation0 + $0x40] sm:$0xf] %v419_v27  ;;  %148 = vst [vmem:[#allocation0 + $0x38] sm:$0xf] %v420_v28  ;;  %v422_v30 = vld [vmem:[%s724_s0 + $0x14] sm:$0xf] }
  0x15   :  { %153 = vst [vmem:[#allocation0 + $0x30] sm:$0xf] %v421_v29  ;;  %v423_v31 = vld [vmem:[%s724_s0 + $0x10] sm:$0xf]  ;;  %v424_v32 = vld [vmem:[%s724_s0 + $0xc] sm:$0xf] }
  0x16   :  { %158 = vst [vmem:[#allocation0 + $0x28] sm:$0xf] %v422_v30  ;;  %163 = vst [vmem:[#allocation0 + $0x20] sm:$0xf] %v423_v31  ;;  %v425_v33 = vld [vmem:[%s724_s0 + $0x8] sm:$0xf] }
  0x17   :  { %168 = vst [vmem:[#allocation0 + $0x18] sm:$0xf] %v424_v32  ;;  %v426_v34 = vld [vmem:[%s724_s0 + $0x4] sm:$0xf]  ;;  %v178_v35 = vld [vmem:[%s724_s0] sm:$0xf] }
  0x18   :  { %173 = vst [vmem:[#allocation0 + $0x10] sm:$0xf] %v425_v33  ;;  %177 = vst [vmem:[#allocation0 + $0x8] sm:$0xf] %v426_v34  ;;  %v284_v36 = vld [vmem:[#allocation0 + $0xa8] sm:$0x7]  }
  0x19   :  { %179 = vst [vmem:[#allocation0] sm:$0xf] %v178_v35  ;;  %v289_v37 = vld [vmem:[#allocation0 + $0xb0] sm:$0x7]   ;;  %v274_v39 = vld [vmem:[#allocation0 + $0x98] sm:$0x7]  }
  0x1a   :  { %v269_v38 = vld [vmem:[#allocation0 + $0x90] sm:$0x7]   ;;  %v279_v40 = vld [vmem:[#allocation0 + $0xa0] sm:$0x7]   ;;  %447 = vst.msk [vmem:[%s725_s1 + $0x53] sm:$0x7] %vm181_vm0, %v284_v36  }
  0x1b   :  { %448 = vst.msk [vmem:[%s725_s1 + $0x56] sm:$0x7] %vm181_vm0, %v289_v37   ;;  %v254_v41 = vld [vmem:[#allocation0 + $0x78] sm:$0x7]   ;;  %v259_v42 = vld [vmem:[#allocation0 + $0x80] sm:$0x7]  }
  0x1c   :  { %v264_v43 = vld [vmem:[#allocation0 + $0x88] sm:$0x7]   ;;  %444 = vst.msk [vmem:[%s725_s1 + $0x46] sm:$0x7] %vm181_vm0, %v269_v38   ;;  %445 = vst.msk [vmem:[%s725_s1 + $0x49] sm:$0x7] %vm181_vm0, %v274_v39  }
  0x1d   :  { %446 = vst.msk [vmem:[%s725_s1 + $0x50] sm:$0x7] %vm181_vm0, %v279_v40   ;;  %v239_v44 = vld [vmem:[#allocation0 + $0x60] sm:$0x7]   ;;  %v244_v45 = vld [vmem:[#allocation0 + $0x68] sm:$0x7]  }
  0x1e   :  { %v249_v46 = vld [vmem:[#allocation0 + $0x70] sm:$0x7]   ;;  %441 = vst.msk [vmem:[%s725_s1 + $0x39] sm:$0x7] %vm181_vm0, %v254_v41   ;;  %442 = vst.msk [vmem:[%s725_s1 + $0x40] sm:$0x7] %vm181_vm0, %v259_v42  }
  0x1f   :  { %443 = vst.msk [vmem:[%s725_s1 + $0x43] sm:$0x7] %vm181_vm0, %v264_v43   ;;  %v224_v47 = vld [vmem:[#allocation0 + $0x48] sm:$0x7]   ;;  %v229_v48 = vld [vmem:[#allocation0 + $0x50] sm:$0x7]  }
  0x20   :  { %v234_v49 = vld [vmem:[#allocation0 + $0x58] sm:$0x7]   ;;  %438 = vst.msk [vmem:[%s725_s1 + $0x30] sm:$0x7] %vm181_vm0, %v239_v44   ;;  %439 = vst.msk [vmem:[%s725_s1 + $0x33] sm:$0x7] %vm181_vm0, %v244_v45  }
  0x21   :  { %440 = vst.msk [vmem:[%s725_s1 + $0x36] sm:$0x7] %vm181_vm0, %v249_v46   ;;  %v209_v50 = vld [vmem:[#allocation0 + $0x30] sm:$0x7]   ;;  %v214_v51 = vld [vmem:[#allocation0 + $0x38] sm:$0x7]  }
  0x22   :  { %v219_v52 = vld [vmem:[#allocation0 + $0x40] sm:$0x7]   ;;  %435 = vst.msk [vmem:[%s725_s1 + $0x23] sm:$0x7] %vm181_vm0, %v224_v47   ;;  %436 = vst.msk [vmem:[%s725_s1 + $0x26] sm:$0x7] %vm181_vm0, %v229_v48  }
  0x23   :  { %437 = vst.msk [vmem:[%s725_s1 + $0x29] sm:$0x7] %vm181_vm0, %v234_v49   ;;  %v194_v53 = vld [vmem:[#allocation0 + $0x18] sm:$0x7]   ;;  %v199_v54 = vld [vmem:[#allocation0 + $0x20] sm:$0x7]  }
  0x24   :  { %v204_v55 = vld [vmem:[#allocation0 + $0x28] sm:$0x7]   ;;  %432 = vst.msk [vmem:[%s725_s1 + $0x16] sm:$0x7] %vm181_vm0, %v209_v50   ;;  %433 = vst.msk [vmem:[%s725_s1 + $0x19] sm:$0x7] %vm181_vm0, %v214_v51  }
  0x25   :  { %434 = vst.msk [vmem:[%s725_s1 + $0x20] sm:$0x7] %vm181_vm0, %v219_v52   ;;  %v180_v56 = vld [vmem:[#allocation0] sm:$0x7]   ;;  %v184_v57 = vld [vmem:[#allocation0 + $0x8] sm:$0x7]  }
  0x26   :  { %v189_v58 = vld [vmem:[#allocation0 + $0x10] sm:$0x7]   ;;  %429 = vst.msk [vmem:[%s725_s1 + $0x9] sm:$0x7] %vm181_vm0, %v194_v53   ;;  %430 = vst.msk [vmem:[%s725_s1 + $0x10] sm:$0x7] %vm181_vm0, %v199_v54  }
  0x27   :  { %431 = vst.msk [vmem:[%s725_s1 + $0x13] sm:$0x7] %vm181_vm0, %v204_v55   ;;  %182 = vst.msk [vmem:[%s725_s1] sm:$0x7] %vm181_vm0, %v180_v56   ;;  %v294_v59 = vld [vmem:[#allocation0 + $0xb8] sm:$0x7]  }
  0x28   :  { %427 = vst.msk [vmem:[%s725_s1 + $0x3] sm:$0x7] %vm181_vm0, %v184_v57   ;;  %428 = vst.msk [vmem:[%s725_s1 + $0x6] sm:$0x7] %vm181_vm0, %v189_v58   ;;  %v299_v60 = vld [vmem:[#allocation0 + $0xc0] sm:$0x7]  }
  0x29   :  { %v304_v61 = vld [vmem:[#allocation0 + $0xc8] sm:$0x7]   ;;  %449 = vst.msk [vmem:[%s725_s1 + $0x59] sm:$0x7] %vm181_vm0, %v294_v59   ;;  %450 = vst.msk [vmem:[%s725_s1 + $0x60] sm:$0x7] %vm181_vm0, %v299_v60  }
  0x2a   :  { %451 = vst.msk [vmem:[%s725_s1 + $0x63] sm:$0x7] %vm181_vm0, %v304_v61   ;;  %v309_v62 = vld [vmem:[#allocation0 + $0xd0] sm:$0x7]   ;;  %v314_v63 = vld [vmem:[#allocation0 + $0xd8] sm:$0x7]  }
  0x2b   :  { %v319_v0 = vld [vmem:[#allocation0 + $0xe0] sm:$0x7]   ;;  %452 = vst.msk [vmem:[%s725_s1 + $0x66] sm:$0x7] %vm181_vm0, %v309_v62   ;;  %453 = vst.msk [vmem:[%s725_s1 + $0x69] sm:$0x7] %vm181_vm0, %v314_v63  }
  0x2c   :  { %454 = vst.msk [vmem:[%s725_s1 + $0x70] sm:$0x7] %vm181_vm0, %v319_v0   ;;  %v324_v1 = vld [vmem:[#allocation0 + $0xe8] sm:$0x7]   ;;  %v329_v2 = vld [vmem:[#allocation0 + $0xf0] sm:$0x7]  }
  0x2d   :  { %v334_v3 = vld [vmem:[#allocation0 + $0xf8] sm:$0x7]   ;;  %455 = vst.msk [vmem:[%s725_s1 + $0x73] sm:$0x7] %vm181_vm0, %v324_v1   ;;  %456 = vst.msk [vmem:[%s725_s1 + $0x76] sm:$0x7] %vm181_vm0, %v329_v2  }
  0x2e   :  { %457 = vst.msk [vmem:[%s725_s1 + $0x79] sm:$0x7] %vm181_vm0, %v334_v3   ;;  %v339_v4 = vld [vmem:[#allocation0 + $0x100] sm:$0x7]   ;;  %v344_v5 = vld [vmem:[#allocation0 + $0x108] sm:$0x7]  }
  0x2f   :  { %v349_v6 = vld [vmem:[#allocation0 + $0x110] sm:$0x7]   ;;  %458 = vst.msk [vmem:[%s725_s1 + $0x80] sm:$0x7] %vm181_vm0, %v339_v4   ;;  %459 = vst.msk [vmem:[%s725_s1 + $0x83] sm:$0x7] %vm181_vm0, %v344_v5  }
  0x30   :  { %460 = vst.msk [vmem:[%s725_s1 + $0x86] sm:$0x7] %vm181_vm0, %v349_v6   ;;  %v354_v7 = vld [vmem:[#allocation0 + $0x118] sm:$0x7]  }
  0x31   :  { %461 = vst.msk [vmem:[%s725_s1 + $0x89] sm:$0x7] %vm181_vm0, %v354_v7  }

// kernel: swa_forward.1
= control target key start
LH: loop header
LB: loop body
LE: loop exit
PB: predicated region body
PF: predicated region fallthrough
CT: control target
= control target key end

     0   :  { %v4890_v3 = vmov 0.0   ;;  %v3266_v4 = vmov 0   ;;  %vm95_vm0 = vcmask 261120   ;;  %s3268_s26 = smov 17   ;;  %s3270_s28 = smov 1   ;;  %vm2181_vm9 = vcmask 130048   ;;  %s4868_s0 = inlined_call_operand.vmem [shape: f32[32,256], index: 0, kind: input, shape index: {}]   ;;  %s4869_s4 = inlined_call_operand.vmem [shape: f32[32,32], index: 4, kind: input, shape index: {}]   ;;  %s4870_s1 = inlined_call_operand.vmem [shape: f32[144,32], index: 1, kind: input, shape index: {}]   ;;  %s4871_s2 = inlined_call_operand.vmem [shape: f32[32,144], index: 2, kind: input, shape index: {}]   ;;  %s4872_s3 = inlined_call_operand.vmem [shape: f32[32,32], index: 3, kind: input, shape index: {}]   ;;  %s4873_s5 = inlined_call_operand.vmem [shape: f32[32,1], index: 5, kind: input, shape index: {}]   ;;  %s4874_s7 = inlined_call_operand.vmem [shape: f32[32,1], index: 7, kind: input, shape index: {}]   ;;  %s4875_s8 = inlined_call_operand.vmem [shape: f32[32,1], index: 8, kind: input, shape index: {}]   ;;  %s4876_s6 = inlined_call_operand.vmem [shape: f32[1,32], index: 6, kind: input, shape index: {}]   ;;  %s4877_s13 = inlined_call_operand.vmem [shape: f32[32,144], index: 13, kind: input, shape index: {}]   ;;  %s4878_s11 = inlined_call_operand.vmem [shape: f32[9,256], index: 11, kind: input, shape index: {}]   ;;  %s4879_s9 = inlined_call_operand.vmem [shape: f32[1,32], index: 9, kind: input, shape index: {}]   ;;  %s4880_s10 = inlined_call_operand.vmem [shape: f32[1,32], index: 10, kind: input, shape index: {}]   ;;  %s4881_s12 = inlined_call_operand.vmem [shape: f32[144,32], index: 12, kind: input, shape index: {}]   ;;  %s4882_s14 = inlined_call_operand.vmem [shape: f32[4,16], index: 14, kind: input, shape index: {}]   ;;  %s4883_s15 = inlined_call_operand.vmem [shape: f32[16,4], index: 15, kind: input, shape index: {}]   ;;  %s4884_s17 = inlined_call_operand.vmem [shape: f32[32,1], index: 17, kind: input, shape index: {}]   ;;  %s4885_s16 = inlined_call_operand.vmem [shape: f32[32,32], index: 16, kind: input, shape index: {}]   ;;  %s4886_s18 = inlined_call_operand.vmem [shape: f32[32,256], index: 18, kind: output, shape index: {}]  }
   0x1   :  { %4904 = sst [smem:[#allocation23_spill]] %s4868_s0  ;;  %172 = vmatprep.mubr.f32.mxu0 %v4890_v3  ;;  %3207 = vset.pattern.permute.xlu0 %v3266_v4  ;;  %v889_v21 = vld [vmem:[%s4871_s2 + $0x8] sm:$0xff]  ;;  %v891_v22 = vld [vmem:[%s4871_s2 + $0x18] sm:$0xff]  ;;  %v888_v23 = vld [vmem:[%s4871_s2] sm:$0xff]  ;;  %s3271_s30 = smov 127   ;;  %vm2265_vm10 = vcmask 1043456  }
   0x2   :  { %4905 = sst [smem:[#allocation24_spill]] %s4869_s4  ;;  %s4907_s29 = sld [smem:[#allocation23_spill]]  ;;  %3208 = vset.pattern.permute.xlu1 %v3266_v4  ;;  %v59_v24 = vld [vmem:[%s4872_s3] sm:$0xff]  ;;  %v3037_v25 = vpack.c.bf16 %v891_v22, %v889_v21  ;;  %v890_v26 = vld [vmem:[%s4871_s2 + $0x10] sm:$0xff]  ;;  %v893_v29 = vld [vmem:[%s4871_s2 + $0x28] sm:$0xff]  ;;  %vm2258_vm11 = vcmask 31744  }
   0x3   :  { %4906 = sst [smem:[#allocation25_spill]] %s4870_s1  ;;  %s4908_s20 = sld [smem:[#allocation24_spill]]  ;;  %v3039_v28 = vpack.c.bf16 %v890_v26, %v888_v23  ;;  %v895_v30 = vld [vmem:[%s4871_s2 + $0x38] sm:$0xff]  ;;  %v892_v33 = vld [vmem:[%s4871_s2 + $0x20] sm:$0xff]  ;;  %v894_v34 = vld [vmem:[%s4871_s2 + $0x30] sm:$0xff] }
   0x4   :  { %s4909_s27 = sld [smem:[#allocation25_spill]]  ;;  %v3041_v32 = vpack.c.bf16 %v895_v30, %v893_v29  ;;  %v60_v35 = vld [vmem:[%s4872_s3 + $0x8] sm:$0xff]  ;;  %v3043_v37 = vpack.c.bf16 %v894_v34, %v892_v33  ;;  %v71_v39 = vld [vmem:[%s4873_s5] sm:$0xff]  ;;  %v73_v40 = vld [vmem:[%s4873_s5 + $0x10] sm:$0xff]  ;;  %s3267_s2 = smov 16  }
   0x5   :  { %77 = vperm.xlu0 %3207, %v71_v39   ;;  %v61_v41 = vld [vmem:[%s4872_s3 + $0x10] sm:$0xff]  ;;  %v72_v42 = vld [vmem:[%s4873_s5 + $0x8] sm:$0xff]  ;;  %87 = vperm.xlu1 %3208, %v73_v40   ;;  %v74_v45 = vld [vmem:[%s4873_s5 + $0x18] sm:$0xff]  ;;  %s3273_s5 = smov 112   ;;  %s3274_s19 = smov 111  }
   0x6   :  { %v62_v46 = vld [vmem:[%s4872_s3 + $0x18] sm:$0xff]  ;;  %v266_v47 = vld [vmem:[%s4874_s7] sm:$0xff]  ;;  %v267_v50 = vld [vmem:[%s4874_s7 + $0x8] sm:$0xff] }
   0x7   :  { %v299_v51 = vld [vmem:[%s4875_s8 + $0x8] sm:$0xff]  ;;  %v298_v54 = vld [vmem:[%s4875_s8] sm:$0xff]  ;;  %v268_v55 = vld [vmem:[%s4874_s7 + $0x10] sm:$0xff] }
   0x8   :  { %v64_v0 = vld [vmem:[%s4907_s29 + $0x8] sm:$0xff]  ;;  %v66_v1 = vld [vmem:[%s4907_s29 + $0x18] sm:$0xff]  ;;  %v63_v7 = vld [vmem:[%s4907_s29] sm:$0xff] }
   0x9   :  { %v348_v2 = vld [vmem:[%s4908_s20] sm:$0xff]  ;;  %v3021_v5 = vpack.c.bf16 %v66_v1, %v64_v0  ;;  %v349_v6 = vld [vmem:[%s4908_s20 + $0x8] sm:$0xff]  ;;  %v65_v8 = vld [vmem:[%s4907_s29 + $0x10] sm:$0xff]  ;;  %82 = vperm.xlu0 %3207, %v72_v42   ;;  %92 = vperm.xlu1 %3208, %v74_v45  }
   0xa   :  { %v3029_v9 = vpack.c.bf16 %v349_v6, %v348_v2  ;;  %v3023_v10 = vpack.c.bf16 %v65_v8, %v63_v7  ;;  %v68_v11 = vld [vmem:[%s4907_s29 + $0x28] sm:$0xff]  ;;  %v70_v12 = vld [vmem:[%s4907_s29 + $0x38] sm:$0xff]  ;;  %v350_v13 = vld [vmem:[%s4908_s20 + $0x10] sm:$0xff] }
   0xb   :  { %3022 = vmatprep.subr.bf16.mxu0 %v3021_v5  ;;  %v3025_v14 = vpack.c.bf16 %v70_v12, %v68_v11  ;;  %v351_v15 = vld [vmem:[%s4908_s20 + $0x18] sm:$0xff]  ;;  %v67_v16 = vld [vmem:[%s4907_s29 + $0x20] sm:$0xff]  ;;  %v69_v17 = vld [vmem:[%s4907_s29 + $0x30] sm:$0xff]  ;;  %s3269_s20 = smov 15  }
   0xc   :  { %3030 = vmatprep.subr.bf16.mxu1 %v3029_v9  ;;  %3024 = vmatpush1.bf16.msra.mxu0 %v3023_v10  ;;  %v3033_v18 = vpack.c.bf16 %v351_v15, %v350_v13  ;;  %v3027_v19 = vpack.c.bf16 %v69_v17, %v67_v16  ;;  %v330_v20 = vld [vmem:[%s4909_s27] sm:$0xff]  ;;  %v331_v27 = vld [vmem:[%s4909_s27 + $0x8] sm:$0xff]  ;;  %v332_v31 = vld [vmem:[%s4909_s27 + $0x10] sm:$0xff] }
   0xd   :  { %3032 = vmatpush3.bf16.msra.mxu1 %v3029_v9  ;;  %3026 = vmatprep.subr.bf16.mxu0 %v3025_v14  ;;  %v333_v36 = vld [vmem:[%s4909_s27 + $0x18] sm:$0xff]  ;;  %v334_v38 = vld [vmem:[%s4909_s27 + $0x20] sm:$0xff]  ;;  %v335_v43 = vld [vmem:[%s4909_s27 + $0x28] sm:$0xff] }
   0xe   :  { %3034 = vmatprep.subr.bf16.mxu1 %v3033_v18  ;;  %2994 = vmatprep.mubr.msk.f32.mxu1 %vm95_vm0, %v330_v20  ;;  %v336_v44 = vld [vmem:[%s4909_s27 + $0x30] sm:$0xff]  ;;  %v337_v48 = vld [vmem:[%s4909_s27 + $0x38] sm:$0xff]  ;;  %v338_v49 = vld [vmem:[%s4909_s27 + $0x40] sm:$0xff] }
   0xf   :  { %272 = vperm.xlu0 %3207, %v266_v47   ;;  %v339_v52 = vld [vmem:[%s4909_s27 + $0x48] sm:$0xff]  ;;  %v340_v53 = vld [vmem:[%s4909_s27 + $0x50] sm:$0xff]  ;;  %277 = vperm.xlu1 %3208, %v267_v50   ;;  %v341_v56 = vld [vmem:[%s4909_s27 + $0x58] sm:$0xff] }
  0x10   :  { %3028 = vmatpush1.bf16.msra.mxu0 %v3027_v19  ;;  %v342_v57 = vld [vmem:[%s4909_s27 + $0x60] sm:$0xff]  ;;  %v269_v58 = vld [vmem:[%s4874_s7 + $0x18] sm:$0xff]  ;;  %v343_v59 = vld [vmem:[%s4909_s27 + $0x68] sm:$0xff] }
  0x11   :  { %3036 = vmatpush3.bf16.msra.mxu1 %v3033_v18  ;;  %3038 = vmatprep.subr.bf16.mxu0 %v3037_v25  ;;  %v344_v60 = vld [vmem:[%s4909_s27 + $0x70] sm:$0xff]  ;;  %v345_v62 = vld [vmem:[%s4909_s27 + $0x78] sm:$0xff]  ;;  %v346_v63 = vld [vmem:[%s4909_s27 + $0x80] sm:$0xff] }
  0x12   :  { %v300_v61 = vld [vmem:[%s4875_s8 + $0x10] sm:$0xff]  ;;  %v301_v0 = vld [vmem:[%s4875_s8 + $0x18] sm:$0xff]  ;;  %v347_v1 = vld [vmem:[%s4909_s27 + $0x88] sm:$0xff]  ;;  %s3272_s27 = smov 113  }
  0x13   :  { %2891 = vmatmul.mubr.msk.f32.vlgmr.msra.gmra.mrb[0].mxu0 %vm95_vm0, %v59_v24  ;;  %309 = vperm.xlu0 %3207, %v299_v51   ;;  %v3573_v4 = vld [vmem:[%s4876_s6] ss:$0 sm:$0xff] }
  0x14   :  { %2995 = vmatmul.mubr.msk.f32.vlgmr.msra.gmra.mrb[0].mxu1 %vm95_vm0, %v331_v27  ;;  %178 = vmatprep.mubr.f32.mxu0 %v4890_v3 }
  0x15   :  { %2997 = vmatprep.mubr.msk.f32.mxu1 %vm95_vm0, %v332_v31  ;;  %3040 = vmatpush1.bf16.msra.mxu0 %v3039_v28 }
  0x16   :  { %3042 = vmatprep.subr.bf16.mxu0 %v3041_v32  ;;  %304 = vperm.xlu1 %3208, %v298_v54  }
  0x17   :  { %2892 = vmatmul.mubr.msk.f32.gmra.mrb[2].mxu0 %vm95_vm0, %v60_v35  ;;  %282 = vperm.xlu0 %3207, %v268_v55  }
  0x18   :  { %2998 = vmatmul.mubr.msk.f32.gmra.mrb[2].mxu1 %vm95_vm0, %v333_v36  ;;  %184 = vmatprep.mubr.f32.mxu0 %v4890_v3 }
  0x19   :  { %3000 = vmatprep.mubr.msk.f32.mxu1 %vm95_vm0, %v334_v38  ;;  %3044 = vmatpush1.bf16.msra.mxu0 %v3043_v37 }
  0x1b   :  { %2893 = vmatmul.mubr.msk.f32.gmra.mrb[4].mxu0 %vm95_vm0, %v61_v41  ;;  %287 = vperm.xlu0 %3207, %v269_v58  }
  0x1c   :  { %3001 = vmatmul.mubr.msk.f32.gmra.mrb[4].mxu1 %vm95_vm0, %v335_v43  ;;  %190 = vmatprep.mubr.f32.mxu0 %v4890_v3 }
  0x1d   :  { %3003 = vmatprep.mubr.msk.f32.mxu1 %vm95_vm0, %v336_v44 }
  0x1f   :  { %2894 = vmatmul.mubr.msk.f32.gmra.mrb[6].mxu0 %vm95_vm0, %v62_v46  ;;  %314 = vperm.xlu0 %3207, %v300_v61  }
  0x20   :  { %3004 = vmatmul.mubr.msk.f32.gmra.mrb[6].mxu1 %vm95_vm0, %v337_v48  ;;  %960 = vmatprep.mubr.f32.mxu0 %v4890_v3 }
  0x21   :  { %3006 = vmatprep.mubr.msk.f32.mxu1 %vm95_vm0, %v338_v49 }
  0x23   :  { %2916 = vmatmul.mubr.msk.f32.vlgmr.msra.gmra.mrb[8].mxu0 %vm95_vm0, %v59_v24  ;;  %319 = vperm.xlu0 %3207, %v301_v0  }
  0x24   :  { %3007 = vmatmul.mubr.msk.f32.gmra.mrb[8].mxu1 %vm95_vm0, %v339_v52  ;;  %966 = vmatprep.mubr.f32.mxu0 %v4890_v3 }
  0x25   :  { %3009 = vmatprep.mubr.msk.f32.mxu1 %vm95_vm0, %v340_v53  ;;  %v985_v53 = vld [vmem:[%s4877_s13] sm:$0xff] }
  0x27   :  { %2917 = vmatmul.mubr.msk.f32.gmra.mrb[10].mxu0 %vm95_vm0, %v60_v35 }
  0x28   :  { %3010 = vmatmul.mubr.msk.f32.gmra.mrb[10].mxu1 %vm95_vm0, %v341_v56  ;;  %972 = vmatprep.mubr.f32.mxu0 %v4890_v3 }
  0x29   :  { %3012 = vmatprep.mubr.msk.f32.mxu1 %vm95_vm0, %v342_v57 }
  0x2b   :  { %2918 = vmatmul.mubr.msk.f32.gmra.mrb[12].mxu0 %vm95_vm0, %v61_v41 }
  0x2c   :  { %3013 = vmatmul.mubr.msk.f32.gmra.mrb[12].mxu1 %vm95_vm0, %v343_v59  ;;  %978 = vmatprep.mubr.f32.mxu0 %v4890_v3 }
  0x2d   :  { %3015 = vmatprep.mubr.msk.f32.mxu1 %vm95_vm0, %v344_v60 }
  0x2f   :  { %2919 = vmatmul.mubr.msk.f32.gmra.mrb[14].mxu0 %vm95_vm0, %v62_v46 }
  0x30   :  { %3016 = vmatmul.mubr.msk.f32.gmra.mrb[14].mxu1 %vm95_vm0, %v345_v62  ;;  %1164 = vmatprep.mubr.f32.mxu0 %v4890_v3 }
  0x31   :  { %3018 = vmatprep.mubr.msk.f32.mxu1 %vm95_vm0, %v346_v63 }
  0x34   :  { %3019 = vmatmul.mubr.msk.f32.gmra.mrb[16].mxu1 %vm95_vm0, %v347_v1 }
  0x35   :  { %2249 = vmatprep.mubr.f32.mxu1 %v4890_v3 }
  0x84   :  { %v3568_v2 = vpop.permute.xlu0 %77  ;;  %v3594_v19 = vpop.permute.xlu1 %87 }
  0x85   :  { %4910 = vst [vmem:[#allocation3_spill] sm:$0xff] %v3568_v2 }
  0x88   :  { %v3581_v11 = vpop.permute.xlu0 %82  ;;  %v3623_v36 = vpop.permute.xlu1 %92 }
  0xe6   :  { %v174_v5 = vpop.f32.mrb[0].mxu0 }
  0xe7   :  { %v2996_v6 = vpop.f32.mrb[0].mxu1  ;;  %v176_v7 = vpop.f32.mrb[1].mxu0  ;;  %v3579_v10 = vadd.f32 %v174_v5, %v3568_v2 }
  0xe8   :  { %v3576_v8 = vadd.f32 %v2996_v6, %v3573_v4  ;;  %v479_v9 = vpop.f32.mrb[1].mxu1  ;;  %v3587_v13 = vadd.f32 %v176_v7, %v3568_v2  ;;  %v987_v6 = vld [vmem:[%s4877_s13 + $0x10] sm:$0xff] }
  0xe9   :  { %v3584_v12 = vadd.f32 %v3573_v4, %v479_v9 }
  0xea   :  { %v571_v14 = vsel %vm95_vm0, %v3576_v8, 0.0  ;;  %v180_v15 = vpop.f32.mrb[2].mxu0 }
  0xeb   :  { %572 = vadd.xlane.f32.xlu0 %v571_v14  ;;  %v3592_v16 = vadd.f32 %v180_v15, %v3581_v11  ;;  %v2999_v17 = vpop.f32.mrb[2].mxu1  ;;  %v182_v18 = vpop.f32.mrb[3].mxu0  ;;  %v568_v27 = vsel %vm95_vm0, %v3584_v12, 0.0 }
  0xec   :  { %v3597_v20 = vadd.f32 %v2999_v17, %v3573_v4  ;;  %v3600_v21 = vadd.f32 %v182_v18, %v3581_v11  ;;  %v489_v22 = vpop.f32.mrb[3].mxu1 }
  0xed   :  { %v197_v23 = vadd.f32 %v3592_v16, %v3579_v10  ;;  %v3607_v25 = vadd.f32 %v3573_v4, %v489_v22  ;;  %v988_v22 = vld [vmem:[%s4877_s13 + $0x18] sm:$0xff] }
  0xee   :  { %v206_v24 = vadd.f32 %v3600_v21, %v3587_v13  ;;  %v577_v26 = vsel %vm95_vm0, %v3597_v20, 0.0  ;;  %v186_v28 = vpop.f32.mrb[4].mxu0 }
  0xef   :  { %578 = vadd.xlane.f32.xlu1 %v577_v26  ;;  %v3002_v29 = vpop.f32.mrb[4].mxu1  ;;  %569 = vadd.xlane.f32.xlu0 %v568_v27  ;;  %v3614_v30 = vadd.f32 %v186_v28, %v3594_v19  ;;  %v188_v31 = vpop.f32.mrb[5].mxu0  ;;  %v574_v39 = vsel %vm95_vm0, %v3607_v25, 0.0 }
  0xf0   :  { %v3617_v32 = vadd.f32 %v188_v31, %v3594_v19  ;;  %v499_v33 = vpop.f32.mrb[5].mxu1  ;;  %v3626_v37 = vadd.f32 %v3002_v29, %v3573_v4 }
  0xf1   :  { %v198_v34 = vadd.f32 %v197_v23, %v3614_v30  ;;  %v3621_v35 = vadd.f32 %v3573_v4, %v499_v33 }
  0xf2   :  { %v207_v38 = vadd.f32 %v206_v24, %v3617_v32  ;;  %v192_v40 = vpop.f32.mrb[6].mxu0  ;;  %v583_v51 = vsel %vm95_vm0, %v3626_v37, 0.0 }
  0xf3   :  { %v3005_v41 = vpop.f32.mrb[6].mxu1  ;;  %575 = vadd.xlane.f32.xlu0 %v574_v39  ;;  %v3632_v42 = vadd.f32 %v192_v40, %v3623_v36  ;;  %v580_v43 = vsel %vm95_vm0, %v3621_v35, 0.0  ;;  %v194_v44 = vpop.f32.mrb[7].mxu0  ;;  %v989_v39 = vld [vmem:[%s4877_s13 + $0x20] sm:$0xff] }
  0xf4   :  { %v509_v45 = vpop.f32.mrb[7].mxu1  ;;  %581 = vadd.xlane.f32.xlu1 %v580_v43  ;;  %v3637_v46 = vadd.f32 %v194_v44, %v3623_v36  ;;  %v3644_v49 = vadd.f32 %v3005_v41, %v3573_v4 }
  0xf5   :  { %v199_v47 = vadd.f32 %v198_v34, %v3632_v42  ;;  %v3641_v48 = vadd.f32 %v3573_v4, %v509_v45  ;;  %v990_v45 = vld [vmem:[%s4877_s13 + $0x28] sm:$0xff] }
  0xf6   :  { %v208_v50 = vadd.f32 %v207_v38, %v3637_v46  ;;  %v962_v52 = vpop.f32.mrb[8].mxu0  ;;  %v589_v1 = vsel %vm95_vm0, %v3644_v49, 0.0 }
  0xf7   :  { %v200_v54 = vrot.slane %v199_v47, 4  ;;  %v3008_v55 = vpop.f32.mrb[8].mxu1  ;;  %584 = vadd.xlane.f32.xlu0 %v583_v51  ;;  %v963_v56 = vadd.f32 %v962_v52, %v3568_v2  ;;  %v586_v57 = vsel %vm95_vm0, %v3641_v48, 0.0  ;;  %v3655_v58 = vpop.f32.mrb[9].mxu0 }
  0xf8   :  { %4911 = vst [vmem:[#allocation4_spill] sm:$0xff] %v3655_v58  ;;  %v209_v59 = vrot.slane %v208_v50, 4  ;;  %v3658_v60 = vadd.f32 %v3008_v55, %v3573_v4  ;;  %v519_v61 = vpop.f32.mrb[9].mxu1  ;;  %587 = vadd.xlane.f32.xlu1 %v586_v57 }
  0xf9   :  { %v201_v62 = vadd.f32 %v200_v54, %v199_v47  ;;  %v3660_v63 = vmul.f32 %v985_v53, %v963_v56  ;;  %v3670_v14 = vadd.f32 %v3573_v4, %v519_v61 }
  0xfa   :  { %v210_v0 = vadd.f32 %v209_v59, %v208_v50  ;;  %v968_v5 = vpop.f32.mrb[10].mxu0  ;;  %v595_v7 = vsel %vm95_vm0, %v3658_v60, 0.0 }
  0xfb   :  { %4912 = vst [vmem:[#allocation5_spill] sm:$0xff] %v3660_v63  ;;  %v202_v9 = vrot.slane %v201_v62, 2  ;;  %v3011_v15 = vpop.f32.mrb[10].mxu1  ;;  %590 = vadd.xlane.f32.xlu0 %v589_v1  ;;  %v969_v17 = vadd.f32 %v968_v5, %v3581_v11  ;;  %v970_v18 = vpop.f32.mrb[11].mxu0  ;;  %v592_v41 = vsel %vm95_vm0, %v3670_v14, 0.0 }
  0xfc   :  { %v211_v23 = vrot.slane %v210_v0, 2  ;;  %v529_v24 = vpop.f32.mrb[11].mxu1  ;;  %596 = vadd.xlane.f32.xlu1 %v595_v7  ;;  %v971_v26 = vadd.f32 %v970_v18, %v3581_v11  ;;  %v3678_v28 = vadd.f32 %v3011_v15, %v3573_v4 }
  0xfd   :  { %v203_v27 = vadd.f32 %v202_v9, %v201_v62  ;;  %v3680_v29 = vmul.f32 %v987_v6, %v969_v17  ;;  %v3683_v31 = vadd.f32 %v3573_v4, %v529_v24 }
  0xfe   :  { %v212_v33 = vadd.f32 %v211_v23, %v210_v0  ;;  %v3685_v34 = vmul.f32 %v988_v22, %v971_v26  ;;  %v974_v38 = vpop.f32.mrb[12].mxu0  ;;  %v601_v56 = vsel %vm95_vm0, %v3678_v28, 0.0 }
  0xff   :  { %4913 = vst [vmem:[#allocation6_spill] sm:$0xff] %v3680_v29  ;;  %v204_v40 = vrot.slane %v203_v27, 1  ;;  %v975_v11 = vadd.f32 %v974_v38, %v3594_v19  ;;  %v598_v43 = vsel %vm95_vm0, %v3683_v31, 0.0  ;;  %v976_v44 = vpop.f32.mrb[13].mxu0  ;;  %v3014_v47 = vpop.f32.mrb[12].mxu1 }
 0x100   :  { %4914 = vst [vmem:[#allocation7_spill] sm:$0xff] %v3685_v34  ;;  %v213_v50 = vrot.slane %v212_v33, 1  ;;  %593 = vadd.xlane.f32.xlu1 %v592_v41  ;;  %599 = vadd.xlane.f32.xlu0 %v598_v43  ;;  %v977_v51 = vadd.f32 %v976_v44, %v3594_v19  ;;  %v3700_v52 = vadd.f32 %v3014_v47, %v3573_v4  ;;  %v539_v53 = vpop.f32.mrb[13].mxu1 }
 0x101   :  { %v205_v54 = vadd.f32 %v204_v40, %v203_v27  ;;  %v3702_v55 = vmul.f32 %v989_v39, %v975_v11 }
 0x102   :  { %v214_v57 = vadd.f32 %v213_v50, %v212_v33  ;;  %v3706_v59 = vmul.f32 %v990_v45, %v977_v51  ;;  %v980_v61 = vpop.f32.mrb[14].mxu0  ;;  %v607_v19 = vsel %vm95_vm0, %v3700_v52, 0.0 }
 0x103   :  { %4915 = vst [vmem:[#allocation8_spill] sm:$0xff] %v3702_v55  ;;  %v216_v62 = vmul.f32 0.03125, %v205_v54  ;;  %v3017_v0 = vpop.f32.mrb[14].mxu1  ;;  %v982_v1 = vpop.f32.mrb[15].mxu0  ;;  %v981_v7 = vadd.f32 %v980_v61, %v3623_v36 }
 0x104   :  { %4916 = vst [vmem:[#allocation9_spill] sm:$0xff] %v3706_v59  ;;  %v217_v5 = vmul.f32 0.03125, %v214_v57  ;;  %v3711_v6 = vadd.f32 %v3017_v0, %v3573_v4  ;;  %602 = vadd.xlane.f32.xlu1 %v601_v56  ;;  %v983_v9 = vadd.f32 %v982_v1, %v3623_v36  ;;  %v549_v15 = vpop.f32.mrb[15].mxu1 }
 0x105   :  { %v3716_v17 = vsub.f32 %v3579_v10, %v216_v62  ;;  %v3719_v18 = vsub.f32 %v3592_v16, %v216_v62  ;;  %v3722_v22 = vsub.f32 %v3614_v30, %v216_v62  ;;  %v3725_v23 = vsub.f32 %v3632_v42, %v216_v62  ;;  %v991_v16 = vld [vmem:[%s4877_s13 + $0x30] sm:$0xff]  ;;  %v992_v30 = vld [vmem:[%s4877_s13 + $0x38] sm:$0xff] }
 0x106   :  { %v3728_v24 = vsub.f32 %v3587_v13, %v217_v5  ;;  %v3731_v26 = vsub.f32 %v3600_v21, %v217_v5  ;;  %v3734_v36 = vsub.f32 %v3617_v32, %v217_v5  ;;  %v3737_v10 = vsub.f32 %v3637_v46, %v217_v5 }
 0x107   :  { %v226_v13 = vmul.f32 %v3716_v17, %v3716_v17  ;;  %v228_v21 = vmul.f32 %v3719_v18, %v3719_v18  ;;  %v3750_v32 = vadd.f32 %v3573_v4, %v539_v53  ;;  %v3020_v42 = vpop.f32.mrb[16].mxu1  ;;  %v230_v46 = vmul.f32 %v3722_v22, %v3722_v22 }
 0x108   :  { %v227_v27 = vmul.f32 %v3728_v24, %v3728_v24  ;;  %v229_v33 = vmul.f32 %v3731_v26, %v3731_v26  ;;  %608 = vadd.xlane.f32.xlu1 %v607_v19  ;;  %v559_v38 = vpop.f32.mrb[17].mxu1  ;;  %v3758_v40 = vmul.f32 %v991_v16, %v981_v7  ;;  %v3760_v11 = vmul.f32 %v992_v30, %v983_v9 }
 0x109   :  { %v234_v39 = vadd.f32 %v228_v21, %v226_v13  ;;  %v3763_v41 = vadd.f32 %v3573_v4, %v549_v15  ;;  %v231_v43 = vmul.f32 %v3734_v36, %v3734_v36  ;;  %v3768_v45 = vadd.f32 %v3020_v42, %v3573_v4 }
 0x10a   :  { %4917 = vst [vmem:[#allocation10_spill] sm:$0xff] %v3758_v40  ;;  %4918 = vst [vmem:[#allocation11_spill] sm:$0xff] %v3760_v11  ;;  %v243_v44 = vadd.f32 %v229_v33, %v227_v27  ;;  %v613_v47 = vsel %vm95_vm0, %v3711_v6, 0.0  ;;  %v232_v50 = vmul.f32 %v3725_v23, %v3725_v23  ;;  %v604_v53 = vsel %vm95_vm0, %v3750_v32, 0.0 }
 0x10b   :  { %v235_v51 = vadd.f32 %v234_v39, %v230_v46  ;;  %614 = vadd.xlane.f32.xlu0 %v613_v47  ;;  %v233_v54 = vmul.f32 %v3737_v10, %v3737_v10  ;;  %v619_v57 = vsel %vm95_vm0, %v3768_v45, 0.0  ;;  %v3781_v62 = vadd.f32 %v3573_v4, %v559_v38  ;;  %v273_v4 = vpop.permute.xlu0 %272 }
 0x10c   :  { %v244_v56 = vadd.f32 %v243_v44, %v231_v43  ;;  %605 = vadd.xlane.f32.xlu1 %v604_v53  ;;  %v610_v0 = vsel %vm95_vm0, %v3763_v41, 0.0 }
 0x10d   :  { %v236_v61 = vadd.f32 %v235_v51, %v232_v50  ;;  %v616_v9 = vsel %vm95_vm0, %v3781_v62, 0.0  ;;  %v278_v51 = vpop.permute.xlu1 %277 }
 0x10e   :  { %v245_v1 = vadd.f32 %v244_v56, %v233_v54 }
 0x10f   :  { %v237_v19 = vrot.slane %v236_v61, 4  ;;  %620 = vadd.xlane.f32.xlu0 %v619_v57  ;;  %v310_v43 = vpop.permute.xlu0 %309 }
 0x110   :  { %v246_v5 = vrot.slane %v245_v1, 4  ;;  %611 = vadd.xlane.f32.xlu1 %v610_v0 }
 0x111   :  { %v238_v7 = vadd.f32 %v237_v19, %v236_v61 }
 0x112   :  { %v247_v15 = vadd.f32 %v246_v5, %v245_v1 }
 0x113   :  { %v239_v16 = vrot.slane %v238_v7, 2  ;;  %v283_v50 = vpop.permute.xlu0 %282 }
 0x114   :  { %v248_v30 = vrot.slane %v247_v15, 2  ;;  %617 = vadd.xlane.f32.xlu1 %v616_v9 }
 0x115   :  { %v240_v13 = vadd.f32 %v239_v16, %v238_v7 }
 0x116   :  { %v249_v21 = vadd.f32 %v248_v30, %v247_v15  ;;  %v305_v30 = vpop.permute.xlu1 %304 }
 0x117   :  { %v241_v42 = vrot.slane %v240_v13, 1  ;;  %v288_v54 = vpop.permute.xlu0 %287 }
 0x118   :  { %v250_v46 = vrot.slane %v249_v21, 1 }
 0x119   :  { %v242_v27 = vadd.f32 %v241_v42, %v240_v13 }
 0x11a   :  { %v251_v33 = vadd.f32 %v250_v46, %v249_v21 }
 0x11b   :  { %v252_v38 = vmul.f32 0.03125, %v242_v27 }
 0x11c   :  { %v253_v39 = vmul.f32 0.03125, %v251_v33 }
 0x11d   :  { %v254_v44 = vadd.f32 1e-05, %v252_v38 }
 0x11e   :  { %v255_v47 = vadd.f32 1e-05, %v253_v39 }
 0x11f   :  { %3209 = vrsqrt.f32 %v254_v44 }
 0x120   :  { %3211 = vrsqrt.f32 %v255_v47 }
 0x129   :  { %v3210_v53 = vpop.eup %3209 }
 0x12a   :  { %v3212_v56 = vpop.eup %3211  ;;  %v258_v57 = vmul.f32 %v3210_v53, %v3716_v17  ;;  %v260_v61 = vmul.f32 %v3210_v53, %v3719_v18  ;;  %v262_v0 = vmul.f32 %v3210_v53, %v3722_v22  ;;  %v264_v1 = vmul.f32 %v3210_v53, %v3725_v23  ;;  %v315_v18 = vpop.permute.xlu0 %314 }
 0x12b   :  { %v259_v19 = vmul.f32 %v3212_v56, %v3728_v24  ;;  %v261_v5 = vmul.f32 %v3212_v56, %v3731_v26  ;;  %v263_v7 = vmul.f32 %v3212_v56, %v3734_v36  ;;  %v265_v9 = vmul.f32 %v3212_v56, %v3737_v10 }
 0x12c   :  { %v290_v15 = vmul.f32 %v273_v4, %v258_v57  ;;  %v292_v16 = vmul.f32 %v278_v51, %v260_v61  ;;  %v294_v13 = vmul.f32 %v283_v50, %v262_v0  ;;  %v296_v22 = vmul.f32 %v288_v54, %v264_v1 }
 0x12d   :  { %v291_v36 = vmul.f32 %v273_v4, %v259_v19  ;;  %v293_v42 = vmul.f32 %v278_v51, %v261_v5  ;;  %v295_v46 = vmul.f32 %v283_v50, %v263_v7  ;;  %v297_v27 = vmul.f32 %v288_v54, %v265_v9 }
 0x12e   :  { %v3795_v21 = vadd.f32 %v305_v30, %v290_v15  ;;  %v3797_v17 = vadd.f32 %v310_v43, %v292_v16  ;;  %v3803_v23 = vadd.f32 %v315_v18, %v294_v13  ;;  %v320_v24 = vpop.permute.xlu0 %319 }
 0x12f   :  { %v3809_v26 = vadd.f32 %v320_v24, %v296_v22  ;;  %v3827_v10 = vadd.f32 %v305_v30, %v291_v36  ;;  %v3837_v4 = vadd.f32 %v310_v43, %v293_v42  ;;  %v3851_v33 = vadd.f32 %v315_v18, %v295_v46 }
 0x130   :  { %1050 = vrot.lane.b32.xlu1 %v3797_v17, %s3267_s2  ;;  %1048 = vrot.lane.b32.xlu0 %v3795_v21, %s3267_s2  ;;  %4919 = vst [vmem:[#allocation12_spill] sm:$0xff] %v3803_v23  ;;  %v3857_v38 = vadd.f32 %v320_v24, %v297_v27 }
 0x131   :  { %4920 = vst [vmem:[#allocation13_spill] sm:$0xff] %v3809_v26 }
 0x132   :  { %4921 = vst [vmem:[#allocation14_spill] sm:$0xff] %v3857_v38 }
 0x134   :  { %1001 = vrot.lane.b32.xlu1 %v3795_v21, %s3268_s26  ;;  %1052 = vrot.lane.b32.xlu0 %v3803_v23, %s3267_s2 }
 0x138   :  { %1260 = vrot.lane.b32.xlu1 %v3795_v21, %s3269_s20  ;;  %1054 = vrot.lane.b32.xlu0 %v3809_v26, %s3267_s2 }
 0x13c   :  { %1262 = vrot.lane.b32.xlu1 %v3797_v17, %s3269_s20  ;;  %1003 = vrot.lane.b32.xlu0 %v3797_v17, %s3268_s26 }
 0x140   :  { %1393 = vrot.lane.b32.xlu1 %v3795_v21, %s3270_s28  ;;  %1005 = vrot.lane.b32.xlu0 %v3803_v23, %s3268_s26 }
 0x144   :  { %1395 = vrot.lane.b32.xlu1 %v3797_v17, %s3270_s28  ;;  %1007 = vrot.lane.b32.xlu0 %v3809_v26, %s3268_s26 }
 0x148   :  { %1056 = vrot.lane.b32.xlu1 %v3827_v10, %s3267_s2  ;;  %1264 = vrot.lane.b32.xlu0 %v3803_v23, %s3269_s20 }
 0x14c   :  { %1009 = vrot.lane.b32.xlu1 %v3827_v10, %s3268_s26  ;;  %1266 = vrot.lane.b32.xlu0 %v3809_v26, %s3269_s20 }
 0x150   :  { %1011 = vrot.lane.b32.xlu1 %v3837_v4, %s3268_s26  ;;  %1397 = vrot.lane.b32.xlu0 %v3803_v23, %s3270_s28 }
 0x154   :  { %1268 = vrot.lane.b32.xlu1 %v3827_v10, %s3269_s20  ;;  %1399 = vrot.lane.b32.xlu0 %v3809_v26, %s3270_s28 }
 0x158   :  { %1401 = vrot.lane.b32.xlu1 %v3827_v10, %s3270_s28  ;;  %1058 = vrot.lane.b32.xlu0 %v3837_v4, %s3267_s2 }
 0x15c   :  { %1403 = vrot.lane.b32.xlu1 %v3837_v4, %s3270_s28  ;;  %1060 = vrot.lane.b32.xlu0 %v3851_v33, %s3267_s2 }
 0x160   :  { %1062 = vrot.lane.b32.xlu0 %v3857_v38, %s3267_s2 }
 0x164   :  { %1013 = vrot.lane.b32.xlu0 %v3851_v33, %s3268_s26 }
 0x168   :  { %1015 = vrot.lane.b32.xlu0 %v3857_v38, %s3268_s26 }
 0x16c   :  { %1270 = vrot.lane.b32.xlu0 %v3837_v4, %s3269_s20 }
 0x170   :  { %1272 = vrot.lane.b32.xlu0 %v3851_v33, %s3269_s20 }
 0x174   :  { %1274 = vrot.lane.b32.xlu0 %v3857_v38, %s3269_s20 }
 0x178   :  { %v573_v39 = vpop.xlane.xlu0 %572  ;;  %1405 = vrot.lane.b32.xlu0 %v3851_v33, %s3270_s28 }
 0x179   :  { %v623_v42 = vmul.f32 0.03125, %v573_v39 }
 0x17c   :  { %v579_v43 = vpop.xlane.xlu1 %578  ;;  %v570_v44 = vpop.xlane.xlu0 %569  ;;  %1407 = vrot.lane.b32.xlu0 %v3857_v38, %s3270_s28 }
 0x17d   :  { %v622_v47 = vmul.f32 0.03125, %v570_v44  ;;  %v3908_v44 = vsub.f32 %v3576_v8, %v623_v42 }
 0x17f   :  { %v3876_v50 = vsub.f32 %v3584_v12, %v622_v47  ;;  %v625_v47 = vmul.f32 0.03125, %v579_v43  ;;  %v659_v8 = vmul.f32 %v3908_v44, %v3908_v44 }
 0x180   :  { %v576_v51 = vpop.xlane.xlu0 %575 }
 0x181   :  { %v624_v53 = vmul.f32 0.03125, %v576_v51  ;;  %v582_v54 = vpop.xlane.xlu1 %581  ;;  %v658_v56 = vmul.f32 %v3876_v50, %v3876_v50 }
 0x182   :  { %v626_v57 = vmul.f32 0.03125, %v582_v54 }
 0x183   :  { %v3881_v61 = vsub.f32 %v3607_v25, %v624_v53  ;;  %v676_v0 = vsel %vm95_vm0, %v658_v56, 0.0 }
 0x184   :  { %v3885_v1 = vsub.f32 %v3621_v35, %v626_v57  ;;  %v585_v19 = vpop.xlane.xlu0 %584  ;;  %677 = vadd.xlane.f32.xlu1 %v676_v0  ;;  %v3917_v57 = vsub.f32 %v3597_v20, %v625_v47 }
 0x185   :  { %v588_v5 = vpop.xlane.xlu1 %587  ;;  %v660_v12 = vmul.f32 %v3881_v61, %v3881_v61  ;;  %v627_v0 = vmul.f32 0.03125, %v585_v19 }
 0x186   :  { %v628_v7 = vmul.f32 0.03125, %v588_v5  ;;  %v662_v15 = vmul.f32 %v3885_v1, %v3885_v1 }
 0x187   :  { %v682_v9 = vsel %vm95_vm0, %v660_v12, 0.0  ;;  %v3928_v20 = vsub.f32 %v3626_v37, %v627_v0 }
 0x188   :  { %v591_v16 = vpop.xlane.xlu0 %590  ;;  %683 = vadd.xlane.f32.xlu1 %v682_v9  ;;  %v3893_v13 = vsub.f32 %v3641_v48, %v628_v7  ;;  %v688_v22 = vsel %vm95_vm0, %v662_v15, 0.0 }
 0x189   :  { %v629_v25 = vmul.f32 0.03125, %v591_v16  ;;  %v597_v30 = vpop.xlane.xlu1 %596  ;;  %v679_v16 = vsel %vm95_vm0, %v659_v8, 0.0 }
 0x18a   :  { %v631_v18 = vmul.f32 0.03125, %v597_v30  ;;  %v664_v48 = vmul.f32 %v3893_v13, %v3893_v13 }
 0x18b   :  { %v3896_v35 = vsub.f32 %v3644_v49, %v629_v25  ;;  %v661_v25 = vmul.f32 %v3917_v57, %v3917_v57 }
 0x18c   :  { %689 = vadd.xlane.f32.xlu1 %v688_v22  ;;  %v3902_v46 = vsub.f32 %v3658_v60, %v631_v18  ;;  %v694_v53 = vsel %vm95_vm0, %v664_v48, 0.0 }
 0x18d   :  { %v594_v24 = vpop.xlane.xlu1 %593  ;;  %v665_v36 = vmul.f32 %v3896_v35, %v3896_v35  ;;  %v600_v54 = vpop.xlane.xlu0 %599  ;;  %v685_v42 = vsel %vm95_vm0, %v661_v25, 0.0 }
 0x18e   :  { %v667_v39 = vmul.f32 %v3902_v46, %v3902_v46  ;;  %v630_v19 = vmul.f32 0.03125, %v594_v24  ;;  %v632_v22 = vmul.f32 0.03125, %v600_v54 }
 0x18f   :  { %v697_v27 = vsel %vm95_vm0, %v665_v36, 0.0 }
 0x190   :  { %698 = vadd.xlane.f32.xlu1 %v697_v27  ;;  %v703_v43 = vsel %vm95_vm0, %v667_v39, 0.0  ;;  %v3940_v37 = vsub.f32 %v3670_v14, %v630_v19 }
 0x191   :  { %v603_v49 = vpop.xlane.xlu1 %602 }
 0x192   :  { %v633_v51 = vmul.f32 0.03125, %v603_v49  ;;  %v3951_v49 = vsub.f32 %v3683_v31, %v632_v22  ;;  %v666_v54 = vmul.f32 %v3940_v37, %v3940_v37 }
 0x194   :  { %v3914_v60 = vsub.f32 %v3678_v28, %v633_v51  ;;  %695 = vadd.xlane.f32.xlu1 %v694_v53  ;;  %4925 = vst [vmem:[#allocation18_spill] sm:$0xff] %v3951_v49  ;;  %v668_v31 = vmul.f32 %v3951_v49, %v3951_v49 }
 0x195   :  { %v609_v56 = vpop.xlane.xlu1 %608 }
 0x196   :  { %4922 = vst [vmem:[#allocation15_spill] sm:$0xff] %v3914_v60  ;;  %v635_v5 = vmul.f32 0.03125, %v609_v56  ;;  %v669_v12 = vmul.f32 %v3914_v60, %v3914_v60 }
 0x198   :  { %v615_v7 = vpop.xlane.xlu0 %614  ;;  %v3925_v9 = vsub.f32 %v3700_v52, %v635_v5  ;;  %704 = vadd.xlane.f32.xlu1 %v703_v43  ;;  %v709_v18 = vsel %vm95_vm0, %v669_v12, 0.0 }
 0x199   :  { %v637_v28 = vmul.f32 0.03125, %v615_v7  ;;  %v606_v15 = vpop.xlane.xlu1 %605  ;;  %v700_v7 = vsel %vm95_vm0, %v666_v54, 0.0  ;;  %v1028_v54 = vld [vmem:[%s4878_s11] ss:$8 sm:$0x3] }
 0x19a   :  { %4923 = vst [vmem:[#allocation16_spill] sm:$0xff] %v3925_v9  ;;  %v671_v52 = vmul.f32 %v3925_v9, %v3925_v9  ;;  %v634_v14 = vmul.f32 0.03125, %v606_v15 }
 0x19b   :  { %v3934_v30 = vsub.f32 %v3711_v6, %v637_v28  ;;  %680 = vadd.xlane.f32.xlu0 %v679_v16  ;;  %v663_v6 = vmul.f32 %v3928_v20, %v3928_v20 }
 0x19c   :  { %710 = vadd.xlane.f32.xlu1 %v709_v18  ;;  %v3942_v24 = vpop.xlane.xlu0 %620  ;;  %v715_v27 = vsel %vm95_vm0, %v671_v52, 0.0  ;;  %v3967_v8 = vsub.f32 %v3750_v32, %v634_v14  ;;  %v706_v32 = vsel %vm95_vm0, %v668_v31, 0.0 }
 0x19d   :  { %4924 = vst [vmem:[#allocation17_spill] sm:$0xff] %v3934_v30  ;;  %v612_v36 = vpop.xlane.xlu1 %611  ;;  %v673_v48 = vmul.f32 %v3934_v30, %v3934_v30  ;;  %v691_v39 = vsel %vm95_vm0, %v663_v6, 0.0 }
 0x19e   :  { %4927 = vst [vmem:[#allocation20_spill] sm:$0xff] %v3967_v8  ;;  %v636_v43 = vmul.f32 0.03125, %v612_v36  ;;  %v670_v25 = vmul.f32 %v3967_v8, %v3967_v8 }
 0x19f   :  { %686 = vadd.xlane.f32.xlu0 %v685_v42  ;;  %v721_v56 = vsel %vm95_vm0, %v673_v48, 0.0  ;;  %v1017_v48 = vlaneseq }
 0x1a0   :  { %716 = vadd.xlane.f32.xlu1 %v715_v27  ;;  %v3978_v19 = vsub.f32 %v3763_v41, %v636_v43  ;;  %v712_v22 = vsel %vm95_vm0, %v670_v25, 0.0 }
 0x1a1   :  { %v618_v47 = vpop.xlane.xlu1 %617 }
 0x1a2   :  { %v638_v51 = vmul.f32 0.03125, %v618_v47  ;;  %v3953_v53 = vpop.permute.xlu0 %1048  ;;  %4928 = vst [vmem:[#allocation21_spill] sm:$0xff] %v3978_v19  ;;  %v672_v36 = vmul.f32 %v3978_v19, %v3978_v19 }
 0x1a3   :  { %692 = vadd.xlane.f32.xlu0 %v691_v39 }
 0x1a4   :  { %v3960_v0 = vsub.f32 %v3781_v62, %v638_v51  ;;  %722 = vadd.xlane.f32.xlu1 %v721_v56  ;;  %v718_v6 = vsel %vm95_vm0, %v672_v36, 0.0  ;;  %v1031_v51 = vshrl.u32 %v1017_v48, 7  ;;  %v4008_v56 = vand.u32 127, %v1017_v48 }
 0x1a5   :  { %v3962_v5 = vpop.permute.xlu1 %1050 }
 0x1a6   :  { %4926 = vst [vmem:[#allocation19_spill] sm:$0xff] %v3960_v0  ;;  %v3969_v12 = vpop.permute.xlu0 %1052  ;;  %v674_v28 = vmul.f32 %v3960_v0, %v3960_v0  ;;  %v4010_v31 = vsub.s32 0, %v1031_v51  ;;  %vm1019_vm1 = vcmp.lt.s32.totalorder %v4008_v56, 17  ;;  %v4030_v36 = vsub.s32 1, %v1031_v51 }
 0x1a7   :  { %701 = vadd.xlane.f32.xlu0 %v700_v7  ;;  %vm1064_vm2 = vcmp.lt.s32.totalorder %v4008_v56, 16  ;;  %vm1276_vm3 = vcmp.lt.s32.totalorder %v4008_v56, 15  ;;  %vm1409_vm4 = vcmp.lt.s32.totalorder %v4008_v56, 1  ;;  %vm1629_vm5 = vcmp.lt.s32.totalorder %v4008_v56, 127 }
 0x1a8   :  { %v724_v62 = vsel %vm95_vm0, %v674_v28, 0.0  ;;  %v4018_v28 = vrot.slane %v1028_v54, %v4010_v31  ;;  %v4066_v19 = vrot.slane %v1028_v54, %v4030_v36  ;;  %vm1762_vm6 = vcmp.lt.s32.totalorder %v4008_v56, 113 }
 0x1a9   :  { %725 = vadd.xlane.f32.xlu1 %v724_v62  ;;  %v3975_v15 = vpop.permute.xlu1 %1001  ;;  %vm1895_vm7 = vcmp.lt.s32.totalorder %v4008_v56, 112  ;;  %vm2028_vm8 = vcmp.lt.s32.totalorder %v4008_v56, 111  ;;  %v4949_v56 = vld [vmem:[#allocation8_spill] sm:$0xff] }
 0x1aa   :  { %v3980_v16 = vpop.permute.xlu0 %1054 }
 0x1ab   :  { %707 = vadd.xlane.f32.xlu0 %v706_v32 }
 0x1ad   :  { %v3985_v18 = vpop.permute.xlu1 %1260 }
 0x1ae   :  { %v1004_v52 = vpop.permute.xlu0 %1003 }
 0x1af   :  { %713 = vadd.xlane.f32.xlu0 %v712_v22 }
 0x1b1   :  { %v3990_v42 = vpop.permute.xlu1 %1262 }
 0x1b2   :  { %v3992_v41 = vpop.permute.xlu0 %1005 }
 0x1b3   :  { %719 = vadd.xlane.f32.xlu0 %v718_v6  ;;  %v2920_v6 = vld [vmem:[%s4878_s11 + $0x1] ss:$8 sm:$0x3] }
 0x1b4   :  { %v1083_v51 = vrot.slane %v2920_v6, %v4030_v36 }
 0x1b5   :  { %v3995_v27 = vpop.permute.xlu1 %1393 }
 0x1b6   :  { %v3997_v47 = vpop.permute.xlu0 %1007 }
 0x1b9   :  { %v3999_v14 = vpop.permute.xlu1 %1395 }
 0x1ba   :  { %1613 = vrot.lane.b32.xlu1 %v3795_v21, %s3271_s30  ;;  %v4003_v39 = vpop.permute.xlu0 %1264 }
 0x1bd   :  { %v1057_v43 = vpop.permute.xlu1 %1056 }
 0x1be   :  { %1615 = vrot.lane.b32.xlu1 %v3797_v17, %s3271_s30  ;;  %v4014_v7 = vpop.permute.xlu0 %1266  ;;  %v1065_v55 = vsel %vm1064_vm2, %v3953_v53, %v1057_v43  ;;  %v1069_v59 = vsel %vm1064_vm2, %v1057_v43, %v3953_v53 }
 0x1bf   :  { %v1087_v58 = vmul.f32 %v1083_v51, %v1065_v55 }
 0x1c1   :  { %v1010_v62 = vpop.permute.xlu1 %1009 }
 0x1c2   :  { %v1024_v32 = vsel %vm1019_vm1, %v1010_v62, %v3975_v15  ;;  %1621 = vrot.lane.b32.xlu1 %v3827_v10, %s3271_s30  ;;  %v4025_v25 = vpop.permute.xlu0 %1397 }
 0x1c3   :  { %v4028_v22 = vmul.f32 %v4018_v28, %v1024_v32  ;;  %v1079_v32 = vrot.slane %v2920_v6, %v4010_v31 }
 0x1c5   :  { %v1012_v48 = vpop.permute.xlu1 %1011  ;;  %v1086_v63 = vmul.f32 %v1079_v32, %v1069_v59 }
 0x1c6   :  { %v1025_v3 = vsel %vm1019_vm1, %v1012_v48, %v1004_v52  ;;  %v4038_v40 = vpop.permute.xlu0 %1399  ;;  %v1021_v30 = vsel %vm1019_vm1, %v1004_v52, %v1012_v48  ;;  %v639_v48 = vmul.f32 0.03125, %v3942_v24 }
 0x1c7   :  { %v4041_v11 = vmul.f32 %v4018_v28, %v1025_v3 }
 0x1c9   :  { %1623 = vrot.lane.b32.xlu0 %v3837_v4, %s3271_s30 }
 0x1ca   :  { %v1059_v3 = vpop.permute.xlu0 %1058 }
 0x1cb   :  { %v1066_v34 = vsel %vm1064_vm2, %v3962_v5, %v1059_v3  ;;  %v1070_v6 = vsel %vm1064_vm2, %v1059_v3, %v3962_v5 }
 0x1cc   :  { %v1088_v2 = vmul.f32 %v1079_v32, %v1070_v6  ;;  %v1089_v0 = vmul.f32 %v1083_v51, %v1066_v34 }
 0x1cd   :  { %1617 = vrot.lane.b32.xlu0 %v3803_v23, %s3271_s30 }
 0x1ce   :  { %v3047_v53 = vpack.c.bf16 %v1088_v2, %v1086_v63  ;;  %v1061_v43 = vpop.permute.xlu0 %1060  ;;  %v3045_v29 = vpack.c.bf16 %v1089_v0, %v1087_v58  ;;  %v1020_v58 = vsel %vm1019_vm1, %v3975_v15, %v1010_v62  ;;  %v1043_v63 = vmul.f32 %v4066_v19, %v1021_v30 }
 0x1cf   :  { %v1067_v59 = vsel %vm1064_vm2, %v3969_v12, %v1061_v43  ;;  %v1071_v34 = vsel %vm1064_vm2, %v1061_v43, %v3969_v12  ;;  %v1041_v54 = vmul.f32 %v4066_v19, %v1020_v58 }
 0x1d0   :  { %3046 = vmatprep.subr.bf16.mxu0 %v3045_v29  ;;  %v1090_v0 = vmul.f32 %v1079_v32, %v1071_v34  ;;  %v1091_v5 = vmul.f32 %v1083_v51, %v1067_v59 }
 0x1d1   :  { %1619 = vrot.lane.b32.xlu0 %v3809_v26, %s3271_s30  ;;  %3048 = vmatpush1.bf16.msra.mxu0 %v3047_v53  ;;  %v3053_v30 = vpack.c.bf16 %v1043_v63, %v1041_v54 }
 0x1d2   :  { %v1063_v2 = vpop.permute.xlu0 %1062 }
 0x1d3   :  { %v1068_v29 = vsel %vm1064_vm2, %v3980_v16, %v1063_v2  ;;  %v1072_v55 = vsel %vm1064_vm2, %v1063_v2, %v3980_v16  ;;  %v4093_v16 = vsub.f32 %v3768_v45, %v639_v48  ;;  %v4169_v48 = vld [vmem:[%s4879_s9] ss:$0 sm:$0xff] }
 0x1d4   :  { %v1092_v12 = vmul.f32 %v1079_v32, %v1072_v55  ;;  %v1093_v52 = vmul.f32 %v1083_v51, %v1068_v29  ;;  %v4122_v51 = vpop.permute.xlu1 %1268 }
 0x1d5   :  { %1625 = vrot.lane.b32.xlu0 %v3851_v33, %s3271_s30  ;;  %4929 = vst [vmem:[#allocation22_spill] sm:$0xff] %v4093_v16  ;;  %v675_v32 = vmul.f32 %v4093_v16, %v4093_v16 }
 0x1d6   :  { %v3051_v15 = vpack.c.bf16 %v1092_v12, %v1090_v0  ;;  %v3049_v62 = vpack.c.bf16 %v1093_v52, %v1091_v5  ;;  %v1014_v45 = vpop.permute.xlu0 %1013 }
 0x1d7   :  { %v727_v24 = vsel %vm95_vm0, %v675_v32, 0.0  ;;  %v1022_v32 = vsel %vm1019_vm1, %v3992_v41, %v1014_v45 }
 0x1d8   :  { %3050 = vmatprep.subr.bf16.mxu0 %v3049_v62  ;;  %v4130_v6 = vpop.permute.xlu1 %1401 }
 0x1d9   :  { %1627 = vrot.lane.b32.xlu0 %v3857_v38, %s3271_s30  ;;  %3052 = vmatpush1.bf16.msra.mxu0 %v3051_v15 }
 0x1da   :  { %3054 = vmatprep.subr.bf16.mxu0 %v3053_v30  ;;  %v1016_v3 = vpop.permute.xlu0 %1015 }
 0x1db   :  { %v1023_v15 = vsel %vm1019_vm1, %v3997_v47, %v1016_v3 }
 0x1dc   :  { %v4140_v43 = vpop.permute.xlu1 %1403 }
 0x1dd   :  { %1746 = vrot.lane.b32.xlu0 %v3795_v21, %s3272_s27 }
 0x1de   :  { %v4138_v53 = vpop.permute.xlu0 %1270 }
 0x1df   :  { %v1278_v8 = vsel %vm1276_vm3, %v3990_v42, %v4138_v53 }
 0x1e1   :  { %1754 = vrot.lane.b32.xlu0 %v3827_v10, %s3272_s27 }
 0x1e2   :  { %v4148_v34 = vpop.permute.xlu0 %1272 }
 0x1e5   :  { %1756 = vrot.lane.b32.xlu0 %v3837_v4, %s3272_s27 }
 0x1e6   :  { %728 = vadd.xlane.f32.xlu1 %v727_v24  ;;  %v4154_v63 = vpop.permute.xlu0 %1274 }
 0x1e9   :  { %1750 = vrot.lane.b32.xlu0 %v3803_v23, %s3272_s27 }
 0x1ea   :  { %v4158_v0 = vpop.permute.xlu0 %1405 }
 0x1ed   :  { %1752 = vrot.lane.b32.xlu0 %v3809_v26, %s3272_s27 }
 0x1ee   :  { %v4160_v52 = vpop.permute.xlu0 %1407 }
 0x1f1   :  { %1760 = vrot.lane.b32.xlu0 %v3857_v38, %s3272_s27 }
 0x1f5   :  { %1881 = vrot.lane.b32.xlu0 %v3797_v17, %s3273_s5 }
 0x1f7   :  { %1748 = vrot.lane.b32.xlu1 %v3797_v17, %s3272_s27 }
 0x1f9   :  { %1889 = vrot.lane.b32.xlu0 %v3837_v4, %s3273_s5 }
 0x1fb   :  { %1758 = vrot.lane.b32.xlu1 %v3851_v33, %s3272_s27 }
 0x1fd   :  { %1885 = vrot.lane.b32.xlu0 %v3809_v26, %s3273_s5 }
 0x1ff   :  { %1879 = vrot.lane.b32.xlu1 %v3795_v21, %s3273_s5 }
 0x201   :  { %1893 = vrot.lane.b32.xlu0 %v3857_v38, %s3273_s5 }
 0x203   :  { %1887 = vrot.lane.b32.xlu1 %v3827_v10, %s3273_s5 }
 0x205   :  { %2014 = vrot.lane.b32.xlu0 %v3797_v17, %s3274_s19 }
 0x207   :  { %1883 = vrot.lane.b32.xlu1 %v3803_v23, %s3273_s5 }
 0x209   :  { %2022 = vrot.lane.b32.xlu0 %v3837_v4, %s3274_s19 }
 0x20b   :  { %1891 = vrot.lane.b32.xlu1 %v3851_v33, %s3273_s5 }
 0x20d   :  { %2018 = vrot.lane.b32.xlu0 %v3809_v26, %s3274_s19 }
 0x20f   :  { %2012 = vrot.lane.b32.xlu1 %v3795_v21, %s3274_s19 }
 0x211   :  { %v678_v59 = vpop.xlane.xlu1 %677  ;;  %2026 = vrot.lane.b32.xlu0 %v3857_v38, %s3274_s19 }
 0x212   :  { %v730_v62 = vmul.f32 0.03125, %v678_v59  ;;  %v4185_v59 = vld [vmem:[%s4880_s10] ss:$0 sm:$0xff] }
 0x213   :  { %2020 = vrot.lane.b32.xlu1 %v3827_v10, %s3274_s19 }
 0x215   :  { %v684_v2 = vpop.xlane.xlu1 %683 }
 0x216   :  { %v732_v58 = vmul.f32 0.03125, %v684_v2  ;;  %v4179_v2 = vld [vmem:[%s4878_s11 + $0x2] ss:$8 sm:$0x3] }
 0x217   :  { %2016 = vrot.lane.b32.xlu1 %v3803_v23, %s3274_s19  ;;  %v4201_v26 = vrot.slane %v4179_v2, %v4030_v36 }
 0x218   :  { %v750_v29 = vadd.f32 1e-05, %v732_v58 }
 0x219   :  { %v690_v55 = vpop.xlane.xlu1 %689  ;;  %v1301_v23 = vmul.f32 %v4201_v26, %v1278_v8 }
 0x21a   :  { %3213 = vrsqrt.f32 %v750_v29  ;;  %v854_v29 = vld [vmem:[%s4881_s12 + $0x10] sm:$0xff]  ;;  %v734_v49 = vmul.f32 0.03125, %v690_v55 }
 0x21b   :  { %2024 = vrot.lane.b32.xlu1 %v3851_v33, %s3274_s19 }
 0x21c   :  { %v752_v55 = vadd.f32 1e-05, %v734_v49 }
 0x21d   :  { %v699_v5 = vpop.xlane.xlu1 %698 }
 0x221   :  { %v696_v54 = vpop.xlane.xlu1 %695 }
 0x224   :  { %v3214_v12 = vpop.eup %3213 }
 0x225   :  { %v786_v30 = vmul.f32 %v3214_v12, %v3881_v61  ;;  %v1047_v61 = vmul.f32 %v4066_v19, %v1023_v15  ;;  %v1027_v12 = vsel %vm1019_vm1, %v1016_v3, %v3997_v47  ;;  %v1045_v15 = vmul.f32 %v4066_v19, %v1022_v32  ;;  %v705_v60 = vpop.xlane.xlu1 %704 }
 0x226   :  { %v1026_v47 = vsel %vm1019_vm1, %v1014_v45, %v3992_v41  ;;  %v1277_v19 = vsel %vm1276_vm3, %v3985_v18, %v4122_v51  ;;  %v4931_v45 = vmov 0.0  }
 0x227   :  { %v811_v24 = vmul.f32 %v4169_v48, %v786_v30  ;;  %v748_v30 = vadd.f32 1e-05, %v730_v62  ;;  %v1046_v62 = vmul.f32 %v4018_v28, %v1027_v12  ;;  %v1044_v41 = vmul.f32 %v4018_v28, %v1026_v47 }
 0x228   :  { %v681_v58 = vpop.xlane.xlu0 %680 }
 0x229   :  { %v836_v16 = vadd.f32 %v4185_v59, %v811_v24  ;;  %v731_v9 = vmul.f32 0.03125, %v681_v58  ;;  %v3057_v58 = vpack.c.bf16 %v1047_v61, %v1045_v15  ;;  %3215 = vrsqrt.f32 %v748_v30  ;;  %v4219_v12 = vpop.xlane.xlu1 %710 }
 0x22a   :  { %v3059_v61 = vpack.c.bf16 %v1046_v62, %v1044_v41 }
 0x22b   :  { %v872_v3 = vmul.f32 %v854_v29, %v836_v16  ;;  %v749_v32 = vadd.f32 1e-05, %v731_v9  ;;  %v4930_v16 = vpack.c.bf16 %v4041_v11, %v4028_v22  ;;  %v1299_v29 = vmul.f32 %v4201_v26, %v1277_v19 }
 0x22c   :  { %v687_v24 = vpop.xlane.xlu0 %686  ;;  %v736_v11 = vmul.f32 0.03125, %v696_v54 }
 0x22d   :  { %2921 = vmatmul.mubr.msk.f32.vlgmr.msra.gmra.mrb[16].mxu0 %vm95_vm0, %v872_v3  ;;  %v733_v38 = vmul.f32 0.03125, %v687_v24  ;;  %3217 = vrsqrt.f32 %v749_v32  ;;  %v3061_v15 = vpack.c.bf16 %v1301_v23, %v1299_v29  ;;  %v4221_v47 = vpop.xlane.xlu1 %716 }
 0x22e   :  { %3056 = vmatpush1.bf16.msra.mxu0 %v4930_v16  ;;  %1170 = vmatprep.mubr.f32.mxu0 %v4931_v45  ;;  %v754_v62 = vadd.f32 1e-05, %v736_v11 }
 0x22f   :  { %v751_v9 = vadd.f32 1e-05, %v733_v38  ;;  %3058 = vmatprep.subr.bf16.mxu0 %v3057_v58  ;;  %v737_v38 = vmul.f32 0.03125, %v699_v5  ;;  %v2928_v5 = vld [vmem:[%s4878_s11 + $0x3] ss:$8 sm:$0x3] }
 0x230   :  { %v693_v8 = vpop.xlane.xlu0 %692 }
 0x231   :  { %3219 = vrsqrt.f32 %v751_v9  ;;  %v735_v30 = vmul.f32 0.03125, %v693_v8  ;;  %v755_v58 = vadd.f32 1e-05, %v737_v38  ;;  %v4225_v41 = vpop.xlane.xlu1 %722  ;;  %v1281_v8 = vsel %vm1276_vm3, %v4122_v51, %v3985_v18 }
 0x232   :  { %3060 = vmatpush1.bf16.msra.mxu0 %v3059_v61  ;;  %3221 = vrsqrt.f32 %v752_v55  ;;  %v855_v55 = vld [vmem:[%s4881_s12 + $0x18] sm:$0xff]  ;;  %v1279_v18 = vsel %vm1276_vm3, %v4003_v39, %v4148_v34  ;;  %v1280_v51 = vsel %vm1276_vm3, %v4014_v7, %v4154_v63 }
 0x233   :  { %3062 = vmatprep.subr.bf16.mxu0 %v3061_v15  ;;  %v753_v22 = vadd.f32 1e-05, %v735_v30  ;;  %v3216_v3 = vpop.eup %3215  ;;  %v739_v30 = vmul.f32 0.03125, %v705_v60 }
 0x234   :  { %v702_v28 = vpop.xlane.xlu0 %701  ;;  %v784_v32 = vmul.f32 %v3216_v3, %v3876_v50 }
 0x235   :  { %3223 = vrsqrt.f32 %v753_v22  ;;  %v738_v54 = vmul.f32 0.03125, %v702_v28  ;;  %v4253_v28 = vrot.slane %v2928_v5, %v4010_v31 }
 0x236   :  { %3225 = vrsqrt.f32 %v754_v62  ;;  %v809_v29 = vmul.f32 %v4169_v48, %v784_v32  ;;  %v4265_v11 = vpop.xlane.xlu1 %725  ;;  %v1410_v32 = vsel %vm1409_vm4, %v3995_v27, %v4130_v6 }
 0x237   :  { %v3218_v24 = vpop.eup %3217  ;;  %3227 = vrsqrt.f32 %v755_v58  ;;  %v852_v58 = vld [vmem:[%s4881_s12] sm:$0xff] }
 0x238   :  { %v708_v19 = vpop.xlane.xlu0 %707  ;;  %v785_v9 = vmul.f32 %v3218_v24, %v3908_v44  ;;  %v1282_v44 = vsel %vm1276_vm3, %v4138_v53, %v3990_v42  ;;  %v756_v42 = vadd.f32 1e-05, %v738_v54  ;;  %v834_v60 = vadd.f32 %v4185_v59, %v809_v29 }
 0x239   :  { %v1428_v24 = vrot.slane %v2928_v5, %v4030_v36  ;;  %v1305_v54 = vmul.f32 %v4201_v26, %v1280_v51  ;;  %v757_v5 = vadd.f32 1e-05, %v739_v30  ;;  %v1414_v30 = vsel %vm1409_vm4, %v4130_v6, %v3995_v27 }
 0x23a   :  { %v810_v3 = vmul.f32 %v4169_v48, %v785_v9  ;;  %v1283_v9 = vsel %vm1276_vm3, %v4148_v34, %v4003_v39  ;;  %3229 = vrsqrt.f32 %v756_v42 }
 0x23b   :  { %v3220_v49 = vpop.eup %3219  ;;  %3231 = vrsqrt.f32 %v757_v5  ;;  %v1432_v51 = vmul.f32 %v1428_v24, %v1410_v32  ;;  %v856_v32 = vld [vmem:[%s4881_s12 + $0x20] sm:$0xff]  ;;  %v1416_v5 = vsel %vm1409_vm4, %v4158_v0, %v4025_v25 }
 0x23c   :  { %v787_v23 = vmul.f32 %v3220_v49, %v3917_v57  ;;  %v4227_v16 = vpop.xlane.xlu0 %713  ;;  %v3222_v61 = vpop.eup %3221  ;;  %v1291_v57 = vrot.slane %v4179_v2, %v4010_v31 }
 0x23d   :  { %v788_v53 = vmul.f32 %v3222_v61, %v3885_v1  ;;  %v1411_v1 = vsel %vm1409_vm4, %v3999_v14, %v4140_v43  ;;  %v740_v61 = vmul.f32 0.03125, %v708_v19 }
 0x23e   :  { %v812_v50 = vmul.f32 %v4169_v48, %v787_v23  ;;  %v1298_v62 = vmul.f32 %v1291_v57, %v1281_v8  ;;  %v1300_v49 = vmul.f32 %v1291_v57, %v1282_v44  ;;  %v1284_v23 = vsel %vm1276_vm3, %v4154_v63, %v4014_v7 }
 0x23f   :  { %v3224_v38 = vpop.eup %3223  ;;  %v813_v7 = vmul.f32 %v4169_v48, %v788_v53  ;;  %v870_v8 = vmul.f32 %v852_v58, %v834_v60  ;;  %v1304_v34 = vmul.f32 %v1291_v57, %v1284_v23  ;;  %v1434_v19 = vmul.f32 %v1428_v24, %v1411_v1 }
 0x240   :  { %v4249_v15 = vpop.xlane.xlu0 %719  ;;  %v837_v2 = vadd.f32 %v4185_v59, %v812_v50  ;;  %v1303_v50 = vmul.f32 %v4201_v26, %v1279_v18  ;;  %v789_v63 = vmul.f32 %v3224_v38, %v3928_v20  ;;  %v3226_v44 = vpop.eup %3225  ;;  %v1415_v26 = vsel %vm1409_vm4, %v4140_v43, %v3999_v14  ;;  %v853_v20 = vld [vmem:[%s4881_s12 + $0x8] sm:$0xff] }
 0x241   :  { %v3063_v39 = vpack.c.bf16 %v1300_v49, %v1298_v62  ;;  %v4309_v18 = vpop.permute.xlu1 %1613  ;;  %v1302_v42 = vmul.f32 %v1291_v57, %v1283_v9  ;;  %v1413_v14 = vsel %vm1409_vm4, %v4038_v40, %v4160_v52  ;;  %v758_v43 = vadd.f32 1e-05, %v740_v61  ;;  %v3228_v60 = vpop.eup %3227 }
 0x242   :  { %v873_v22 = vmul.f32 %v855_v55, %v837_v2  ;;  %v835_v55 = vadd.f32 %v4185_v59, %v810_v3  ;;  %v741_v2 = vmul.f32 0.03125, %v4219_v12  ;;  %v3065_v6 = vpack.c.bf16 %v1305_v54, %v1303_v50 }
 0x243   :  { %v838_v12 = vadd.f32 %v4185_v59, %v813_v7  ;;  %v790_v53 = vmul.f32 %v3226_v44, %v3893_v13  ;;  %v814_v3 = vmul.f32 %v4169_v48, %v789_v63  ;;  %v1433_v57 = vmul.f32 %v4253_v28, %v1415_v26 }
 0x244   :  { %2922 = vmatmul.mubr.msk.f32.gmra.mrb[18].mxu0 %vm95_vm0, %v873_v22  ;;  %v4286_v29 = vpop.permute.xlu0 %1623  ;;  %v871_v22 = vmul.f32 %v853_v20, %v835_v55  ;;  %v3067_v38 = vpack.c.bf16 %v1304_v34, %v1302_v42  ;;  %v1412_v62 = vsel %vm1409_vm4, %v4025_v25, %v4158_v0  ;;  %v1417_v13 = vsel %vm1409_vm4, %v4160_v52, %v4038_v40  ;;  %v3230_v63 = vpop.eup %3229 }
 0x245   :  { %1247 = vmatprep.mubr.f32.mxu0 %v4931_v45  ;;  %v1438_v49 = vmul.f32 %v1428_v24, %v1413_v14  ;;  %v759_v58 = vadd.f32 1e-05, %v741_v2  ;;  %v3069_v23 = vpack.c.bf16 %v1434_v19, %v1432_v51  ;;  %v1431_v54 = vmul.f32 %v4253_v28, %v1414_v30  ;;  %v1616_v50 = vpop.permute.xlu1 %1615  ;;  %v3232_v30 = vpop.eup %3231  ;;  %v2933_v19 = vld [vmem:[%s4878_s11 + $0x5] ss:$8 sm:$0x3] }
 0x246   :  { %v791_v9 = vmul.f32 %v3228_v60, %v3896_v35  ;;  %3233 = vrsqrt.f32 %v758_v43  ;;  %v1436_v40 = vmul.f32 %v1428_v24, %v1412_v62  ;;  %v815_v52 = vmul.f32 %v4169_v48, %v790_v53  ;;  %v857_v35 = vld [vmem:[%s4881_s12 + $0x28] sm:$0xff]  ;;  %v4932_v62 = vld [vmem:[#allocation14_spill] sm:$0xff] }
 0x247   :  { %v874_v61 = vmul.f32 %v856_v32, %v838_v12  ;;  %v839_v7 = vadd.f32 %v4185_v59, %v814_v3  ;;  %v1437_v55 = vmul.f32 %v4253_v28, %v1417_v13  ;;  %3235 = vrsqrt.f32 %v759_v58  ;;  %v4933_v58 = vld [vmem:[#allocation18_spill] sm:$0xff] }
 0x248   :  { %2923 = vmatmul.mubr.msk.f32.vlgmr.msra.gmra.mrb[16].mxu0 %vm95_vm0, %v870_v8  ;;  %v4312_v27 = vpop.permute.xlu0 %1617  ;;  %v3071_v8 = vpack.c.bf16 %v1433_v57, %v1431_v54  ;;  %v3073_v0 = vpack.c.bf16 %v1438_v49, %v1436_v40  ;;  %v1435_v24 = vmul.f32 %v4253_v28, %v1416_v5  ;;  %v816_v44 = vmul.f32 %v4169_v48, %v791_v9  ;;  %v858_v28 = vld [vmem:[%s4881_s12 + $0x30] sm:$0xff]  ;;  %v4934_v40 = vld [vmem:[#allocation12_spill] sm:$0xff] }
 0x249   :  { %3064 = vmatpush1.bf16.msra.mxu0 %v3063_v39  ;;  %1253 = vmatprep.mubr.f32.mxu0 %v4931_v45  ;;  %v840_v26 = vadd.f32 %v4185_v59, %v815_v52  ;;  %v792_v39 = vmul.f32 %v3230_v63, %v3940_v37  ;;  %v875_v34 = vmul.f32 %v857_v35, %v839_v7  ;;  %v1622_v2 = vpop.permute.xlu1 %1621  ;;  %v4935_v52 = vld [vmem:[#allocation13_spill] sm:$0xff] }
 0x24a   :  { %3066 = vmatprep.subr.bf16.mxu0 %v3065_v6  ;;  %v3075_v20 = vpack.c.bf16 %v1437_v55, %v1435_v24  ;;  %v3077_v37 = vpack.c.bf16 %v3837_v4, %v3827_v10  ;;  %v793_v51 = vmul.f32 %v3232_v30, %v3902_v46  ;;  %v1635_v42 = vsel %vm1629_vm5, %v4286_v29, %v1616_v50  ;;  %v859_v10 = vld [vmem:[%s4881_s12 + $0x38] sm:$0xff]  ;;  %v4936_v55 = vld [vmem:[#allocation15_spill] sm:$0xff] }
 0x24b   :  { %v841_v14 = vadd.f32 %v4185_v59, %v816_v44  ;;  %v817_v43 = vmul.f32 %v4169_v48, %v792_v39  ;;  %v1648_v60 = vrot.slane %v2933_v19, %v4030_v36  ;;  %v876_v12 = vmul.f32 %v858_v28, %v840_v26 }
 0x24c   :  { %2924 = vmatmul.mubr.msk.f32.gmra.mrb[18].mxu0 %vm95_vm0, %v871_v22  ;;  %v4335_v1 = vpop.permute.xlu0 %1619  ;;  %v1634_v46 = vsel %vm1629_vm5, %v1622_v2, %v4309_v18  ;;  %v3079_v53 = vpack.c.bf16 %v3797_v17, %v3795_v21  ;;  %v1644_v22 = vrot.slane %v2933_v19, %v4010_v31  ;;  %v1631_v3 = vsel %vm1629_vm5, %v1616_v50, %v4286_v29 }
 0x24d   :  { %3068 = vmatpush1.bf16.msra.mxu0 %v3067_v38  ;;  %1376 = vmatprep.mubr.f32.mxu0 %v4931_v45  ;;  %v1654_v57 = vmul.f32 %v1648_v60, %v1635_v42  ;;  %v3081_v32 = vpack.c.bf16 %v4932_v62, %v3851_v33  ;;  %v877_v21 = vmul.f32 %v859_v10, %v841_v14  ;;  %v862_v42 = vld [vmem:[%s4881_s12 + $0x50] sm:$0xff]  ;;  %v863_v10 = vld [vmem:[%s4881_s12 + $0x58] sm:$0xff] }
 0x24e   :  { %3070 = vmatprep.subr.bf16.mxu0 %v3069_v23  ;;  %v818_v17 = vmul.f32 %v4169_v48, %v793_v51  ;;  %v842_v29 = vadd.f32 %v4185_v59, %v817_v43  ;;  %v1630_v54 = vsel %vm1629_vm5, %v4309_v18, %v1622_v2  ;;  %v1652_v33 = vmul.f32 %v1648_v60, %v1634_v46 }
 0x24f   :  { %v1653_v5 = vmul.f32 %v1644_v22, %v1631_v3  ;;  %v3083_v50 = vpack.c.bf16 %v4935_v52, %v4934_v40  ;;  %v743_v43 = vmul.f32 0.03125, %v4221_v47  ;;  %v744_v3 = vmul.f32 0.03125, %v4249_v15 }
 0x250   :  { %2926 = vmatmul.mubr.msk.f32.vlgmr.msra.gmra.mrb[16].mxu0 %vm95_vm0, %v874_v61  ;;  %v4351_v25 = vpop.permute.xlu0 %1625  ;;  %v3234_v4 = vpop.eup %3233  ;;  %v860_v61 = vld [vmem:[%s4881_s12 + $0x40] sm:$0xff]  ;;  %v843_v24 = vadd.f32 %v4185_v59, %v818_v17 }
 0x251   :  { %3072 = vmatpush1.bf16.msra.mxu0 %v3071_v8  ;;  %1382 = vmatprep.mubr.f32.mxu0 %v4931_v45  ;;  %v3236_v49 = vpop.eup %3235  ;;  %v794_v23 = vmul.f32 %v3234_v4, %v4933_v58  ;;  %v1636_v9 = vsel %vm1629_vm5, %v4351_v25, %v4312_v27  ;;  %v3085_v8 = vpack.c.bf16 %v1654_v57, %v1652_v33  ;;  %v761_v46 = vadd.f32 1e-05, %v743_v43  ;;  %v2936_v57 = vld [vmem:[%s4878_s11 + $0x6] ss:$8 sm:$0x3] }
 0x252   :  { %3074 = vmatprep.subr.bf16.mxu0 %v3073_v0  ;;  %v795_v35 = vmul.f32 %v3236_v49, %v4936_v55  ;;  %v1651_v0 = vmul.f32 %v1644_v22, %v1630_v54  ;;  %v1656_v30 = vmul.f32 %v1648_v60, %v1636_v9  ;;  %v878_v26 = vmul.f32 %v860_v61, %v842_v29 }
 0x253   :  { %v819_v44 = vmul.f32 %v4169_v48, %v794_v23  ;;  %v1781_v17 = vrot.slane %v2936_v57, %v4030_v36  ;;  %v745_v49 = vmul.f32 0.03125, %v4225_v41  ;;  %v762_v29 = vadd.f32 1e-05, %v744_v3  ;;  %v4937_v23 = vld [vmem:[#allocation20_spill] sm:$0xff] }
 0x254   :  { %2927 = vmatmul.mubr.msk.f32.gmra.mrb[18].mxu0 %vm95_vm0, %v875_v34  ;;  %v1628_v6 = vpop.permute.xlu0 %1627  ;;  %v3087_v39 = vpack.c.bf16 %v1653_v5, %v1651_v0  ;;  %v746_v43 = vmul.f32 0.03125, %v4265_v11  ;;  %v865_v11 = vld [vmem:[%s4881_s12 + $0x68] sm:$0xff] }
 0x255   :  { %3076 = vmatpush1.bf16.msra.mxu0 %v3075_v20  ;;  %1509 = vmatprep.mubr.f32.mxu0 %v4931_v45  ;;  %v1637_v13 = vsel %vm1629_vm5, %v1628_v6, %v4335_v1  ;;  %v1633_v7 = vsel %vm1629_vm5, %v4335_v1, %v1628_v6  ;;  %v1632_v1 = vsel %vm1629_vm5, %v4312_v27, %v4351_v25  ;;  %v861_v20 = vld [vmem:[%s4881_s12 + $0x48] sm:$0xff]  ;;  %v742_v27 = vmul.f32 0.03125, %v4227_v16 }
 0x256   :  { %3078 = vmatprep.subr.bf16.mxu0 %v3077_v37  ;;  %v1658_v18 = vmul.f32 %v1648_v60, %v1637_v13  ;;  %v1657_v34 = vmul.f32 %v1644_v22, %v1633_v7  ;;  %v1655_v2 = vmul.f32 %v1644_v22, %v1632_v1  ;;  %v844_v6 = vadd.f32 %v4185_v59, %v819_v44 }
 0x257   :  { %v879_v25 = vmul.f32 %v861_v20, %v843_v24  ;;  %v820_v37 = vmul.f32 %v4169_v48, %v795_v35  ;;  %v760_v60 = vadd.f32 1e-05, %v742_v27 }
 0x258   :  { %2929 = vmatmul.mubr.msk.f32.vlgmr.msra.gmra.mrb[16].mxu0 %vm95_vm0, %v876_v12  ;;  %v4389_v38 = vpop.permute.xlu0 %1746  ;;  %v3089_v28 = vpack.c.bf16 %v1658_v18, %v1656_v30  ;;  %v3091_v51 = vpack.c.bf16 %v1657_v34, %v1655_v2  ;;  %v880_v12 = vmul.f32 %v862_v42, %v844_v6  ;;  %v763_v18 = vadd.f32 1e-05, %v745_v49  ;;  %v4939_v49 = vld [vmem:[#allocation21_spill] sm:$0xff] }
 0x259   :  { %3080 = vmatpush1.bf16.msra.mxu0 %v3079_v53  ;;  %1515 = vmatprep.mubr.f32.mxu0 %v4931_v45  ;;  %v845_v16 = vadd.f32 %v4185_v59, %v820_v37  ;;  %3237 = vrsqrt.f32 %v760_v60 }
 0x25a   :  { %3082 = vmatprep.subr.bf16.mxu0 %v3081_v32  ;;  %3239 = vrsqrt.f32 %v761_v46 }
 0x25b   :  { %v881_v53 = vmul.f32 %v863_v10, %v845_v16  ;;  %3241 = vrsqrt.f32 %v762_v29 }
 0x25c   :  { %2930 = vmatmul.mubr.msk.f32.gmra.mrb[18].mxu0 %vm95_vm0, %v877_v21  ;;  %v1755_v63 = vpop.permute.xlu0 %1754  ;;  %v1777_v21 = vrot.slane %v2936_v57, %v4010_v31  ;;  %3243 = vrsqrt.f32 %v763_v18 }
 0x25d   :  { %3084 = vmatpush1.bf16.msra.mxu0 %v3083_v50  ;;  %1596 = vmatprep.mubr.f32.mxu0 %v4931_v45  ;;  %v1763_v15 = vsel %vm1762_vm6, %v4389_v38, %v1755_v63  ;;  %v1767_v58 = vsel %vm1762_vm6, %v1755_v63, %v4389_v38 }
 0x25e   :  { %3086 = vmatprep.subr.bf16.mxu0 %v3085_v8  ;;  %v1784_v41 = vmul.f32 %v1777_v21, %v1763_v15  ;;  %v1785_v52 = vmul.f32 %v1781_v17, %v1767_v58  ;;  %v4938_v8 = vld [vmem:[#allocation16_spill] sm:$0xff] }
 0x260   :  { %v1757_v19 = vpop.permute.xlu0 %1756  ;;  %2931 = vmatmul.mubr.msk.f32.vlgmr.msra.gmra.mrb[16].mxu0 %vm95_vm0, %v878_v26 }
 0x261   :  { %3088 = vmatpush1.bf16.msra.mxu0 %v3087_v39  ;;  %1602 = vmatprep.mubr.f32.mxu0 %v4931_v45 }
 0x262   :  { %3090 = vmatprep.subr.bf16.mxu0 %v3089_v28 }
 0x263   :  { %v3238_v32 = vpop.eup %3237 }
 0x264   :  { %v1751_v14 = vpop.permute.xlu0 %1750  ;;  %2932 = vmatmul.mubr.msk.f32.gmra.mrb[18].mxu0 %vm95_vm0, %v879_v25  ;;  %v796_v54 = vmul.f32 %v3238_v32, %v4937_v23  ;;  %v3240_v5 = vpop.eup %3239 }
 0x265   :  { %3092 = vmatpush1.bf16.msra.mxu0 %v3091_v51  ;;  %1729 = vmatprep.mubr.f32.mxu0 %v4931_v45  ;;  %v797_v55 = vmul.f32 %v3240_v5, %v4938_v8  ;;  %v864_v51 = vld [vmem:[%s4881_s12 + $0x60] sm:$0xff]  ;;  %v3242_v46 = vpop.eup %3241 }
 0x266   :  { %v821_v35 = vmul.f32 %v4169_v48, %v796_v54  ;;  %v798_v29 = vmul.f32 %v3242_v46, %v4939_v49 }
 0x267   :  { %v822_v37 = vmul.f32 %v4169_v48, %v797_v55 }
 0x268   :  { %v1753_v4 = vpop.permute.xlu0 %1752  ;;  %2934 = vmatmul.mubr.msk.f32.vlgmr.msra.gmra.mrb[16].mxu0 %vm95_vm0, %v880_v12  ;;  %v846_v28 = vadd.f32 %v4185_v59, %v821_v35 }
 0x269   :  { %1735 = vmatprep.mubr.f32.mxu0 %v4931_v45 }
 0x26a   :  { %v882_v10 = vmul.f32 %v864_v51, %v846_v28 }
 0x26c   :  { %v1761_v22 = vpop.permute.xlu0 %1760  ;;  %2935 = vmatmul.mubr.msk.f32.gmra.mrb[18].mxu0 %vm95_vm0, %v881_v53 }
 0x26d   :  { %1862 = vmatprep.mubr.f32.mxu0 %v4931_v45  ;;  %v1766_v38 = vsel %vm1762_vm6, %v1753_v4, %v1761_v22  ;;  %v1770_v63 = vsel %vm1762_vm6, %v1761_v22, %v1753_v4  ;;  %v847_v4 = vadd.f32 %v4185_v59, %v822_v37 }
 0x26e   :  { %v1790_v26 = vmul.f32 %v1777_v21, %v1766_v38  ;;  %v1791_v39 = vmul.f32 %v1781_v17, %v1770_v63 }
 0x26f   :  { %v883_v23 = vmul.f32 %v865_v11, %v847_v4 }
 0x270   :  { %v1882_v47 = vpop.permute.xlu0 %1881 }
 0x273   :  { %v4451_v62 = vpop.xlane.xlu1 %728 }
 0x274   :  { %v1890_v13 = vpop.permute.xlu0 %1889 }
 0x275   :  { %v1897_v60 = vsel %vm1895_vm7, %v1882_v47, %v1890_v13  ;;  %v1901_v12 = vsel %vm1895_vm7, %v1890_v13, %v1882_v47 }
 0x277   :  { %v1749_v33 = vpop.permute.xlu1 %1748 }
 0x278   :  { %v1764_v9 = vsel %vm1762_vm6, %v1749_v33, %v1757_v19  ;;  %v1768_v40 = vsel %vm1762_vm6, %v1757_v19, %v1749_v33  ;;  %v4467_v7 = vpop.permute.xlu0 %1885  ;;  %v2939_v19 = vld [vmem:[%s4878_s11 + $0x7] ss:$8 sm:$0x3]  ;;  %v3244_v33 = vpop.eup %3243 }
 0x279   :  { %v1786_v50 = vmul.f32 %v1777_v21, %v1764_v9  ;;  %v1787_v61 = vmul.f32 %v1781_v17, %v1768_v40  ;;  %v1910_v42 = vrot.slane %v2939_v19, %v4010_v31  ;;  %v4940_v40 = vld [vmem:[#allocation17_spill] sm:$0xff] }
 0x27b   :  { %v3095_v0 = vpack.c.bf16 %v1786_v50, %v1784_v41  ;;  %v1759_v24 = vpop.permute.xlu1 %1758  ;;  %v3093_v44 = vpack.c.bf16 %v1787_v61, %v1785_v52  ;;  %v1919_v3 = vmul.f32 %v1910_v42, %v1897_v60  ;;  %v799_v41 = vmul.f32 %v3244_v33, %v4940_v40  ;;  %v868_v40 = vld [vmem:[%s4881_s12 + $0x80] sm:$0xff] }
 0x27c   :  { %v1765_v1 = vsel %vm1762_vm6, %v1751_v14, %v1759_v24  ;;  %v1769_v30 = vsel %vm1762_vm6, %v1759_v24, %v1751_v14  ;;  %v1894_v6 = vpop.permute.xlu0 %1893  ;;  %v1914_v14 = vrot.slane %v2939_v19, %v4030_v36  ;;  %v823_v52 = vmul.f32 %v4169_v48, %v798_v29 }
 0x27d   :  { %v1788_v34 = vmul.f32 %v1777_v21, %v1765_v1  ;;  %v1789_v20 = vmul.f32 %v1781_v17, %v1769_v30  ;;  %3094 = vmatprep.subr.bf16.mxu0 %v3093_v44  ;;  %v764_v21 = vadd.f32 1e-05, %v746_v43  ;;  %v747_v17 = vmul.f32 0.03125, %v4451_v62 }
 0x27e   :  { %3096 = vmatpush1.bf16.msra.mxu0 %v3095_v0  ;;  %v1920_v57 = vmul.f32 %v1914_v14, %v1901_v12  ;;  %v1899_v9 = vsel %vm1895_vm7, %v4467_v7, %v1894_v6  ;;  %v1903_v62 = vsel %vm1895_vm7, %v1894_v6, %v4467_v7  ;;  %v2942_v7 = vld [vmem:[%s4878_s11 + $0x10] ss:$8 sm:$0x3]  ;;  %v848_v0 = vadd.f32 %v4185_v59, %v823_v52 }
 0x27f   :  { %v3099_v2 = vpack.c.bf16 %v1790_v26, %v1788_v34  ;;  %v1880_v27 = vpop.permute.xlu1 %1879  ;;  %v3097_v25 = vpack.c.bf16 %v1791_v39, %v1789_v20  ;;  %3245 = vrsqrt.f32 %v764_v21  ;;  %v765_v5 = vadd.f32 1e-05, %v747_v17  ;;  %v866_v26 = vld [vmem:[%s4881_s12 + $0x70] sm:$0xff] }
 0x280   :  { %v2015_v32 = vpop.permute.xlu0 %2014  ;;  %v1923_v63 = vmul.f32 %v1910_v42, %v1899_v9  ;;  %v1924_v8 = vmul.f32 %v1914_v14, %v1903_v62  ;;  %v824_v30 = vmul.f32 %v4169_v48, %v799_v41  ;;  %v4531_v39 = vrot.slane %v2942_v7, %v4010_v31 }
 0x281   :  { %3098 = vmatprep.subr.bf16.mxu0 %v3097_v25  ;;  %3247 = vrsqrt.f32 %v765_v5  ;;  %v4534_v34 = vrot.slane %v2942_v7, %v4030_v36  ;;  %v884_v6 = vmul.f32 %v866_v26, %v848_v0 }
 0x282   :  { %3100 = vmatpush1.bf16.msra.mxu0 %v3099_v2 }
 0x283   :  { %v1888_v16 = vpop.permute.xlu1 %1887 }
 0x284   :  { %v1896_v53 = vsel %vm1895_vm7, %v1880_v27, %v1888_v16  ;;  %v1900_v22 = vsel %vm1895_vm7, %v1888_v16, %v1880_v27  ;;  %v2023_v50 = vpop.permute.xlu0 %2022  ;;  %v849_v27 = vadd.f32 %v4185_v59, %v824_v30  ;;  %v4941_v16 = vld [vmem:[#allocation19_spill] sm:$0xff] }
 0x285   :  { %v1917_v47 = vmul.f32 %v1910_v42, %v1896_v53  ;;  %v1918_v13 = vmul.f32 %v1914_v14, %v1900_v22  ;;  %2937 = vmatmul.mubr.msk.f32.vlgmr.msra.gmra.mrb[16].mxu0 %vm95_vm0, %v882_v10  ;;  %v2030_v19 = vsel %vm2028_vm8, %v2015_v32, %v2023_v50  ;;  %v2034_v28 = vsel %vm2028_vm8, %v2023_v50, %v2015_v32  ;;  %v869_v50 = vld [vmem:[%s4881_s12 + $0x88] sm:$0xff] }
 0x286   :  { %1868 = vmatprep.mubr.f32.mxu0 %v4931_v45  ;;  %v2053_v43 = vmul.f32 %v4534_v34, %v2034_v28 }
 0x287   :  { %v3103_v15 = vpack.c.bf16 %v1919_v3, %v1917_v47  ;;  %v1884_v58 = vpop.permute.xlu1 %1883  ;;  %v3101_v54 = vpack.c.bf16 %v1920_v57, %v1918_v13  ;;  %v4942_v13 = vld [vmem:[#allocation22_spill] sm:$0xff] }
 0x288   :  { %v2019_v20 = vpop.permute.xlu0 %2018 }
 0x289   :  { %2938 = vmatmul.mubr.msk.f32.gmra.mrb[18].mxu0 %vm95_vm0, %v883_v23  ;;  %3102 = vmatprep.subr.bf16.mxu0 %v3101_v54  ;;  %v3246_v25 = vpop.eup %3245 }
 0x28a   :  { %3104 = vmatpush1.bf16.msra.mxu0 %v3103_v15  ;;  %1995 = vmatprep.mubr.f32.mxu0 %v4931_v45  ;;  %v800_v10 = vmul.f32 %v3246_v25, %v4941_v16 }
 0x28b   :  { %v1892_v61 = vpop.permute.xlu1 %1891  ;;  %v3248_v3 = vpop.eup %3247 }
 0x28c   :  { %v1898_v18 = vsel %vm1895_vm7, %v1884_v58, %v1892_v61  ;;  %v1902_v38 = vsel %vm1895_vm7, %v1892_v61, %v1884_v58  ;;  %v2027_v4 = vpop.permute.xlu0 %2026  ;;  %v825_v47 = vmul.f32 %v4169_v48, %v800_v10  ;;  %v801_v21 = vmul.f32 %v3248_v3, %v4942_v13  ;;  %v4944_v13 = vld [vmem:[#allocation4_spill] sm:$0xff] }
 0x28d   :  { %v1921_v55 = vmul.f32 %v1910_v42, %v1898_v18  ;;  %v1922_v35 = vmul.f32 %v1914_v14, %v1902_v38  ;;  %v867_v42 = vld [vmem:[%s4881_s12 + $0x78] sm:$0xff]  ;;  %v2052_v14 = vmul.f32 %v4531_v39, %v2030_v19  ;;  %v2032_v57 = vsel %vm2028_vm8, %v2019_v20, %v2027_v4 }
 0x28e   :  { %v885_v22 = vmul.f32 %v867_v42, %v849_v27  ;;  %v2036_v32 = vsel %vm2028_vm8, %v2027_v4, %v2019_v20  ;;  %v2056_v15 = vmul.f32 %v4531_v39, %v2032_v57  ;;  %v850_v33 = vadd.f32 %v4185_v59, %v825_v47  ;;  %v4943_v47 = vld [vmem:[#allocation3_spill] sm:$0xff] }
 0x28f   :  { %v3107_v24 = vpack.c.bf16 %v1923_v63, %v1921_v55  ;;  %v2013_v44 = vpop.permute.xlu1 %2012  ;;  %v3105_v1 = vpack.c.bf16 %v1924_v8, %v1922_v35  ;;  %v2057_v58 = vmul.f32 %v4534_v34, %v2036_v32  ;;  %v826_v62 = vmul.f32 %v4169_v48, %v801_v21  ;;  %v2256_v32 = vld [vmem:[%s4883_s15] sm:$0xff] }
 0x290   :  { %v886_v41 = vmul.f32 %v868_v40, %v850_v33  ;;  %v965_v21 = vadd.f32 %v4944_v13, %v4943_v47  ;;  %v2951_v13 = vld [vmem:[%s4878_s11 + $0x6] ss:$8 sm:$0x3] }
 0x291   :  { %3106 = vmatprep.subr.bf16.mxu0 %v3105_v1  ;;  %v851_v52 = vadd.f32 %v4185_v59, %v826_v62 }
 0x292   :  { %3108 = vmatpush1.bf16.msra.mxu0 %v3107_v24 }
 0x293   :  { %v2021_v2 = vpop.permute.xlu1 %2020  ;;  %v887_v61 = vmul.f32 %v869_v50, %v851_v52 }
 0x294   :  { %v2029_v37 = vsel %vm2028_vm8, %v2013_v44, %v2021_v2  ;;  %v2033_v51 = vsel %vm2028_vm8, %v2021_v2, %v2013_v44 }
 0x295   :  { %v2050_v60 = vmul.f32 %v4531_v39, %v2029_v37  ;;  %v2051_v12 = vmul.f32 %v4534_v34, %v2033_v51  ;;  %2940 = vmatmul.mubr.msk.f32.vlgmr.msra.gmra.mrb[16].mxu0 %vm95_vm0, %v884_v6 }
 0x296   :  { %2001 = vmatprep.mubr.f32.mxu0 %v4931_v45 }
 0x297   :  { %v3111_v46 = vpack.c.bf16 %v2052_v14, %v2050_v60  ;;  %v2017_v53 = vpop.permute.xlu1 %2016  ;;  %v3109_v11 = vpack.c.bf16 %v2053_v43, %v2051_v12 }
 0x299   :  { %2941 = vmatmul.mubr.msk.f32.gmra.mrb[18].mxu0 %vm95_vm0, %v885_v22  ;;  %3110 = vmatprep.subr.bf16.mxu0 %v3109_v11  ;;  %v2180_v11 = vld [vmem:[%s4882_s14] sm:$0xf] }
 0x29a   :  { %3112 = vmatpush1.bf16.msra.mxu0 %v3111_v46  ;;  %2128 = vmatprep.mubr.f32.mxu0 %v4931_v45 }
 0x29b   :  { %v2025_v17 = vpop.permute.xlu1 %2024 }
 0x29c   :  { %v2031_v49 = vsel %vm2028_vm8, %v2017_v53, %v2025_v17  ;;  %v2035_v29 = vsel %vm2028_vm8, %v2025_v17, %v2017_v53  ;;  %v986_v17 = vld [vmem:[%s4877_s13 + $0x8] sm:$0xff] }
 0x29d   :  { %v2054_v23 = vmul.f32 %v4531_v39, %v2031_v49  ;;  %v2055_v54 = vmul.f32 %v4534_v34, %v2035_v29  ;;  %v2257_v49 = vld [vmem:[%s4883_s15 + $0x8] sm:$0xff]  ;;  %v994_v29 = vmul.f32 %v986_v17, %v965_v21 }
 0x29f   :  { %v3115_v5 = vpack.c.bf16 %v2056_v15, %v2054_v23  ;;  %v3113_v9 = vpack.c.bf16 %v2057_v58, %v2055_v54 }
 0x2a1   :  { %3114 = vmatprep.subr.bf16.mxu0 %v3113_v9 }
 0x2a2   :  { %3116 = vmatpush1.bf16.msra.mxu0 %v3115_v5 }
 0x2a5   :  { %2943 = vmatmul.mubr.msk.f32.vlgmr.msra.gmra.mrb[16].mxu0 %vm95_vm0, %v886_v41 }
 0x2a6   :  { %2134 = vmatprep.mubr.f32.mxu0 %v4931_v45 }
 0x2a9   :  { %2944 = vmatmul.mubr.msk.f32.gmra.mrb[18].mxu0 %vm95_vm0, %v887_v61 }
 0x378   :  { %v2130_v48 = vpop.f32.mrb[16].mxu0 }
 0x379   :  { %v2145_v18 = vmul.f32 0.058925565, %v2130_v48  ;;  %v2132_v38 = vpop.f32.mrb[17].mxu0 }
 0x37a   :  { %v2146_v63 = vmul.f32 0.058925565, %v2132_v38 }
 0x37c   :  { %v2149_v8 = vmax.f32 %v2145_v18, %v2146_v63  ;;  %v2136_v55 = vpop.f32.mrb[18].mxu0 }
 0x37d   :  { %v2147_v35 = vmul.f32 0.058925565, %v2136_v55  ;;  %v2138_v7 = vpop.f32.mrb[19].mxu0 }
 0x37e   :  { %v2148_v59 = vmul.f32 0.058925565, %v2138_v7  ;;  %2150 = vmax.xlane.f32.xlu1 %v2149_v8 }
 0x380   :  { %v2152_v0 = vmax.f32 %v2147_v35, %v2148_v59 }
 0x382   :  { %2153 = vmax.xlane.f32.xlu0 %v2152_v0 }
 0x40b   :  { %v2151_v24 = vpop.xlane.xlu1 %2150 }
 0x40f   :  { %v2154_v44 = vpop.xlane.xlu0 %2153 }
 0x410   :  { %v2155_v1 = vmax.f32 %v2151_v24, %v2154_v44  ;;  %v2754_v44 = vld [vmem:[%s4884_s17] sm:$0xff] }
 0x412   :  { %v2156_v30 = vrot.slane %v2155_v1, 4 }
 0x414   :  { %v2157_v26 = vmax.f32 %v2155_v1, %v2156_v30  ;;  %v2755_v1 = vld [vmem:[%s4884_s17 + $0x8] sm:$0xff]  ;;  %v2756_v30 = vld [vmem:[%s4884_s17 + $0x10] sm:$0xff] }
 0x416   :  { %v2158_v20 = vrot.slane %v2157_v26, 2 }
 0x418   :  { %v2159_v19 = vmax.f32 %v2157_v26, %v2158_v20  ;;  %v2757_v26 = vld [vmem:[%s4884_s17 + $0x18] sm:$0xff] }
 0x41a   :  { %v2160_v28 = vrot.slane %v2159_v19, 1 }
 0x41c   :  { %v2161_v2 = vmax.f32 %v2159_v19, %v2160_v28 }
 0x41e   :  { %v2162_v6 = vsub.f32 %v2145_v18, %v2161_v2  ;;  %v2163_v27 = vsub.f32 %v2146_v63, %v2161_v2  ;;  %v2164_v25 = vsub.f32 %v2147_v35, %v2161_v2  ;;  %v2165_v37 = vsub.f32 %v2148_v59, %v2161_v2 }
 0x420   :  { %v2166_v51 = vmul.f32 1.442695, %v2162_v6  ;;  %v2168_v42 = vmul.f32 1.442695, %v2163_v27  ;;  %v2170_v14 = vmul.f32 1.442695, %v2164_v25 }
 0x421   :  { %v2172_v43 = vmul.f32 1.442695, %v2165_v37 }
 0x422   :  { %3249 = vpow2.f32 %v2166_v51 }
 0x423   :  { %3251 = vpow2.f32 %v2168_v42 }
 0x424   :  { %3253 = vpow2.f32 %v2170_v14 }
 0x425   :  { %3255 = vpow2.f32 %v2172_v43 }
 0x42c   :  { %v3250_v60 = vpop.eup %3249 }
 0x42d   :  { %v3252_v12 = vpop.eup %3251  ;;  %v2349_v52 = vmul.f32 %v3250_v60, %v3250_v60 }
 0x42e   :  { %v3254_v16 = vpop.eup %3253  ;;  %v2174_v10 = vmax.f32 %v3250_v60, %v3252_v12  ;;  %v2350_v61 = vmul.f32 %v3252_v12, %v3252_v12 }
 0x42f   :  { %v3256_v4 = vpop.eup %3255  ;;  %v3119_v46 = vpack.c.bf16 %v3254_v16, %v3250_v60  ;;  %v2351_v63 = vmul.f32 %v3254_v16, %v3254_v16 }
 0x430   :  { %v2177_v53 = vmax.f32 %v3254_v16, %v3256_v4  ;;  %v3117_v22 = vpack.c.bf16 %v3256_v4, %v3252_v12  ;;  %2175 = vmax.xlane.f32.xlu0 %v2174_v10  ;;  %v2352_v55 = vmul.f32 %v3256_v4, %v3256_v4  ;;  %v2950_v16 = vld [vmem:[%s4878_s11 + $0x7] ss:$8 sm:$0x3] }
 0x432   :  { %2178 = vmax.xlane.f32.xlu1 %v2177_v53  ;;  %3118 = vmatprep.subr.bf16.mxu1 %v3117_v22  ;;  %v2402_v22 = vrot.slane %v2950_v16, %v4010_v31 }
 0x433   :  { %3120 = vmatpush1.bf16.msra.mxu1 %v3119_v46 }
 0x436   :  { %2945 = vmatmul.mubr.msk.f32.vlgmr.msra.gmra.mrb[18].mxu1 %vm2181_vm9, %v2180_v11  ;;  %v2406_v11 = vrot.slane %v2950_v16, %v4030_v36 }
 0x437   :  { %2336 = vmatprep.mubr.f32.mxu1 %v4931_v45 }
 0x4bd   :  { %v2176_v15 = vpop.xlane.xlu0 %2175 }
 0x4bf   :  { %v2179_v5 = vpop.xlane.xlu1 %2178 }
 0x509   :  { %v2251_v3 = vpop.f32.mrb[18].mxu1 }
 0x50a   :  { %v2253_v57 = vpop.f32.mrb[19].mxu1 }
 0x50b   :  { %2946 = vmatprep.subr.msk.mxu1 %vm2265_vm10, %v2253_v57 }
 0x50c   :  { %2947 = vmatpush1.msk.msra.mxu1 %vm2265_vm10, %v2251_v3 }
 0x50d   :  { %2948 = vmatmul.mubr.msk.f32.vlgmr.msra.gmra.mrb[20].mxu1 %vm2258_vm11, %v2256_v32 }
 0x50e   :  { %2342 = vmatprep.mubr.f32.mxu1 %v4931_v45 }
 0x511   :  { %2949 = vmatmul.mubr.msk.f32.gmra.mrb[22].mxu1 %vm2258_vm11, %v2257_v49 }
 0x512   :  { %2956 = vmatprep.mubr.msk.f32.mxu1 %vm2181_vm9, %v994_v29 }
 0x5e0   :  { %v2338_v58 = vpop.f32.mrb[20].mxu1 }
 0x5e1   :  { %v2353_v23 = vmul.f32 %v2338_v58, %v2176_v15  ;;  %v2340_v54 = vpop.f32.mrb[21].mxu1 }
 0x5e2   :  { %v2354_v33 = vmul.f32 %v2340_v54, %v2176_v15 }
 0x5e3   :  { %3257 = vrcp.f32 %v2353_v23 }
 0x5e4   :  { %3259 = vrcp.f32 %v2354_v33  ;;  %v2344_v9 = vpop.f32.mrb[22].mxu1  ;;  %v2434_v33 = vrot.slane %v2951_v13, %v4010_v31 }
 0x5e5   :  { %v2355_v62 = vmul.f32 %v2344_v9, %v2179_v5  ;;  %v2346_v40 = vpop.f32.mrb[23].mxu1 }
 0x5e6   :  { %v2356_v41 = vmul.f32 %v2346_v40, %v2179_v5  ;;  %v2438_v5 = vrot.slane %v2951_v13, %v4030_v36  ;;  %v2952_v40 = vld [vmem:[%s4878_s11 + $0x5] ss:$8 sm:$0x3] }
 0x5e7   :  { %3261 = vrcp.f32 %v2355_v62 }
 0x5e8   :  { %3263 = vrcp.f32 %v2356_v41 }
 0x5ed   :  { %v3258_v50 = vpop.eup %3257 }
 0x5ee   :  { %v3260_v48 = vpop.eup %3259  ;;  %v4601_v18 = vmul.f32 %v3258_v50, %v2349_v52 }
 0x5ef   :  { %v4603_v38 = vmul.f32 %v3260_v48, %v2350_v61 }
 0x5f0   :  { %2385 = vrot.lane.b32.xlu1 %v4601_v18, %s3273_s5  ;;  %2365 = vrot.lane.b32.xlu0 %v4601_v18, %s3274_s19 }
 0x5f1   :  { %v3262_v8 = vpop.eup %3261 }
 0x5f2   :  { %v3264_v35 = vpop.eup %3263  ;;  %v4609_v7 = vmul.f32 %v3262_v8, %v2351_v63 }
 0x5f3   :  { %v4611_v59 = vmul.f32 %v3264_v35, %v2352_v55  ;;  %v2466_v35 = vrot.slane %v2952_v40, %v4010_v31 }
 0x5f4   :  { %2417 = vrot.lane.b32.xlu1 %v4601_v18, %s3272_s27  ;;  %2387 = vrot.lane.b32.xlu0 %v4609_v7, %s3273_s5  ;;  %v3139_v0 = vpack.c.bf16 %v4609_v7, %v4601_v18 }
 0x5f5   :  { %v3137_v24 = vpack.c.bf16 %v4611_v59, %v4603_v38 }
 0x5f8   :  { %2449 = vrot.lane.b32.xlu1 %v4601_v18, %s3271_s30  ;;  %2419 = vrot.lane.b32.xlu0 %v4609_v7, %s3272_s27 }
 0x5fc   :  { %2369 = vrot.lane.b32.xlu1 %v4603_v38, %s3274_s19  ;;  %2451 = vrot.lane.b32.xlu0 %v4609_v7, %s3271_s30 }
 0x600   :  { %2389 = vrot.lane.b32.xlu1 %v4603_v38, %s3273_s5  ;;  %2487 = vrot.lane.b32.xlu0 %v4609_v7, %s3270_s28 }
 0x604   :  { %2421 = vrot.lane.b32.xlu1 %v4603_v38, %s3272_s27  ;;  %2519 = vrot.lane.b32.xlu0 %v4609_v7, %s3269_s20 }
 0x608   :  { %2453 = vrot.lane.b32.xlu1 %v4603_v38, %s3271_s30  ;;  %2551 = vrot.lane.b32.xlu0 %v4609_v7, %s3267_s2 }
 0x60c   :  { %2367 = vrot.lane.b32.xlu1 %v4609_v7, %s3274_s19  ;;  %2371 = vrot.lane.b32.xlu0 %v4611_v59, %s3274_s19 }
 0x610   :  { %2485 = vrot.lane.b32.xlu1 %v4601_v18, %s3270_s28  ;;  %2391 = vrot.lane.b32.xlu0 %v4611_v59, %s3273_s5 }
 0x614   :  { %2489 = vrot.lane.b32.xlu1 %v4603_v38, %s3270_s28  ;;  %2423 = vrot.lane.b32.xlu0 %v4611_v59, %s3272_s27 }
 0x618   :  { %2517 = vrot.lane.b32.xlu1 %v4601_v18, %s3269_s20  ;;  %2455 = vrot.lane.b32.xlu0 %v4611_v59, %s3271_s30 }
 0x61c   :  { %2521 = vrot.lane.b32.xlu1 %v4603_v38, %s3269_s20  ;;  %2583 = vrot.lane.b32.xlu0 %v4609_v7, %s3268_s26 }
 0x620   :  { %2549 = vrot.lane.b32.xlu1 %v4601_v18, %s3267_s2  ;;  %2491 = vrot.lane.b32.xlu0 %v4611_v59, %s3270_s28 }
 0x624   :  { %2553 = vrot.lane.b32.xlu1 %v4603_v38, %s3267_s2  ;;  %2523 = vrot.lane.b32.xlu0 %v4611_v59, %s3269_s20 }
 0x628   :  { %2581 = vrot.lane.b32.xlu1 %v4601_v18, %s3268_s26  ;;  %2555 = vrot.lane.b32.xlu0 %v4611_v59, %s3267_s2 }
 0x62c   :  { %2585 = vrot.lane.b32.xlu1 %v4603_v38, %s3268_s26  ;;  %2587 = vrot.lane.b32.xlu0 %v4611_v59, %s3268_s26  ;;  %v2955_v38 = vld [vmem:[%s4878_s11 + $0x1] ss:$8 sm:$0x3] }
 0x630   :  { %2760 = vperm.xlu1 %3208, %v2754_v44   ;;  %2765 = vperm.xlu0 %3207, %v2755_v1   ;;  %v2470_v44 = vrot.slane %v2952_v40, %v4030_v36 }
 0x634   :  { %2770 = vperm.xlu1 %3208, %v2756_v30   ;;  %2775 = vperm.xlu0 %3207, %v2757_v26  }
 0x662   :  { %v2386_v20 = vpop.permute.xlu1 %2385  ;;  %v2366_v19 = vpop.permute.xlu0 %2365 }
 0x666   :  { %v2418_v28 = vpop.permute.xlu1 %2417  ;;  %v2388_v2 = vpop.permute.xlu0 %2387 }
 0x66a   :  { %v2450_v6 = vpop.permute.xlu1 %2449  ;;  %v2420_v27 = vpop.permute.xlu0 %2419 }
 0x66e   :  { %v2370_v25 = vpop.permute.xlu1 %2369  ;;  %v2452_v37 = vpop.permute.xlu0 %2451 }
 0x66f   :  { %v2373_v10 = vsel %vm2028_vm8, %v2366_v19, %v2370_v25  ;;  %v2375_v4 = vsel %vm2028_vm8, %v2370_v25, %v2366_v19 }
 0x670   :  { %v2377_v32 = vmul.f32 %v2373_v10, %v4531_v39  ;;  %v2378_v47 = vmul.f32 %v2375_v4, %v4534_v34 }
 0x672   :  { %v2390_v51 = vpop.permute.xlu1 %2389  ;;  %v4689_v42 = vpop.permute.xlu0 %2487 }
 0x673   :  { %v2393_v49 = vsel %vm1895_vm7, %v2386_v20, %v2390_v51  ;;  %v2395_v29 = vsel %vm1895_vm7, %v2390_v51, %v2386_v20 }
 0x674   :  { %v2410_v62 = vmul.f32 %v2406_v11, %v2395_v29 }
 0x676   :  { %v2422_v14 = vpop.permute.xlu1 %2421  ;;  %v4691_v43 = vpop.permute.xlu0 %2519 }
 0x677   :  { %v2425_v50 = vsel %vm1762_vm6, %v2418_v28, %v2422_v14  ;;  %v2427_v61 = vsel %vm1762_vm6, %v2422_v14, %v2418_v28 }
 0x678   :  { %v2441_v26 = vmul.f32 %v2434_v33, %v2425_v50  ;;  %v2442_v20 = vmul.f32 %v2438_v5, %v2427_v61 }
 0x67a   :  { %v2454_v60 = vpop.permute.xlu1 %2453  ;;  %v4693_v12 = vpop.permute.xlu0 %2551 }
 0x67b   :  { %v2457_v28 = vsel %vm1629_vm5, %v2450_v6, %v2454_v60  ;;  %v2459_v25 = vsel %vm1629_vm5, %v2454_v60, %v2450_v6  ;;  %v2953_v6 = vld [vmem:[%s4878_s11 + $0x3] ss:$8 sm:$0x3] }
 0x67c   :  { %v2506_v13 = vrot.slane %v2953_v6, %v4030_v36 }
 0x67e   :  { %v2368_v46 = vpop.permute.xlu1 %2367  ;;  %v2372_v53 = vpop.permute.xlu0 %2371 }
 0x67f   :  { %v2374_v3 = vsel %vm2028_vm8, %v2368_v46, %v2372_v53  ;;  %v2376_v57 = vsel %vm2028_vm8, %v2372_v53, %v2368_v46  ;;  %v2473_v46 = vmul.f32 %v2466_v35, %v2457_v28  ;;  %v2474_v53 = vmul.f32 %v2470_v44, %v2459_v25 }
 0x680   :  { %v2379_v21 = vmul.f32 %v2374_v3, %v4531_v39  ;;  %v2380_v17 = vmul.f32 %v2376_v57, %v4534_v34  ;;  %v2409_v34 = vmul.f32 %v2402_v22, %v2393_v49 }
 0x682   :  { %v3123_v15 = vpack.c.bf16 %v2379_v21, %v2377_v32  ;;  %v2486_v58 = vpop.permute.xlu1 %2485  ;;  %v2392_v23 = vpop.permute.xlu0 %2391  ;;  %v3121_v54 = vpack.c.bf16 %v2380_v17, %v2378_v47  ;;  %v2502_v47 = vrot.slane %v2953_v6, %v4010_v31 }
 0x683   :  { %v2394_v9 = vsel %vm1895_vm7, %v2388_v2, %v2392_v23  ;;  %v2396_v39 = vsel %vm1895_vm7, %v2392_v23, %v2388_v2 }
 0x684   :  { %v2411_v41 = vmul.f32 %v2402_v22, %v2394_v9  ;;  %v2412_v52 = vmul.f32 %v2406_v11, %v2396_v39  ;;  %3122 = vmatprep.subr.bf16.mxu1 %v3121_v54 }
 0x685   :  { %3124 = vmatpush1.bf16.msra.mxu1 %v3123_v15 }
 0x686   :  { %v3127_v48 = vpack.c.bf16 %v2411_v41, %v2409_v34  ;;  %v2490_v63 = vpop.permute.xlu1 %2489  ;;  %v2424_v8 = vpop.permute.xlu0 %2423  ;;  %v3125_v55 = vpack.c.bf16 %v2412_v52, %v2410_v62  ;;  %v2566_v41 = vrot.slane %v2955_v38, %v4010_v31  ;;  %v2570_v52 = vrot.slane %v2955_v38, %v4030_v36  ;;  %v2750_v38 = vld [vmem:[%s4885_s16] sm:$0xff] }
 0x687   :  { %v2426_v1 = vsel %vm1762_vm6, %v2420_v27, %v2424_v8  ;;  %v2428_v30 = vsel %vm1762_vm6, %v2424_v8, %v2420_v27  ;;  %v2493_v21 = vsel %vm1409_vm4, %v2486_v58, %v2490_v63  ;;  %v2495_v17 = vsel %vm1409_vm4, %v2490_v63, %v2486_v58 }
 0x688   :  { %v2443_v19 = vmul.f32 %v2434_v33, %v2426_v1  ;;  %v2444_v2 = vmul.f32 %v2438_v5, %v2428_v30  ;;  %3126 = vmatprep.subr.bf16.mxu1 %v3125_v55  ;;  %v2509_v58 = vmul.f32 %v2502_v47, %v2495_v17  ;;  %v2510_v5 = vmul.f32 %v2506_v13, %v2493_v21 }
 0x689   :  { %3128 = vmatpush1.bf16.msra.mxu1 %v3127_v48 }
 0x68a   :  { %v3131_v51 = vpack.c.bf16 %v2443_v19, %v2441_v26  ;;  %v2518_v14 = vpop.permute.xlu1 %2517  ;;  %v2456_v16 = vpop.permute.xlu0 %2455  ;;  %v3129_v10 = vpack.c.bf16 %v2444_v2, %v2442_v20 }
 0x68b   :  { %v2458_v4 = vsel %vm1629_vm5, %v2452_v37, %v2456_v16  ;;  %v2460_v27 = vsel %vm1629_vm5, %v2456_v16, %v2452_v37  ;;  %v2954_v37 = vld [vmem:[%s4878_s11 + $0x2] ss:$8 sm:$0x3] }
 0x68c   :  { %v2475_v22 = vmul.f32 %v2466_v35, %v2458_v4  ;;  %v2476_v11 = vmul.f32 %v2470_v44, %v2460_v27  ;;  %3130 = vmatprep.subr.bf16.mxu1 %v3129_v10  ;;  %v2534_v15 = vrot.slane %v2954_v37, %v4010_v31  ;;  %v2538_v23 = vrot.slane %v2954_v37, %v4030_v36  ;;  %v4951_v37 = vld [vmem:[#allocation10_spill] sm:$0xff] }
 0x68d   :  { %3132 = vmatpush1.bf16.msra.mxu1 %v3131_v51 }
 0x68e   :  { %v3135_v60 = vpack.c.bf16 %v2475_v22, %v2473_v46  ;;  %v2522_v3 = vpop.permute.xlu1 %2521  ;;  %v4749_v57 = vpop.permute.xlu0 %2583  ;;  %v3133_v32 = vpack.c.bf16 %v2476_v11, %v2474_v53 }
 0x68f   :  { %v2525_v59 = vsel %vm1276_vm3, %v2518_v14, %v2522_v3 }
 0x690   :  { %3134 = vmatprep.subr.bf16.mxu1 %v3133_v32  ;;  %v2542_v63 = vmul.f32 %v2538_v23, %v2525_v59  ;;  %v4946_v32 = vld [vmem:[#allocation7_spill] sm:$0xff]  ;;  %v2751_v59 = vld [vmem:[%s4885_s16 + $0x8] sm:$0xff] }
 0x691   :  { %3136 = vmatpush1.bf16.msra.mxu1 %v3135_v60 }
 0x692   :  { %v2550_v49 = vpop.permute.xlu1 %2549  ;;  %3138 = vmatprep.subr.bf16.mxu1 %v3137_v24  ;;  %v2492_v29 = vpop.permute.xlu0 %2491  ;;  %v2527_v24 = vsel %vm1276_vm3, %v2522_v3, %v2518_v14  ;;  %v4945_v3 = vld [vmem:[#allocation5_spill] sm:$0xff] }
 0x693   :  { %v2494_v54 = vsel %vm1409_vm4, %v4689_v42, %v2492_v29  ;;  %v2496_v33 = vsel %vm1409_vm4, %v2492_v29, %v4689_v42  ;;  %v2541_v48 = vmul.f32 %v2534_v15, %v2527_v24  ;;  %v2752_v24 = vld [vmem:[%s4885_s16 + $0x10] sm:$0xff] }
 0x694   :  { %v2511_v9 = vmul.f32 %v2502_v47, %v2496_v33  ;;  %v2512_v39 = vmul.f32 %v2506_v13, %v2494_v54  ;;  %v4947_v47 = vld [vmem:[#allocation6_spill] sm:$0xff]  ;;  %v4948_v13 = vld [vmem:[#allocation9_spill] sm:$0xff] }
 0x695   :  { %3140 = vmatpush1.bf16.msra.mxu1 %v3139_v0  ;;  %v2593_v0 = vld [vmem:[%s4878_s11] ss:$8 sm:$0x3] }
 0x696   :  { %v3143_v34 = vpack.c.bf16 %v2511_v9, %v2509_v58  ;;  %v2554_v42 = vpop.permute.xlu1 %2553  ;;  %v2524_v62 = vpop.permute.xlu0 %2523  ;;  %v3141_v40 = vpack.c.bf16 %v2512_v39, %v2510_v5  ;;  %v2598_v20 = vrot.slane %v2593_v0, %v4010_v31  ;;  %v2602_v19 = vrot.slane %v2593_v0, %v4030_v36 }
 0x697   :  { %v2526_v50 = vsel %vm1276_vm3, %v4691_v43, %v2524_v62  ;;  %v2528_v61 = vsel %vm1276_vm3, %v2524_v62, %v4691_v43  ;;  %v2557_v8 = vsel %vm1064_vm2, %v2550_v49, %v2554_v42  ;;  %v2559_v55 = vsel %vm1064_vm2, %v2554_v42, %v2550_v49 }
 0x698   :  { %v2543_v18 = vmul.f32 %v2534_v15, %v2528_v61  ;;  %v2544_v7 = vmul.f32 %v2538_v23, %v2526_v50  ;;  %3142 = vmatprep.subr.bf16.mxu1 %v3141_v40  ;;  %v2573_v2 = vmul.f32 %v2566_v41, %v2559_v55  ;;  %v2574_v28 = vmul.f32 %v2570_v52, %v2557_v8 }
 0x699   :  { %3144 = vmatpush1.bf16.msra.mxu1 %v3143_v34  ;;  %v2753_v34 = vld [vmem:[%s4885_s16 + $0x18] sm:$0xff] }
 0x69a   :  { %v3147_v35 = vpack.c.bf16 %v2543_v18, %v2541_v48  ;;  %v2582_v44 = vpop.permute.xlu1 %2581  ;;  %v2556_v1 = vpop.permute.xlu0 %2555  ;;  %v3145_v43 = vpack.c.bf16 %v2544_v7, %v2542_v63 }
 0x69b   :  { %v2558_v30 = vsel %vm1064_vm2, %v4693_v12, %v2556_v1  ;;  %v2560_v26 = vsel %vm1064_vm2, %v2556_v1, %v4693_v12 }
 0x69c   :  { %v2575_v25 = vmul.f32 %v2566_v41, %v2560_v26  ;;  %v2576_v51 = vmul.f32 %v2570_v52, %v2558_v30  ;;  %3146 = vmatprep.subr.bf16.mxu1 %v3145_v43 }
 0x69d   :  { %3148 = vmatpush1.bf16.msra.mxu1 %v3147_v35 }
 0x69e   :  { %v3151_v14 = vpack.c.bf16 %v2575_v25, %v2573_v2  ;;  %v2586_v16 = vpop.permute.xlu1 %2585  ;;  %v2588_v10 = vpop.permute.xlu0 %2587  ;;  %v3149_v4 = vpack.c.bf16 %v2576_v51, %v2574_v28 }
 0x69f   :  { %v2589_v27 = vsel %vm1019_vm1, %v2582_v44, %v2586_v16  ;;  %v2591_v12 = vsel %vm1019_vm1, %v2586_v16, %v2582_v44  ;;  %v2590_v31 = vsel %vm1019_vm1, %v4749_v57, %v2588_v10  ;;  %v2592_v36 = vsel %vm1019_vm1, %v2588_v10, %v4749_v57  ;;  %v4950_v57 = vld [vmem:[#allocation11_spill] sm:$0xff] }
 0x6a0   :  { %v2605_v46 = vmul.f32 %v2598_v20, %v2591_v12  ;;  %v2606_v53 = vmul.f32 %v2602_v19, %v2589_v27  ;;  %v2607_v22 = vmul.f32 %v2598_v20, %v2592_v36  ;;  %v2608_v11 = vmul.f32 %v2602_v19, %v2590_v31  ;;  %3150 = vmatprep.subr.bf16.mxu1 %v3149_v4 }
 0x6a1   :  { %3152 = vmatpush1.bf16.msra.mxu1 %v3151_v14 }
 0x6a2   :  { %v3155_v6 = vpack.c.bf16 %v2607_v22, %v2605_v46  ;;  %v3153_v60 = vpack.c.bf16 %v2608_v11, %v2606_v53 }
 0x6a4   :  { %3154 = vmatprep.subr.bf16.mxu1 %v3153_v60 }
 0x6a5   :  { %3156 = vmatpush1.bf16.msra.mxu1 %v3155_v6 }
 0x6a8   :  { %2726 = vmatmul.mubr.f32.vlgmr.msra.gmra.mrb[24].mxu1 %v4945_v3 }
 0x6a9   :  { %2957 = vmatprep.mubr.msk.f32.mxu1 %vm2181_vm9, %v4946_v32 }
 0x6ac   :  { %2732 = vmatmul.mubr.f32.gmra.mrb[26].mxu1 %v4947_v47 }
 0x6ad   :  { %2958 = vmatprep.mubr.msk.f32.mxu1 %vm2181_vm9, %v4948_v13 }
 0x6af   :  { %v2761_v42 = vpop.permute.xlu1 %2760  ;;  %v2766_v50 = vpop.permute.xlu0 %2765 }
 0x6b0   :  { %2738 = vmatmul.mubr.f32.gmra.mrb[28].mxu1 %v4949_v56 }
 0x6b1   :  { %2959 = vmatprep.mubr.msk.f32.mxu1 %vm2181_vm9, %v4950_v57 }
 0x6b3   :  { %v2771_v18 = vpop.permute.xlu1 %2770  ;;  %v2776_v35 = vpop.permute.xlu0 %2775 }
 0x6b4   :  { %2744 = vmatmul.mubr.f32.gmra.mrb[30].mxu1 %v4951_v37 }
 0x6b5   :  { %2854 = vmatprep.mubr.f32.mxu1 %v4931_v45 }
 0x77b   :  { %v2727_v21 = vpop.f32.mrb[24].mxu1 }
 0x77c   :  { %v2729_v17 = vpop.f32.mrb[25].mxu1 }
 0x77f   :  { %v2733_v49 = vpop.f32.mrb[26].mxu1 }
 0x780   :  { %v3159_v29 = vpack.c.bf16 %v2733_v49, %v2727_v21  ;;  %v2735_v15 = vpop.f32.mrb[27].mxu1 }
 0x781   :  { %v3157_v23 = vpack.c.bf16 %v2735_v15, %v2729_v17 }
 0x783   :  { %v2739_v54 = vpop.f32.mrb[28].mxu1  ;;  %3158 = vmatprep.subr.bf16.mxu1 %v3157_v23 }
 0x784   :  { %v2741_v33 = vpop.f32.mrb[29].mxu1  ;;  %3160 = vmatpush1.bf16.msra.mxu1 %v3159_v29 }
 0x787   :  { %v2745_v58 = vpop.f32.mrb[30].mxu1 }
 0x788   :  { %v3163_v5 = vpack.c.bf16 %v2745_v58, %v2739_v54  ;;  %v2747_v9 = vpop.f32.mrb[31].mxu1 }
 0x789   :  { %v3161_v39 = vpack.c.bf16 %v2747_v9, %v2741_v33 }
 0x78b   :  { %3162 = vmatprep.subr.bf16.mxu1 %v3161_v39 }
 0x78c   :  { %3164 = vmatpush1.bf16.msra.mxu1 %v3163_v5 }
 0x78f   :  { %2960 = vmatmul.mubr.msk.f32.vlgmr.msra.gmra.mrb[32].mxu1 %vm95_vm0, %v2750_v38 }
 0x790   :  { %2860 = vmatprep.mubr.f32.mxu1 %v4931_v45 }
 0x793   :  { %2961 = vmatmul.mubr.msk.f32.gmra.mrb[34].mxu1 %vm95_vm0, %v2751_v59 }
 0x794   :  { %2866 = vmatprep.mubr.f32.mxu1 %v4931_v45 }
 0x797   :  { %2962 = vmatmul.mubr.msk.f32.gmra.mrb[36].mxu1 %vm95_vm0, %v2752_v24 }
 0x798   :  { %2872 = vmatprep.mubr.f32.mxu1 %v4931_v45 }
 0x79b   :  { %2963 = vmatmul.mubr.msk.f32.gmra.mrb[38].mxu1 %vm95_vm0, %v2753_v34 }
 0x862   :  { %v2856_v62 = vpop.f32.mrb[32].mxu1 }
 0x863   :  { %v2857_v40 = vadd.f32 %v2856_v62, %v2761_v42  ;;  %v2858_v41 = vpop.f32.mrb[33].mxu1 }
 0x864   :  { %v2859_v52 = vadd.f32 %v2858_v41, %v2761_v42 }
 0x865   :  { %2879 = vst [vmem:[%s4886_s18] sm:$0xff] %v2857_v40 }
 0x866   :  { %2880 = vst [vmem:[%s4886_s18 + $0x8] sm:$0xff] %v2859_v52  ;;  %v2862_v45 = vpop.f32.mrb[34].mxu1 }
 0x867   :  { %v2863_v61 = vadd.f32 %v2862_v45, %v2766_v50  ;;  %v2864_v48 = vpop.f32.mrb[35].mxu1 }
 0x868   :  { %v2865_v63 = vadd.f32 %v2864_v48, %v2766_v50 }
 0x869   :  { %2881 = vst [vmem:[%s4886_s18 + $0x10] sm:$0xff] %v2863_v61 }
 0x86a   :  { %2882 = vst [vmem:[%s4886_s18 + $0x18] sm:$0xff] %v2865_v63  ;;  %v2868_v7 = vpop.f32.mrb[36].mxu1 }
 0x86b   :  { %v2869_v0 = vadd.f32 %v2868_v7, %v2771_v18  ;;  %v2870_v8 = vpop.f32.mrb[37].mxu1 }
 0x86c   :  { %v2871_v55 = vadd.f32 %v2870_v8, %v2771_v18 }
 0x86d   :  { %2883 = vst [vmem:[%s4886_s18 + $0x20] sm:$0xff] %v2869_v0 }
 0x86e   :  { %2884 = vst [vmem:[%s4886_s18 + $0x28] sm:$0xff] %v2871_v55  ;;  %v2874_v44 = vpop.f32.mrb[38].mxu1 }
 0x86f   :  { %v2875_v1 = vadd.f32 %v2874_v44, %v2776_v35  ;;  %v2876_v43 = vpop.f32.mrb[39].mxu1 }
 0x870   :  { %v2877_v30 = vadd.f32 %v2876_v43, %v2776_v35 }
 0x871   :  { %2885 = vst [vmem:[%s4886_s18 + $0x30] sm:$0xff] %v2875_v1 }
 0x872   :  { %2886 = vst [vmem:[%s4886_s18 + $0x38] sm:$0xff] %v2877_v30 }

</bundles_post_ra>
